<compile_context>
chip_gen: v6e
topology: v6e:2x2x1
jax: 0.10.0
libtpu: 0.0.40
codegen_flags: <defaults>
</compile_context>

<pallas_src>
import jax
import jax.numpy as jnp
import numpy as np
from jax.experimental import pallas as pl
from jax.experimental.pallas import tpu as pltpu

EPS = 1e-5


# ---------------- Pallas kernel ----------------

def make_fused_conv_kernel(N, H, W, Cin, KH, KW, stride, padding, dilation, Ho, Wo):
    """Fused: BN-affine + ReLU + zero-pad + per-tap (conv || residual) matmuls + bias."""
    pad = padding
    M = N * Ho * Wo
    T = KH * KW  # number of conv taps; tap index T is the residual 1x1 tap

    def kernel(x_ref, scale_ref, shift_ref, w_ref, b_ref, o_ref, ypad_ref):
        # x_ref:     (N, H, W, Cin)        original (un-normalized) input, f32
        # scale/shift: (1, Cin)            folded global-batch-stat BN affine, f32
        # w_ref:     (T+1, Cin, CPAD)      bf16 per-tap conv weights + residual 1x1 slab,
        #                                  output channels zero-padded to 128 lanes
        # b_ref:     (1, CPAD)             f32 zero-padded conv bias
        # o_ref:     (M, CPAD)             f32 lane-dense output block, M = N*Ho*Wo
        # ypad_ref:  (N, H+2p, W+2p, Cin)  f32 VMEM scratch: zero-padded BN+ReLU activations
        x = x_ref[...]
        y = jnp.maximum(x * scale_ref[...] + shift_ref[...], 0.0)

        # Single grid step => zero-fill of the halo and interior write happen exactly once.
        if pad > 0:
            ypad_ref[...] = jnp.zeros_like(ypad_ref)
        ypad_ref[:, pad:pad + H, pad:pad + W, :] = y

        # Init output block with the conv bias (lane-dense, unmasked stores).
        o_ref[...] = jnp.broadcast_to(b_ref[...], (M, o_ref.shape[-1]))

        # Per-tap accumulate on the MXU (f32 accumulation into the VMEM output block).
        for kh in range(KH):
            for kw in range(KW):
                t = kh * KW + kw
                h0, w0 = kh * dilation, kw * dilation
                if stride == 1:
                    tile = ypad_ref[:, h0:h0 + Ho, w0:w0 + Wo, :]
                else:
                    # TODO(synk): strided-window path (stride > 1) is untested.
                    tile = ypad_ref[:, pl.ds(h0, Ho, stride), pl.ds(w0, Wo, stride), :]
                lhs = tile.reshape(M, Cin).astype(jnp.bfloat16)
                o_ref[...] += jnp.dot(lhs, w_ref[t],
                                      preferred_element_type=jnp.float32)

        # Residual 1x1 conv acts on the ORIGINAL (pre-BN) input.
        if stride == 1:
            xr = x
        else:
            xr = x_ref[:, pl.ds(0, Ho, stride), pl.ds(0, Wo, stride), :]
        o_ref[...] += jnp.dot(xr.reshape(M, Cin).astype(jnp.bfloat16), w_ref[T],
                              preferred_element_type=jnp.float32)

    return kernel


# ---------------- wrapper ----------------

def res_block_forward(x_nchw, params, *, stride=1, padding=0, dilation=1):
    """Forward of ResBlock.  x_nchw: (N, Cin, H, W).  Returns NCHW output."""
    N, Cin, H, W = x_nchw.shape
    gamma = params["gamma"].astype(jnp.float32)
    beta = params["beta"].astype(jnp.float32)
    w_conv = params["w_conv"].astype(jnp.float32)
    b_conv = params["b_conv"].astype(jnp.float32)
    w_res = params.get("w_res", None)
    Cout, _, KH, KW = w_conv.shape

    Hp, Wp = H + 2 * padding, W + 2 * padding
    Ho = (Hp - dilation * (KH - 1) - 1) // stride + 1
    Wo = (Wp - dilation * (KW - 1) - 1) // stride + 1
    # module contract: main and residual branches must produce the same spatial size
    assert Ho == (H - 1) // stride + 1 and Wo == (W - 1) // stride + 1

    x_f32 = x_nchw.astype(jnp.float32)

    # BatchNorm batch statistics (training mode): plain jnp, two-pass mean / E[(x-mean)^2]
    # (numerically stable), computed on NCHW directly so XLA fuses it with the transpose.
    mean = jnp.mean(x_f32, axis=(0, 2, 3))
    var = jnp.mean((x_f32 - mean.reshape(1, Cin, 1, 1)) ** 2, axis=(0, 2, 3))
    scale = gamma * jax.lax.rsqrt(var + EPS)          # fold BN + affine into scale/shift
    shift = beta - mean * scale

    # TODO(synk): for large inputs, accept NHWC from the producer (this transpose is an
    # extra HBM round-trip of x).
    x_nhwc = jnp.transpose(x_f32, (0, 2, 3, 1))       # (N, H, W, Cin)

    # Weight prep: per-tap conv slabs stacked with the residual 1x1 slab along a leading
    # tap axis; output channels zero-padded to a dense 128-lane dim; cast to bf16.
    cpad = ((Cout + 127) // 128) * 128
    w_taps = jnp.transpose(w_conv, (2, 3, 1, 0)).reshape(KH * KW, Cin, Cout)
    if w_res is not None:
        wr = jnp.transpose(w_res.astype(jnp.float32), (2, 3, 1, 0)).reshape(1, Cin, Cout)
    else:
        assert Cin == Cout, "identity residual requires Cin == Cout"
        wr = jnp.eye(Cin, dtype=jnp.float32).reshape(1, Cin, Cout)
    w_stack = jnp.concatenate([w_taps, wr], axis=0)                        # (T+1, Cin, Cout)
    w_stack = (jnp.zeros((KH * KW + 1, Cin, cpad), jnp.float32)
               .at[:, :, :Cout].set(w_stack)).astype(jnp.bfloat16)
    b_pad = jnp.zeros((1, cpad), jnp.float32).at[:, :Cout].set(b_conv.reshape(1, Cout))

    M = N * Ho * Wo
    kernel = make_fused_conv_kernel(N, H, W, Cin, KH, KW, stride, padding, dilation, Ho, Wo)

    # Single grid step: the whole batch forms one M = N*Ho*Wo matmul, amortizing the
    # per-step pipeline cost on 1-TC chips (v5e/v6e).
    # TODO(synk): on v7x (2 TCs) / large feature maps, add a 'parallel' Ho-tile grid axis
    # with a haloed index_map and budget VMEM against the 64 MiB limit (vmem_limit_bytes).
    out_p = pl.pallas_call(
        kernel,
        out_shape=jax.ShapeDtypeStruct((M, cpad), jnp.float32),
        grid=(1,),
        in_specs=[
            pl.BlockSpec((N, H, W, Cin), lambda i: (0, 0, 0, 0)),
            pl.BlockSpec((1, Cin), lambda i: (0, 0)),
            pl.BlockSpec((1, Cin), lambda i: (0, 0)),
            pl.BlockSpec((KH * KW + 1, Cin, cpad), lambda i: (0, 0, 0)),
            pl.BlockSpec((1, cpad), lambda i: (0, 0)),
        ],
        out_specs=pl.BlockSpec((M, cpad), lambda i: (0, 0)),
        scratch_shapes=[pltpu.VMEM((N, Hp, Wp, Cin), jnp.float32)],
        compiler_params=pltpu.CompilerParams(dimension_semantics=("arbitrary",)),
    )(x_nhwc, scale.reshape(1, Cin), shift.reshape(1, Cin), w_stack, b_pad)

    out = out_p[:, :Cout].reshape(N, Ho, Wo, Cout)
    return jnp.transpose(out, (0, 3, 1, 2))            # back to NCHW


# ---------------- pure-JAX reference ----------------

def ref_forward(x_nchw, params, stride, padding):
    x = x_nchw.astype(jnp.float32)
    mean = jnp.mean(x, axis=(0, 2, 3), keepdims=True)
    var = jnp.mean((x - mean) ** 2, axis=(0, 2, 3), keepdims=True)
    g = params["gamma"].reshape(1, -1, 1, 1)
    b = params["beta"].reshape(1, -1, 1, 1)
    y = jnp.maximum((x - mean) * jax.lax.rsqrt(var + EPS) * g + b, 0.0)
    out = jax.lax.conv_general_dilated(
        y, params["w_conv"], window_strides=(stride, stride),
        padding=[(padding, padding)] * 2,
        dimension_numbers=("NCHW", "OIHW", "NCHW"))
    out = out + params["b_conv"].reshape(1, -1, 1, 1)
    res = jax.lax.conv_general_dilated(
        x, params["w_res"], window_strides=(stride, stride), padding=[(0, 0)] * 2,
        dimension_numbers=("NCHW", "OIHW", "NCHW"))
    return out + res


# ---------------- main ----------------

if __name__ == "__main__":
    # ResBlock(in_channels=4, out_channels=8, kernel_size=3, stride=1, padding=1)
    # -> conv_residual is a 1x1 conv because in_channels != out_channels.
    N, Cin, H, W = 2, 4, 16, 16
    Cout, K, stride, padding = 8, 3, 1, 1

    key = jax.random.PRNGKey(0)
    ks = jax.random.split(key, 6)
    x = jax.random.normal(ks[0], (N, Cin, H, W), jnp.float32)

    params = dict(
        gamma=1.0 + 0.1 * jax.random.normal(ks[1], (Cin,), jnp.float32),
        beta=0.1 * jax.random.normal(ks[2], (Cin,), jnp.float32),
        w_conv=0.1 * jax.random.normal(ks[3], (Cout, Cin, K, K), jnp.float32),
        b_conv=0.1 * jax.random.normal(ks[4], (Cout,), jnp.float32),
        w_res=0.1 * jax.random.normal(ks[5], (Cout, Cin, 1, 1), jnp.float32),
    )

    out = res_block_forward(x, params, stride=stride, padding=padding)
    out = jax.block_until_ready(out)

    ref = ref_forward(x, params, stride, padding)
    # bf16 MXU operands (f32 accumulation) -> slightly relaxed tolerance vs pure-f32 ref.
    np.testing.assert_allclose(np.asarray(out), np.asarray(ref), rtol=2e-2, atol=2e-2)
    print("KERNEL_OK")
</pallas_src>

<mosaic_0001>
module attributes {stable_mosaic.version = 11 : i64} {
  func.func @kernel(%arg0: i32, %arg1: memref<2x16x16x4xf32, #tpu.memory_space<vmem>>, %arg2: memref<1x4xf32, #tpu.memory_space<vmem>>, %arg3: memref<1x4xf32, #tpu.memory_space<vmem>>, %arg4: memref<10x4x128xbf16, #tpu.memory_space<vmem>>, %arg5: memref<1x128xf32, #tpu.memory_space<vmem>>, %arg6: memref<512x128xf32, #tpu.memory_space<vmem>>, %arg7: memref<2x18x18x4xf32, #tpu.memory_space<vmem>>) attributes {dimension_semantics = [#tpu.dimension_semantics<arbitrary>], iteration_bounds = array<i64: 1>, scalar_prefetch = 0 : i64, scratch_operands = 1 : i64, tpu.core_type = #tpu.core_type<tc>, window_params = [{pipeline_mode = #tpu.pipeline_mode<synchronous>, transform_indices = @transform_0, window_bounds = array<i64: 2, 16, 16, 4>}, {pipeline_mode = #tpu.pipeline_mode<synchronous>, transform_indices = @transform_1, window_bounds = array<i64: 1, 4>}, {pipeline_mode = #tpu.pipeline_mode<synchronous>, transform_indices = @transform_2, window_bounds = array<i64: 1, 4>}, {pipeline_mode = #tpu.pipeline_mode<synchronous>, transform_indices = @transform_3, window_bounds = array<i64: 10, 4, 128>}, {pipeline_mode = #tpu.pipeline_mode<synchronous>, transform_indices = @transform_4, window_bounds = array<i64: 1, 128>}, {pipeline_mode = #tpu.pipeline_mode<synchronous>, transform_indices = @transform_5, window_bounds = array<i64: 512, 128>}]} {
    %c0 = arith.constant 0 : index
    %c0_0 = arith.constant 0 : index
    %c0_1 = arith.constant 0 : index
    %c0_2 = arith.constant 0 : index
    %0 = vector.load %arg1[%c0, %c0_0, %c0_1, %c0_2] : memref<2x16x16x4xf32, #tpu.memory_space<vmem>>, vector<2x16x16x4xf32>
    %c0_3 = arith.constant 0 : index
    %c0_4 = arith.constant 0 : index
    %1 = vector.load %arg2[%c0_3, %c0_4] : memref<1x4xf32, #tpu.memory_space<vmem>>, vector<1x4xf32>
    %2 = vector.shape_cast %1 : vector<1x4xf32> to vector<1x1x1x4xf32>
    %3 = vector.broadcast %2 : vector<1x1x1x4xf32> to vector<2x16x16x4xf32>
    %4 = arith.mulf %0, %3 : vector<2x16x16x4xf32>
    %c0_5 = arith.constant 0 : index
    %c0_6 = arith.constant 0 : index
    %5 = vector.load %arg3[%c0_5, %c0_6] : memref<1x4xf32, #tpu.memory_space<vmem>>, vector<1x4xf32>
    %6 = vector.shape_cast %5 : vector<1x4xf32> to vector<1x1x1x4xf32>
    %7 = vector.broadcast %6 : vector<1x1x1x4xf32> to vector<2x16x16x4xf32>
    %8 = arith.addf %4, %7 : vector<2x16x16x4xf32>
    %cst = arith.constant 0.000000e+00 : f32
    %9 = vector.broadcast %cst : f32 to vector<2x16x16x4xf32>
    %10 = arith.maximumf %8, %9 : vector<2x16x16x4xf32>
    %cst_7 = arith.constant 0.000000e+00 : f32
    %11 = vector.broadcast %cst_7 : f32 to vector<2x18x18x4xf32>
    %c0_8 = arith.constant 0 : index
    %c0_9 = arith.constant 0 : index
    %c0_10 = arith.constant 0 : index
    %c0_11 = arith.constant 0 : index
    %12 = vector.load %arg7[%c0_8, %c0_9, %c0_10, %c0_11] : memref<2x18x18x4xf32, #tpu.memory_space<vmem>>, vector<2x18x18x4xf32>
    tpu.vector_store %arg7[%c0_8, %c0_9, %c0_10, %c0_11], %11 {strides = array<i32>} : memref<2x18x18x4xf32, #tpu.memory_space<vmem>>, vector<2x18x18x4xf32>,
    %c0_12 = arith.constant 0 : index
    %c1 = arith.constant 1 : index
    %c1_13 = arith.constant 1 : index
    %c0_14 = arith.constant 0 : index
    %13 = vector.load %arg7[%c0_12, %c1, %c1_13, %c0_14] : memref<2x18x18x4xf32, #tpu.memory_space<vmem>>, vector<2x16x16x4xf32>
    tpu.vector_store %arg7[%c0_12, %c1, %c1_13, %c0_14], %10 {strides = array<i32>} : memref<2x18x18x4xf32, #tpu.memory_space<vmem>>, vector<2x16x16x4xf32>,
    %c0_15 = arith.constant 0 : index
    %c0_16 = arith.constant 0 : index
    %14 = vector.load %arg5[%c0_15, %c0_16] : memref<1x128xf32, #tpu.memory_space<vmem>>, vector<1x128xf32>
    %15 = vector.shape_cast %14 : vector<1x128xf32> to vector<1x128xf32>
    %16 = vector.broadcast %15 : vector<1x128xf32> to vector<512x128xf32>
    %c0_17 = arith.constant 0 : index
    %c0_18 = arith.constant 0 : index
    %17 = vector.load %arg6[%c0_17, %c0_18] : memref<512x128xf32, #tpu.memory_space<vmem>>, vector<512x128xf32>
    tpu.vector_store %arg6[%c0_17, %c0_18], %16 {strides = array<i32>} : memref<512x128xf32, #tpu.memory_space<vmem>>, vector<512x128xf32>,
    %c0_19 = arith.constant 0 : index
    %c0_20 = arith.constant 0 : index
    %c0_21 = arith.constant 0 : index
    %c0_22 = arith.constant 0 : index
    %18 = vector.load %arg7[%c0_19, %c0_20, %c0_21, %c0_22] : memref<2x18x18x4xf32, #tpu.memory_space<vmem>>, vector<2x16x16x4xf32>
    %19 = vector.shape_cast %18 : vector<2x16x16x4xf32> to vector<512x4xf32>
    %20 = arith.truncf %19 : vector<512x4xf32> to vector<512x4xbf16>
    %c0_23 = arith.constant 0 : index
    %c0_24 = arith.constant 0 : index
    %21 = vector.load %arg6[%c0_23, %c0_24] : memref<512x128xf32, #tpu.memory_space<vmem>>, vector<512x128xf32>
    %c0_25 = arith.constant 0 : index
    %c0_26 = arith.constant 0 : index
    %c0_27 = arith.constant 0 : index
    %22 = vector.load %arg4[%c0_25, %c0_26, %c0_27] : memref<10x4x128xbf16, #tpu.memory_space<vmem>>, vector<1x4x128xbf16>
    %23 = vector.shape_cast %22 : vector<1x4x128xbf16> to vector<4x128xbf16>
    %cst_28 = arith.constant dense<0.000000e+00> : vector<512x128xf32>
    %24 = tpu.matmul %20, %23, %cst_28 {dimension_numbers = #tpu.dot_dimension_numbers<[1], [0], [0], [1], [0, 0, 1, 1], [], []>} : vector<512x4xbf16>, vector<4x128xbf16>, vector<512x128xf32> -> vector<512x128xf32>
    %25 = arith.addf %21, %24 : vector<512x128xf32>
    %c0_29 = arith.constant 0 : index
    %c0_30 = arith.constant 0 : index
    %26 = vector.load %arg6[%c0_29, %c0_30] : memref<512x128xf32, #tpu.memory_space<vmem>>, vector<512x128xf32>
    tpu.vector_store %arg6[%c0_29, %c0_30], %25 {strides = array<i32>} : memref<512x128xf32, #tpu.memory_space<vmem>>, vector<512x128xf32>,
    %c0_31 = arith.constant 0 : index
    %c0_32 = arith.constant 0 : index
    %c1_33 = arith.constant 1 : index
    %c0_34 = arith.constant 0 : index
    %27 = vector.load %arg7[%c0_31, %c0_32, %c1_33, %c0_34] : memref<2x18x18x4xf32, #tpu.memory_space<vmem>>, vector<2x16x16x4xf32>
    %28 = vector.shape_cast %27 : vector<2x16x16x4xf32> to vector<512x4xf32>
    %29 = arith.truncf %28 : vector<512x4xf32> to vector<512x4xbf16>
    %c0_35 = arith.constant 0 : index
    %c0_36 = arith.constant 0 : index
    %30 = vector.load %arg6[%c0_35, %c0_36] : memref<512x128xf32, #tpu.memory_space<vmem>>, vector<512x128xf32>
    %c1_37 = arith.constant 1 : index
    %c0_38 = arith.constant 0 : index
    %c0_39 = arith.constant 0 : index
    %31 = vector.load %arg4[%c1_37, %c0_38, %c0_39] : memref<10x4x128xbf16, #tpu.memory_space<vmem>>, vector<1x4x128xbf16>
    %32 = vector.shape_cast %31 : vector<1x4x128xbf16> to vector<4x128xbf16>
    %cst_40 = arith.constant dense<0.000000e+00> : vector<512x128xf32>
    %33 = tpu.matmul %29, %32, %cst_40 {dimension_numbers = #tpu.dot_dimension_numbers<[1], [0], [0], [1], [0, 0, 1, 1], [], []>} : vector<512x4xbf16>, vector<4x128xbf16>, vector<512x128xf32> -> vector<512x128xf32>
    %34 = arith.addf %30, %33 : vector<512x128xf32>
    %c0_41 = arith.constant 0 : index
    %c0_42 = arith.constant 0 : index
    %35 = vector.load %arg6[%c0_41, %c0_42] : memref<512x128xf32, #tpu.memory_space<vmem>>, vector<512x128xf32>
    tpu.vector_store %arg6[%c0_41, %c0_42], %34 {strides = array<i32>} : memref<512x128xf32, #tpu.memory_space<vmem>>, vector<512x128xf32>,
    %c0_43 = arith.constant 0 : index
    %c0_44 = arith.constant 0 : index
    %c2 = arith.constant 2 : index
    %c0_45 = arith.constant 0 : index
    %36 = vector.load %arg7[%c0_43, %c0_44, %c2, %c0_45] : memref<2x18x18x4xf32, #tpu.memory_space<vmem>>, vector<2x16x16x4xf32>
    %37 = vector.shape_cast %36 : vector<2x16x16x4xf32> to vector<512x4xf32>
    %38 = arith.truncf %37 : vector<512x4xf32> to vector<512x4xbf16>
    %c0_46 = arith.constant 0 : index
    %c0_47 = arith.constant 0 : index
    %39 = vector.load %arg6[%c0_46, %c0_47] : memref<512x128xf32, #tpu.memory_space<vmem>>, vector<512x128xf32>
    %c2_48 = arith.constant 2 : index
    %c0_49 = arith.constant 0 : index
    %c0_50 = arith.constant 0 : index
    %40 = vector.load %arg4[%c2_48, %c0_49, %c0_50] : memref<10x4x128xbf16, #tpu.memory_space<vmem>>, vector<1x4x128xbf16>
    %41 = vector.shape_cast %40 : vector<1x4x128xbf16> to vector<4x128xbf16>
    %cst_51 = arith.constant dense<0.000000e+00> : vector<512x128xf32>
    %42 = tpu.matmul %38, %41, %cst_51 {dimension_numbers = #tpu.dot_dimension_numbers<[1], [0], [0], [1], [0, 0, 1, 1], [], []>} : vector<512x4xbf16>, vector<4x128xbf16>, vector<512x128xf32> -> vector<512x128xf32>
    %43 = arith.addf %39, %42 : vector<512x128xf32>
    %c0_52 = arith.constant 0 : index
    %c0_53 = arith.constant 0 : index
    %44 = vector.load %arg6[%c0_52, %c0_53] : memref<512x128xf32, #tpu.memory_space<vmem>>, vector<512x128xf32>
    tpu.vector_store %arg6[%c0_52, %c0_53], %43 {strides = array<i32>} : memref<512x128xf32, #tpu.memory_space<vmem>>, vector<512x128xf32>,
    %c0_54 = arith.constant 0 : index
    %c1_55 = arith.constant 1 : index
    %c0_56 = arith.constant 0 : index
    %c0_57 = arith.constant 0 : index
    %45 = vector.load %arg7[%c0_54, %c1_55, %c0_56, %c0_57] : memref<2x18x18x4xf32, #tpu.memory_space<vmem>>, vector<2x16x16x4xf32>
    %46 = vector.shape_cast %45 : vector<2x16x16x4xf32> to vector<512x4xf32>
    %47 = arith.truncf %46 : vector<512x4xf32> to vector<512x4xbf16>
    %c0_58 = arith.constant 0 : index
    %c0_59 = arith.constant 0 : index
    %48 = vector.load %arg6[%c0_58, %c0_59] : memref<512x128xf32, #tpu.memory_space<vmem>>, vector<512x128xf32>
    %c3 = arith.constant 3 : index
    %c0_60 = arith.constant 0 : index
    %c0_61 = arith.constant 0 : index
    %49 = vector.load %arg4[%c3, %c0_60, %c0_61] : memref<10x4x128xbf16, #tpu.memory_space<vmem>>, vector<1x4x128xbf16>
    %50 = vector.shape_cast %49 : vector<1x4x128xbf16> to vector<4x128xbf16>
    %cst_62 = arith.constant dense<0.000000e+00> : vector<512x128xf32>
    %51 = tpu.matmul %47, %50, %cst_62 {dimension_numbers = #tpu.dot_dimension_numbers<[1], [0], [0], [1], [0, 0, 1, 1], [], []>} : vector<512x4xbf16>, vector<4x128xbf16>, vector<512x128xf32> -> vector<512x128xf32>
    %52 = arith.addf %48, %51 : vector<512x128xf32>
    %c0_63 = arith.constant 0 : index
    %c0_64 = arith.constant 0 : index
    %53 = vector.load %arg6[%c0_63, %c0_64] : memref<512x128xf32, #tpu.memory_space<vmem>>, vector<512x128xf32>
    tpu.vector_store %arg6[%c0_63, %c0_64], %52 {strides = array<i32>} : memref<512x128xf32, #tpu.memory_space<vmem>>, vector<512x128xf32>,
    %c0_65 = arith.constant 0 : index
    %c1_66 = arith.constant 1 : index
    %c1_67 = arith.constant 1 : index
    %c0_68 = arith.constant 0 : index
    %54 = vector.load %arg7[%c0_65, %c1_66, %c1_67, %c0_68] : memref<2x18x18x4xf32, #tpu.memory_space<vmem>>, vector<2x16x16x4xf32>
    %55 = vector.shape_cast %54 : vector<2x16x16x4xf32> to vector<512x4xf32>
    %56 = arith.truncf %55 : vector<512x4xf32> to vector<512x4xbf16>
    %c0_69 = arith.constant 0 : index
    %c0_70 = arith.constant 0 : index
    %57 = vector.load %arg6[%c0_69, %c0_70] : memref<512x128xf32, #tpu.memory_space<vmem>>, vector<512x128xf32>
    %c4 = arith.constant 4 : index
    %c0_71 = arith.constant 0 : index
    %c0_72 = arith.constant 0 : index
    %58 = vector.load %arg4[%c4, %c0_71, %c0_72] : memref<10x4x128xbf16, #tpu.memory_space<vmem>>, vector<1x4x128xbf16>
    %59 = vector.shape_cast %58 : vector<1x4x128xbf16> to vector<4x128xbf16>
    %cst_73 = arith.constant dense<0.000000e+00> : vector<512x128xf32>
    %60 = tpu.matmul %56, %59, %cst_73 {dimension_numbers = #tpu.dot_dimension_numbers<[1], [0], [0], [1], [0, 0, 1, 1], [], []>} : vector<512x4xbf16>, vector<4x128xbf16>, vector<512x128xf32> -> vector<512x128xf32>
    %61 = arith.addf %57, %60 : vector<512x128xf32>
    %c0_74 = arith.constant 0 : index
    %c0_75 = arith.constant 0 : index
    %62 = vector.load %arg6[%c0_74, %c0_75] : memref<512x128xf32, #tpu.memory_space<vmem>>, vector<512x128xf32>
    tpu.vector_store %arg6[%c0_74, %c0_75], %61 {strides = array<i32>} : memref<512x128xf32, #tpu.memory_space<vmem>>, vector<512x128xf32>,
    %c0_76 = arith.constant 0 : index
    %c1_77 = arith.constant 1 : index
    %c2_78 = arith.constant 2 : index
    %c0_79 = arith.constant 0 : index
    %63 = vector.load %arg7[%c0_76, %c1_77, %c2_78, %c0_79] : memref<2x18x18x4xf32, #tpu.memory_space<vmem>>, vector<2x16x16x4xf32>
    %64 = vector.shape_cast %63 : vector<2x16x16x4xf32> to vector<512x4xf32>
    %65 = arith.truncf %64 : vector<512x4xf32> to vector<512x4xbf16>
    %c0_80 = arith.constant 0 : index
    %c0_81 = arith.constant 0 : index
    %66 = vector.load %arg6[%c0_80, %c0_81] : memref<512x128xf32, #tpu.memory_space<vmem>>, vector<512x128xf32>
    %c5 = arith.constant 5 : index
    %c0_82 = arith.constant 0 : index
    %c0_83 = arith.constant 0 : index
    %67 = vector.load %arg4[%c5, %c0_82, %c0_83] : memref<10x4x128xbf16, #tpu.memory_space<vmem>>, vector<1x4x128xbf16>
    %68 = vector.shape_cast %67 : vector<1x4x128xbf16> to vector<4x128xbf16>
    %cst_84 = arith.constant dense<0.000000e+00> : vector<512x128xf32>
    %69 = tpu.matmul %65, %68, %cst_84 {dimension_numbers = #tpu.dot_dimension_numbers<[1], [0], [0], [1], [0, 0, 1, 1], [], []>} : vector<512x4xbf16>, vector<4x128xbf16>, vector<512x128xf32> -> vector<512x128xf32>
    %70 = arith.addf %66, %69 : vector<512x128xf32>
    %c0_85 = arith.constant 0 : index
    %c0_86 = arith.constant 0 : index
    %71 = vector.load %arg6[%c0_85, %c0_86] : memref<512x128xf32, #tpu.memory_space<vmem>>, vector<512x128xf32>
    tpu.vector_store %arg6[%c0_85, %c0_86], %70 {strides = array<i32>} : memref<512x128xf32, #tpu.memory_space<vmem>>, vector<512x128xf32>,
    %c0_87 = arith.constant 0 : index
    %c2_88 = arith.constant 2 : index
    %c0_89 = arith.constant 0 : index
    %c0_90 = arith.constant 0 : index
    %72 = vector.load %arg7[%c0_87, %c2_88, %c0_89, %c0_90] : memref<2x18x18x4xf32, #tpu.memory_space<vmem>>, vector<2x16x16x4xf32>
    %73 = vector.shape_cast %72 : vector<2x16x16x4xf32> to vector<512x4xf32>
    %74 = arith.truncf %73 : vector<512x4xf32> to vector<512x4xbf16>
    %c0_91 = arith.constant 0 : index
    %c0_92 = arith.constant 0 : index
    %75 = vector.load %arg6[%c0_91, %c0_92] : memref<512x128xf32, #tpu.memory_space<vmem>>, vector<512x128xf32>
    %c6 = arith.constant 6 : index
    %c0_93 = arith.constant 0 : index
    %c0_94 = arith.constant 0 : index
    %76 = vector.load %arg4[%c6, %c0_93, %c0_94] : memref<10x4x128xbf16, #tpu.memory_space<vmem>>, vector<1x4x128xbf16>
    %77 = vector.shape_cast %76 : vector<1x4x128xbf16> to vector<4x128xbf16>
    %cst_95 = arith.constant dense<0.000000e+00> : vector<512x128xf32>
    %78 = tpu.matmul %74, %77, %cst_95 {dimension_numbers = #tpu.dot_dimension_numbers<[1], [0], [0], [1], [0, 0, 1, 1], [], []>} : vector<512x4xbf16>, vector<4x128xbf16>, vector<512x128xf32> -> vector<512x128xf32>
    %79 = arith.addf %75, %78 : vector<512x128xf32>
    %c0_96 = arith.constant 0 : index
    %c0_97 = arith.constant 0 : index
    %80 = vector.load %arg6[%c0_96, %c0_97] : memref<512x128xf32, #tpu.memory_space<vmem>>, vector<512x128xf32>
    tpu.vector_store %arg6[%c0_96, %c0_97], %79 {strides = array<i32>} : memref<512x128xf32, #tpu.memory_space<vmem>>, vector<512x128xf32>,
    %c0_98 = arith.constant 0 : index
    %c2_99 = arith.constant 2 : index
    %c1_100 = arith.constant 1 : index
    %c0_101 = arith.constant 0 : index
    %81 = vector.load %arg7[%c0_98, %c2_99, %c1_100, %c0_101] : memref<2x18x18x4xf32, #tpu.memory_space<vmem>>, vector<2x16x16x4xf32>
    %82 = vector.shape_cast %81 : vector<2x16x16x4xf32> to vector<512x4xf32>
    %83 = arith.truncf %82 : vector<512x4xf32> to vector<512x4xbf16>
    %c0_102 = arith.constant 0 : index
    %c0_103 = arith.constant 0 : index
    %84 = vector.load %arg6[%c0_102, %c0_103] : memref<512x128xf32, #tpu.memory_space<vmem>>, vector<512x128xf32>
    %c7 = arith.constant 7 : index
    %c0_104 = arith.constant 0 : index
    %c0_105 = arith.constant 0 : index
    %85 = vector.load %arg4[%c7, %c0_104, %c0_105] : memref<10x4x128xbf16, #tpu.memory_space<vmem>>, vector<1x4x128xbf16>
    %86 = vector.shape_cast %85 : vector<1x4x128xbf16> to vector<4x128xbf16>
    %cst_106 = arith.constant dense<0.000000e+00> : vector<512x128xf32>
    %87 = tpu.matmul %83, %86, %cst_106 {dimension_numbers = #tpu.dot_dimension_numbers<[1], [0], [0], [1], [0, 0, 1, 1], [], []>} : vector<512x4xbf16>, vector<4x128xbf16>, vector<512x128xf32> -> vector<512x128xf32>
    %88 = arith.addf %84, %87 : vector<512x128xf32>
    %c0_107 = arith.constant 0 : index
    %c0_108 = arith.constant 0 : index
    %89 = vector.load %arg6[%c0_107, %c0_108] : memref<512x128xf32, #tpu.memory_space<vmem>>, vector<512x128xf32>
    tpu.vector_store %arg6[%c0_107, %c0_108], %88 {strides = array<i32>} : memref<512x128xf32, #tpu.memory_space<vmem>>, vector<512x128xf32>,
    %c0_109 = arith.constant 0 : index
    %c2_110 = arith.constant 2 : index
    %c2_111 = arith.constant 2 : index
    %c0_112 = arith.constant 0 : index
    %90 = vector.load %arg7[%c0_109, %c2_110, %c2_111, %c0_112] : memref<2x18x18x4xf32, #tpu.memory_space<vmem>>, vector<2x16x16x4xf32>
    %91 = vector.shape_cast %90 : vector<2x16x16x4xf32> to vector<512x4xf32>
    %92 = arith.truncf %91 : vector<512x4xf32> to vector<512x4xbf16>
    %c0_113 = arith.constant 0 : index
    %c0_114 = arith.constant 0 : index
    %93 = vector.load %arg6[%c0_113, %c0_114] : memref<512x128xf32, #tpu.memory_space<vmem>>, vector<512x128xf32>
    %c8 = arith.constant 8 : index
    %c0_115 = arith.constant 0 : index
    %c0_116 = arith.constant 0 : index
    %94 = vector.load %arg4[%c8, %c0_115, %c0_116] : memref<10x4x128xbf16, #tpu.memory_space<vmem>>, vector<1x4x128xbf16>
    %95 = vector.shape_cast %94 : vector<1x4x128xbf16> to vector<4x128xbf16>
    %cst_117 = arith.constant dense<0.000000e+00> : vector<512x128xf32>
    %96 = tpu.matmul %92, %95, %cst_117 {dimension_numbers = #tpu.dot_dimension_numbers<[1], [0], [0], [1], [0, 0, 1, 1], [], []>} : vector<512x4xbf16>, vector<4x128xbf16>, vector<512x128xf32> -> vector<512x128xf32>
    %97 = arith.addf %93, %96 : vector<512x128xf32>
    %c0_118 = arith.constant 0 : index
    %c0_119 = arith.constant 0 : index
    %98 = vector.load %arg6[%c0_118, %c0_119] : memref<512x128xf32, #tpu.memory_space<vmem>>, vector<512x128xf32>
    tpu.vector_store %arg6[%c0_118, %c0_119], %97 {strides = array<i32>} : memref<512x128xf32, #tpu.memory_space<vmem>>, vector<512x128xf32>,
    %c0_120 = arith.constant 0 : index
    %c0_121 = arith.constant 0 : index
    %99 = vector.load %arg6[%c0_120, %c0_121] : memref<512x128xf32, #tpu.memory_space<vmem>>, vector<512x128xf32>
    %100 = vector.shape_cast %0 : vector<2x16x16x4xf32> to vector<512x4xf32>
    %101 = arith.truncf %100 : vector<512x4xf32> to vector<512x4xbf16>
    %c9 = arith.constant 9 : index
    %c0_122 = arith.constant 0 : index
    %c0_123 = arith.constant 0 : index
    %102 = vector.load %arg4[%c9, %c0_122, %c0_123] : memref<10x4x128xbf16, #tpu.memory_space<vmem>>, vector<1x4x128xbf16>
    %103 = vector.shape_cast %102 : vector<1x4x128xbf16> to vector<4x128xbf16>
    %cst_124 = arith.constant dense<0.000000e+00> : vector<512x128xf32>
    %104 = tpu.matmul %101, %103, %cst_124 {dimension_numbers = #tpu.dot_dimension_numbers<[1], [0], [0], [1], [0, 0, 1, 1], [], []>} : vector<512x4xbf16>, vector<4x128xbf16>, vector<512x128xf32> -> vector<512x128xf32>
    %105 = arith.addf %99, %104 : vector<512x128xf32>
    %c0_125 = arith.constant 0 : index
    %c0_126 = arith.constant 0 : index
    %106 = vector.load %arg6[%c0_125, %c0_126] : memref<512x128xf32, #tpu.memory_space<vmem>>, vector<512x128xf32>
    tpu.vector_store %arg6[%c0_125, %c0_126], %105 {strides = array<i32>} : memref<512x128xf32, #tpu.memory_space<vmem>>, vector<512x128xf32>,
    return
  }
  func.func @transform_0(%arg0: i32) -> (i32, i32, i32, i32) {
    %c0_i32 = arith.constant 0 : i32
    %c0_i32_0 = arith.constant 0 : i32
    %c0_i32_1 = arith.constant 0 : i32
    %c0_i32_2 = arith.constant 0 : i32
    %c0_i32_3 = arith.constant 0 : i32
    return %c0_i32, %c0_i32_0, %c0_i32_1, %c0_i32_2 : i32, i32, i32, i32
  }
  func.func @transform_1(%arg0: i32) -> (i32, i32) {
    %c0_i32 = arith.constant 0 : i32
    %c0_i32_0 = arith.constant 0 : i32
    %c0_i32_1 = arith.constant 0 : i32
    return %c0_i32, %c0_i32_0 : i32, i32
  }
  func.func @transform_2(%arg0: i32) -> (i32, i32) {
    %c0_i32 = arith.constant 0 : i32
    %c0_i32_0 = arith.constant 0 : i32
    %c0_i32_1 = arith.constant 0 : i32
    return %c0_i32, %c0_i32_0 : i32, i32
  }
  func.func @transform_3(%arg0: i32) -> (i32, i32, i32) {
    %c0_i32 = arith.constant 0 : i32
    %c0_i32_0 = arith.constant 0 : i32
    %c0_i32_1 = arith.constant 0 : i32
    %c0_i32_2 = arith.constant 0 : i32
    return %c0_i32, %c0_i32_0, %c0_i32_1 : i32, i32, i32
  }
  func.func @transform_4(%arg0: i32) -> (i32, i32) {
    %c0_i32 = arith.constant 0 : i32
    %c0_i32_0 = arith.constant 0 : i32
    %c0_i32_1 = arith.constant 0 : i32
    return %c0_i32, %c0_i32_0 : i32, i32
  }
  func.func @transform_5(%arg0: i32) -> (i32, i32) {
    %c0_i32 = arith.constant 0 : i32
    %c0_i32_0 = arith.constant 0 : i32
    %c0_i32_1 = arith.constant 0 : i32
    return %c0_i32, %c0_i32_0 : i32, i32
  }
}

</mosaic_0001>

<bundles_post_ra>
// kernel: tpu_custom_call.1
= control target key start
LH: loop header
LB: loop body
LE: loop exit
PB: predicated region body
PF: predicated region fallthrough
CT: control target
= control target key end

     0   :  { %vm795_vm0 = vcmask 1041408   ;;  %vm292_vm1 = vcmask 31744   ;;  %v8698_v3 = vmov 0.0   ;;  %vm295_vm2 = vcmask 25600   ;;  %s10222_s0 = inlined_call_operand.vmem [shape: f32[2,16,16,4], index: 0, kind: input, shape index: {}]   ;;  %s10223_s1 = inlined_call_operand.vmem [shape: f32[1,4], index: 1, kind: input, shape index: {}]   ;;  %s10224_s2 = inlined_call_operand.vmem [shape: f32[1,4], index: 2, kind: input, shape index: {}]   ;;  %s10225_s3 = inlined_call_operand.vmem [shape: bf16[10,4,128], index: 3, kind: input, shape index: {}]   ;;  %s10226_s4 = inlined_call_operand.vmem [shape: f32[1,128], index: 4, kind: input, shape index: {}]   ;;  %s10227_s5 = inlined_call_operand.hbm [shape: f32[512,128], index: 5, kind: output, shape index: {}]  }
   0x1   :  { %v698_v0 = vld [vmem:[%s10225_s3] sm:$0x3]  ;;  %293 = vst.msk [vmem:[#allocation2] sm:$0xff] %vm292_vm1, %v8698_v3  ;;  %294 = vst.msk [vmem:[#allocation2 + $0x8] sm:$0xff] %vm292_vm1, %v8698_v3  ;;  %v7339_v4 = vld [vmem:[%s10225_s3 + $0x4] sm:$0x3] }
   0x2   :  { %v8738_v1 = vld [vmem:[%s10222_s0] sm:$0xff]  ;;  %8593 = vmatprep.subr.msk.bf16.mxu0 %vm795_vm0, %v698_v0  ;;  %v8742_v2 = vsel %vm795_vm0, %v698_v0, 0  ;;  %297 = vst.msk [vmem:[#allocation2 + $0x18] sm:$0xff] %vm292_vm1, %v8698_v3  ;;  %298 = vst.msk [vmem:[#allocation2 + $0x20] sm:$0xff] %vm292_vm1, %v8698_v3  ;;  %v23_v5 = vld [vmem:[%s10222_s0 + $0x8] sm:$0xff]  ;;  %v8986_v11 = vsel %vm795_vm0, %v7339_v4, 0 }
   0x3   :  { %300 = vst.msk [vmem:[#allocation2 + $0x30] sm:$0xff] %vm292_vm1, %v8698_v3  ;;  %301 = vst.msk [vmem:[#allocation2 + $0x38] sm:$0xff] %vm292_vm1, %v8698_v3  ;;  %v8897_v6 = vld [vmem:[%s10223_s1] ss:$0 sm:$0xff]  ;;  %7934 = vmatpush3.bf16.msra.mxu0 %v8742_v2  ;;  %v7306_v10 = vld [vmem:[%s10225_s3 + $0x2] sm:$0x3] }
   0x4   :  { %303 = vst.msk [vmem:[#allocation2 + $0x48] sm:$0xff] %vm292_vm1, %v8698_v3  ;;  %304 = vst.msk [vmem:[#allocation2 + $0x50] sm:$0xff] %vm292_vm1, %v8698_v3  ;;  %v93_v7 = vmul.f32 %v8897_v6, %v8738_v1  ;;  %v94_v8 = vmul.f32 %v8897_v6, %v23_v5  ;;  %v8906_v9 = vld [vmem:[%s10224_s2] ss:$0 sm:$0xff]  ;;  %8595 = vmatprep.subr.msk.bf16.mxu0 %vm795_vm0, %v7339_v4  ;;  %8594 = vmatprep.subr.msk.bf16.mxu1 %vm795_vm0, %v7306_v10  ;;  %v1475_v12 = vsel %vm795_vm0, %v7306_v10, 0  ;;  %v24_v13 = vld [vmem:[%s10222_s0 + $0x10] sm:$0xff] }
   0x5   :  { %306 = vst.msk [vmem:[#allocation2 + $0x60] sm:$0xff] %vm292_vm1, %v8698_v3  ;;  %307 = vst.msk [vmem:[#allocation2 + $0x68] sm:$0xff] %vm292_vm1, %v8698_v3  ;;  %v25_v14 = vld [vmem:[%s10222_s0 + $0x18] sm:$0xff]  ;;  %v26_v15 = vld [vmem:[%s10222_s0 + $0x20] sm:$0xff]  ;;  %8000 = vmatpush3.bf16.msra.mxu1 %v1475_v12  ;;  %v95_v18 = vmul.f32 %v8897_v6, %v24_v13 }
   0x6   :  { %309 = vst.msk [vmem:[#allocation2 + $0x78] sm:$0xff] %vm292_vm1, %v8698_v3  ;;  %310 = vst.msk [vmem:[#allocation2 + $0x80] sm:$0xff] %vm292_vm1, %v8698_v3  ;;  %v164_v16 = vadd.f32 %v8906_v9, %v93_v7  ;;  %v165_v17 = vadd.f32 %v8906_v9, %v94_v8  ;;  %v96_v19 = vmul.f32 %v8897_v6, %v25_v14  ;;  %v27_v20 = vld [vmem:[%s10222_s0 + $0x28] sm:$0xff]  ;;  %v7372_v21 = vld [vmem:[%s10225_s3 + $0x6] sm:$0x3] }
   0x7   :  { %312 = vst.msk [vmem:[#allocation2 + $0x90] sm:$0xff] %vm292_vm1, %v8698_v3  ;;  %313 = vst.msk [vmem:[#allocation2 + $0x98] sm:$0xff] %vm292_vm1, %v8698_v3  ;;  %v28_v22 = vld [vmem:[%s10222_s0 + $0x30] sm:$0xff]  ;;  %v97_v23 = vmul.f32 %v8897_v6, %v26_v15  ;;  %v98_v24 = vmul.f32 %v8897_v6, %v27_v20  ;;  %8596 = vmatprep.subr.msk.bf16.mxu1 %vm795_vm0, %v7372_v21  ;;  %v9015_v25 = vsel %vm795_vm0, %v7372_v21, 0  ;;  %v29_v26 = vld [vmem:[%s10222_s0 + $0x38] sm:$0xff] }
   0x8   :  { %315 = vst.msk [vmem:[#allocation2 + $0xa8] sm:$0xff] %vm292_vm1, %v8698_v3  ;;  %316 = vst.msk [vmem:[#allocation2 + $0xb0] sm:$0xff] %vm292_vm1, %v8698_v3  ;;  %v99_v27 = vmul.f32 %v8897_v6, %v28_v22  ;;  %v30_v28 = vld [vmem:[%s10222_s0 + $0x40] sm:$0xff]  ;;  %v31_v29 = vld [vmem:[%s10222_s0 + $0x48] sm:$0xff]  ;;  %v228_v30 = vmax.f32 %v164_v16, 0.0  ;;  %v229_v31 = vmax.f32 %v165_v17, 0.0  ;;  %v166_v32 = vadd.f32 %v8906_v9, %v95_v18 }
   0x9   :  { %318 = vst.msk [vmem:[#allocation2 + $0xc0] sm:$0xff] %vm292_vm1, %v8698_v3  ;;  %319 = vst.msk [vmem:[#allocation2 + $0xc8] sm:$0xff] %vm292_vm1, %v8698_v3  ;;  %v167_v33 = vadd.f32 %v8906_v9, %v96_v19  ;;  %v168_v34 = vadd.f32 %v8906_v9, %v97_v23  ;;  %v169_v35 = vadd.f32 %v8906_v9, %v98_v24  ;;  %v32_v38 = vld [vmem:[%s10222_s0 + $0x50] sm:$0xff]  ;;  %v33_v39 = vld [vmem:[%s10222_s0 + $0x58] sm:$0xff] }
   0xa   :  { %321 = vst.msk [vmem:[#allocation2 + $0xd8] sm:$0xff] %vm292_vm1, %v8698_v3  ;;  %322 = vst.msk [vmem:[#allocation2 + $0xe0] sm:$0xff] %vm292_vm1, %v8698_v3  ;;  %v100_v36 = vmul.f32 %v8897_v6, %v29_v26  ;;  %v170_v37 = vadd.f32 %v8906_v9, %v99_v27  ;;  %v34_v40 = vld [vmem:[%s10222_s0 + $0x60] sm:$0xff]  ;;  %v539_v42 = vld [vmem:[#allocation2 + $0x8] sm:$0xff]  ;;  %v230_v44 = vmax.f32 %v166_v32, 0.0  ;;  %v101_v46 = vmul.f32 %v8897_v6, %v30_v28 }
   0xb   :  { %324 = vst.msk [vmem:[#allocation2 + $0xf0] sm:$0xff] %vm292_vm1, %v8698_v3  ;;  %325 = vst.msk [vmem:[#allocation2 + $0xf8] sm:$0xff] %vm292_vm1, %v8698_v3  ;;  %v538_v41 = vld [vmem:[#allocation2] sm:$0xff]  ;;  %v231_v45 = vmax.f32 %v167_v33, 0.0  ;;  %v102_v47 = vmul.f32 %v8897_v6, %v31_v29  ;;  %v232_v49 = vmax.f32 %v168_v34, 0.0  ;;  %v233_v50 = vmax.f32 %v169_v35, 0.0 }
   0xc   :  { %327 = vst.msk [vmem:[#allocation2 + $0x108] sm:$0xff] %vm292_vm1, %v8698_v3  ;;  %328 = vst.msk [vmem:[#allocation2 + $0x110] sm:$0xff] %vm292_vm1, %v8698_v3  ;;  %v1216_v43 = vld [vmem:[#allocation2 + $0x1] sm:$0xff]  ;;  %v602_v48 = vpack.c.bf16 %v539_v42, %v538_v41  ;;  %v171_v51 = vadd.f32 %v8906_v9, %v100_v36  ;;  %v234_v54 = vmax.f32 %v170_v37, 0.0  ;;  %v172_v55 = vadd.f32 %v8906_v9, %v101_v46  ;;  %v36_v58 = vld [vmem:[%s10222_s0 + $0x70] sm:$0xff] }
   0xd   :  { %330 = vst.msk [vmem:[#allocation2 + $0x120] sm:$0xff] %vm292_vm1, %v8698_v3  ;;  %331 = vst.msk [vmem:[#allocation2 + $0x128] sm:$0xff] %vm292_vm1, %v8698_v3  ;;  %v35_v52 = vld [vmem:[%s10222_s0 + $0x68] sm:$0xff]  ;;  %v173_v56 = vadd.f32 %v8906_v9, %v102_v47  ;;  %v103_v57 = vmul.f32 %v8897_v6, %v32_v38  ;;  %v37_v59 = vld [vmem:[%s10222_s0 + $0x78] sm:$0xff]  ;;  %v104_v62 = vmul.f32 %v8897_v6, %v33_v39 }
   0xe   :  { %333 = vst.msk [vmem:[#allocation2 + $0x138] sm:$0xff] %vm292_vm1, %v8698_v3  ;;  %334 = vst.msk [vmem:[#allocation2 + $0x140] sm:$0xff] %vm292_vm1, %v8698_v3  ;;  %7935 = vmatprep.mubr.msk.bf16.mxu0 %vm292_vm1, %v602_v48  ;;  %v235_v61 = vmax.f32 %v171_v51, 0.0  ;;  %v105_v63 = vmul.f32 %v8897_v6, %v34_v40  ;;  %v38_v0 = vld [vmem:[%s10222_s0 + $0x80] sm:$0xff]  ;;  %v39_v1 = vld [vmem:[%s10222_s0 + $0x88] sm:$0xff]  ;;  %v236_v2 = vmax.f32 %v172_v55, 0.0  ;;  %v106_v5 = vmul.f32 %v8897_v6, %v35_v52 }
   0xf   :  { %336 = vst.msk [vmem:[#allocation2 + $0x150] sm:$0xff] %vm292_vm1, %v8698_v3  ;;  %337 = vst.msk [vmem:[#allocation2 + $0x158] sm:$0xff] %vm292_vm1, %v8698_v3  ;;  %v174_v4 = vadd.f32 %v8906_v9, %v103_v57  ;;  %v175_v7 = vadd.f32 %v8906_v9, %v104_v62  ;;  %v107_v10 = vmul.f32 %v8897_v6, %v36_v58  ;;  %v40_v17 = vld [vmem:[%s10222_s0 + $0x90] sm:$0xff]  ;;  %v41_v18 = vld [vmem:[%s10222_s0 + $0x98] sm:$0xff] }
  0x10   :  { %339 = vst.msk [vmem:[#allocation2 + $0x168] sm:$0xff] %vm292_vm1, %v8698_v3  ;;  %340 = vst.msk [vmem:[#allocation2 + $0x170] sm:$0xff] %vm292_vm1, %v8698_v3  ;;  %v176_v8 = vadd.f32 %v8906_v9, %v105_v63  ;;  %v108_v12 = vmul.f32 %v8897_v6, %v37_v59  ;;  %v177_v14 = vadd.f32 %v8906_v9, %v106_v5  ;;  %v42_v32 = vld [vmem:[%s10222_s0 + $0xa0] sm:$0xff]  ;;  %v43_v33 = vld [vmem:[%s10222_s0 + $0xa8] sm:$0xff] }
  0x11   :  { %342 = vst.msk [vmem:[#allocation2 + $0x180] sm:$0xff] %vm292_vm1, %v8698_v3  ;;  %343 = vst.msk [vmem:[#allocation2 + $0x188] sm:$0xff] %vm292_vm1, %v8698_v3  ;;  %v238_v13 = vmax.f32 %v174_v4, 0.0  ;;  %v109_v15 = vmul.f32 %v8897_v6, %v38_v0  ;;  %v110_v16 = vmul.f32 %v8897_v6, %v39_v1  ;;  %v239_v22 = vmax.f32 %v175_v7, 0.0  ;;  %v44_v41 = vld [vmem:[%s10222_s0 + $0xb0] sm:$0xff] }
  0x12   :  { %345 = vst.msk [vmem:[#allocation2 + $0x198] sm:$0xff] %vm292_vm1, %v8698_v3  ;;  %346 = vst.msk [vmem:[#allocation2 + $0x1a0] sm:$0xff] %vm292_vm1, %v8698_v3  ;;  %v240_v23 = vmax.f32 %v176_v8, 0.0  ;;  %v178_v24 = vadd.f32 %v8906_v9, %v107_v10  ;;  %v179_v26 = vadd.f32 %v8906_v9, %v108_v12  ;;  %v241_v29 = vmax.f32 %v177_v14, 0.0  ;;  %v48_v0 = vld [vmem:[%s10222_s0 + $0xd0] sm:$0xff] }
  0x13   :  { %348 = vst.msk [vmem:[#allocation2 + $0x1b0] sm:$0xff] %vm292_vm1, %v8698_v3  ;;  %349 = vst.msk [vmem:[#allocation2 + $0x1b8] sm:$0xff] %vm292_vm1, %v8698_v3  ;;  %v111_v40 = vmul.f32 %v8897_v6, %v40_v17  ;;  %v112_v48 = vmul.f32 %v8897_v6, %v41_v18  ;;  %v113_v59 = vmul.f32 %v8897_v6, %v42_v32 }
  0x14   :  { %351 = vst.msk [vmem:[#allocation2 + $0x1c8] sm:$0xff] %vm292_vm1, %v8698_v3  ;;  %352 = vst.msk [vmem:[#allocation2 + $0x1d0] sm:$0xff] %vm292_vm1, %v8698_v3  ;;  %v242_v38 = vmax.f32 %v178_v24, 0.0  ;;  %v243_v39 = vmax.f32 %v179_v26, 0.0  ;;  %v114_v63 = vmul.f32 %v8897_v6, %v43_v33  ;;  %v115_v4 = vmul.f32 %v8897_v6, %v44_v41  ;;  %v51_v24 = vld [vmem:[%s10222_s0 + $0xe8] sm:$0xff] }
  0x15   :  { %354 = vst.msk [vmem:[#allocation2 + $0x1e0] sm:$0xff] %vm292_vm1, %v8698_v3  ;;  %355 = vst.msk [vmem:[#allocation2 + $0x1e8] sm:$0xff] %vm292_vm1, %v8698_v3  ;;  %v182_v55 = vadd.f32 %v8906_v9, %v111_v40 }
  0x16   :  { %357 = vst.msk [vmem:[#allocation2 + $0x1f8] sm:$0xff] %vm292_vm1, %v8698_v3  ;;  %358 = vst.msk [vmem:[#allocation2 + $0x200] sm:$0xff] %vm292_vm1, %v8698_v3  ;;  %v185_v7 = vadd.f32 %v8906_v9, %v114_v63  ;;  %v60_v63 = vld [vmem:[%s10222_s0 + $0x130] sm:$0xff] }
  0x17   :  { %360 = vst.msk [vmem:[#allocation2 + $0x210] sm:$0xff] %vm292_vm1, %v8698_v3  ;;  %361 = vst.msk [vmem:[#allocation2 + $0x218] sm:$0xff] %vm292_vm1, %v8698_v3  ;;  %v246_v62 = vmax.f32 %v182_v55, 0.0 }
  0x18   :  { %363 = vst.msk [vmem:[#allocation2 + $0x228] sm:$0xff] %vm292_vm1, %v8698_v3  ;;  %364 = vst.msk [vmem:[#allocation2 + $0x230] sm:$0xff] %vm292_vm1, %v8698_v3  ;;  %v249_v17 = vmax.f32 %v185_v7, 0.0 }
  0x19   :  { %366 = vst.msk [vmem:[#allocation2 + $0x240] sm:$0xff] %vm292_vm1, %v8698_v3  ;;  %367 = vst.msk [vmem:[#allocation2 + $0x248] sm:$0xff] %vm292_vm1, %v8698_v3 }
  0x1a   :  { %369 = vst.msk [vmem:[#allocation2 + $0x258] sm:$0xff] %vm292_vm1, %v8698_v3  ;;  %370 = vst.msk [vmem:[#allocation2 + $0x260] sm:$0xff] %vm292_vm1, %v8698_v3 }
  0x1b   :  { %372 = vst.msk [vmem:[#allocation2 + $0x270] sm:$0xff] %vm292_vm1, %v8698_v3  ;;  %373 = vst.msk [vmem:[#allocation2 + $0x278] sm:$0xff] %vm292_vm1, %v8698_v3 }
  0x1c   :  { %375 = vst.msk [vmem:[#allocation2 + $0x288] sm:$0xff] %vm292_vm1, %v8698_v3  ;;  %376 = vst.msk [vmem:[#allocation2 + $0x290] sm:$0xff] %vm292_vm1, %v8698_v3 }
  0x1d   :  { %378 = vst.msk [vmem:[#allocation2 + $0x2a0] sm:$0xff] %vm292_vm1, %v8698_v3  ;;  %379 = vst.msk [vmem:[#allocation2 + $0x2a8] sm:$0xff] %vm292_vm1, %v8698_v3 }
  0x1e   :  { %381 = vst.msk [vmem:[#allocation2 + $0x2b8] sm:$0xff] %vm292_vm1, %v8698_v3  ;;  %382 = vst.msk [vmem:[#allocation2 + $0x2c0] sm:$0xff] %vm292_vm1, %v8698_v3 }
  0x1f   :  { %384 = vst.msk [vmem:[#allocation2 + $0x2d0] sm:$0xff] %vm292_vm1, %v8698_v3  ;;  %385 = vst.msk [vmem:[#allocation2 + $0x2d8] sm:$0xff] %vm292_vm1, %v8698_v3 }
  0x20   :  { %387 = vst.msk [vmem:[#allocation2 + $0x2e8] sm:$0xff] %vm292_vm1, %v8698_v3  ;;  %388 = vst.msk [vmem:[#allocation2 + $0x2f0] sm:$0xff] %vm292_vm1, %v8698_v3 }
  0x21   :  { %390 = vst.msk [vmem:[#allocation2 + $0x300] sm:$0xff] %vm292_vm1, %v8698_v3  ;;  %391 = vst.msk [vmem:[#allocation2 + $0x308] sm:$0xff] %vm292_vm1, %v8698_v3 }
  0x22   :  { %393 = vst.msk [vmem:[#allocation2 + $0x318] sm:$0xff] %vm292_vm1, %v8698_v3  ;;  %394 = vst.msk [vmem:[#allocation2 + $0x320] sm:$0xff] %vm292_vm1, %v8698_v3 }
  0x23   :  { %396 = vst.msk [vmem:[#allocation2 + $0x330] sm:$0xff] %vm292_vm1, %v8698_v3  ;;  %397 = vst.msk [vmem:[#allocation2 + $0x338] sm:$0xff] %vm292_vm1, %v8698_v3 }
  0x24   :  { %399 = vst.msk [vmem:[#allocation2 + $0x348] sm:$0xff] %vm292_vm1, %v8698_v3  ;;  %400 = vst.msk [vmem:[#allocation2 + $0x350] sm:$0xff] %vm292_vm1, %v8698_v3 }
  0x25   :  { %299 = vst.msk [vmem:[#allocation2 + $0x28] sm:$0x3] %vm295_vm2, %v8698_v3  ;;  %296 = vst.msk [vmem:[#allocation2 + $0x10] sm:$0x3] %vm295_vm2, %v8698_v3 }
  0x26   :  { %302 = vst.msk [vmem:[#allocation2 + $0x40] sm:$0x3] %vm295_vm2, %v8698_v3  ;;  %305 = vst.msk [vmem:[#allocation2 + $0x58] sm:$0x3] %vm295_vm2, %v8698_v3 }
  0x27   :  { %308 = vst.msk [vmem:[#allocation2 + $0x70] sm:$0x3] %vm295_vm2, %v8698_v3  ;;  %311 = vst.msk [vmem:[#allocation2 + $0x88] sm:$0x3] %vm295_vm2, %v8698_v3 }
  0x28   :  { %314 = vst.msk [vmem:[#allocation2 + $0xa0] sm:$0x3] %vm295_vm2, %v8698_v3  ;;  %317 = vst.msk [vmem:[#allocation2 + $0xb8] sm:$0x3] %vm295_vm2, %v8698_v3 }
  0x29   :  { %320 = vst.msk [vmem:[#allocation2 + $0xd0] sm:$0x3] %vm295_vm2, %v8698_v3  ;;  %323 = vst.msk [vmem:[#allocation2 + $0xe8] sm:$0x3] %vm295_vm2, %v8698_v3 }
  0x2a   :  { %326 = vst.msk [vmem:[#allocation2 + $0x100] sm:$0x3] %vm295_vm2, %v8698_v3  ;;  %329 = vst.msk [vmem:[#allocation2 + $0x118] sm:$0x3] %vm295_vm2, %v8698_v3 }
  0x2b   :  { %332 = vst.msk [vmem:[#allocation2 + $0x130] sm:$0x3] %vm295_vm2, %v8698_v3  ;;  %335 = vst.msk [vmem:[#allocation2 + $0x148] sm:$0x3] %vm295_vm2, %v8698_v3 }
  0x2c   :  { %338 = vst.msk [vmem:[#allocation2 + $0x160] sm:$0x3] %vm295_vm2, %v8698_v3  ;;  %341 = vst.msk [vmem:[#allocation2 + $0x178] sm:$0x3] %vm295_vm2, %v8698_v3  ;;  %v1217_v53 = vld [vmem:[#allocation2 + $0x9] sm:$0xff] }
  0x2d   :  { %344 = vst.msk [vmem:[#allocation2 + $0x190] sm:$0x3] %vm295_vm2, %v8698_v3  ;;  %347 = vst.msk [vmem:[#allocation2 + $0x1a8] sm:$0x3] %vm295_vm2, %v8698_v3  ;;  %v1280_v60 = vpack.c.bf16 %v1217_v53, %v1216_v43 }
  0x2e   :  { %350 = vst.msk [vmem:[#allocation2 + $0x1c0] sm:$0x3] %vm295_vm2, %v8698_v3  ;;  %353 = vst.msk [vmem:[#allocation2 + $0x1d8] sm:$0x3] %vm295_vm2, %v8698_v3 }
  0x2f   :  { %356 = vst.msk [vmem:[#allocation2 + $0x1f0] sm:$0x3] %vm295_vm2, %v8698_v3  ;;  %359 = vst.msk [vmem:[#allocation2 + $0x208] sm:$0x3] %vm295_vm2, %v8698_v3  ;;  %8001 = vmatprep.mubr.msk.bf16.mxu1 %vm292_vm1, %v1280_v60 }
  0x30   :  { %362 = vst.msk [vmem:[#allocation2 + $0x220] sm:$0x3] %vm295_vm2, %v8698_v3  ;;  %365 = vst.msk [vmem:[#allocation2 + $0x238] sm:$0x3] %vm295_vm2, %v8698_v3 }
  0x31   :  { %368 = vst.msk [vmem:[#allocation2 + $0x250] sm:$0x3] %vm295_vm2, %v8698_v3  ;;  %371 = vst.msk [vmem:[#allocation2 + $0x268] sm:$0x3] %vm295_vm2, %v8698_v3 }
  0x32   :  { %374 = vst.msk [vmem:[#allocation2 + $0x280] sm:$0x3] %vm295_vm2, %v8698_v3  ;;  %377 = vst.msk [vmem:[#allocation2 + $0x298] sm:$0x3] %vm295_vm2, %v8698_v3 }
  0x33   :  { %380 = vst.msk [vmem:[#allocation2 + $0x2b0] sm:$0x3] %vm295_vm2, %v8698_v3  ;;  %383 = vst.msk [vmem:[#allocation2 + $0x2c8] sm:$0x3] %vm295_vm2, %v8698_v3 }
  0x34   :  { %386 = vst.msk [vmem:[#allocation2 + $0x2e0] sm:$0x3] %vm295_vm2, %v8698_v3  ;;  %389 = vst.msk [vmem:[#allocation2 + $0x2f8] sm:$0x3] %vm295_vm2, %v8698_v3 }
  0x35   :  { %392 = vst.msk [vmem:[#allocation2 + $0x310] sm:$0x3] %vm295_vm2, %v8698_v3  ;;  %395 = vst.msk [vmem:[#allocation2 + $0x328] sm:$0x3] %vm295_vm2, %v8698_v3 }
  0x36   :  { %398 = vst.msk [vmem:[#allocation2 + $0x340] sm:$0x3] %vm295_vm2, %v8698_v3  ;;  %401 = vst.msk [vmem:[#allocation2 + $0x358] sm:$0x3] %vm295_vm2, %v8698_v3  ;;  %v237_v3 = vmax.f32 %v173_v56, 0.0 }
  0x37   :  { %403 = vst.msk [vmem:[#allocation2 + $0x19] sm:$0xff] %vm292_vm1, %v228_v30  ;;  %404 = vst.msk [vmem:[#allocation2 + $0x21] sm:$0xff] %vm292_vm1, %v229_v31  ;;  %v180_v30 = vadd.f32 %v8906_v9, %v109_v15  ;;  %v181_v31 = vadd.f32 %v8906_v9, %v110_v16  ;;  %v49_v15 = vld [vmem:[%s10222_s0 + $0xd8] sm:$0xff]  ;;  %v119_v16 = vmul.f32 %v8897_v6, %v48_v0 }
  0x38   :  { %405 = vst.msk [vmem:[#allocation2 + $0x31] sm:$0xff] %vm292_vm1, %v230_v44  ;;  %406 = vst.msk [vmem:[#allocation2 + $0x39] sm:$0xff] %vm292_vm1, %v231_v45 }
  0x39   :  { %407 = vst.msk [vmem:[#allocation2 + $0x49] sm:$0xff] %vm292_vm1, %v232_v49  ;;  %408 = vst.msk [vmem:[#allocation2 + $0x51] sm:$0xff] %vm292_vm1, %v233_v50  ;;  %v244_v46 = vmax.f32 %v180_v30, 0.0  ;;  %v245_v47 = vmax.f32 %v181_v31, 0.0  ;;  %v45_v49 = vld [vmem:[%s10222_s0 + $0xb8] sm:$0xff]  ;;  %v46_v50 = vld [vmem:[%s10222_s0 + $0xc0] sm:$0xff]  ;;  %v120_v30 = vmul.f32 %v8897_v6, %v49_v15 }
  0x3a   :  { %409 = vst.msk [vmem:[#allocation2 + $0x61] sm:$0xff] %vm292_vm1, %v234_v54  ;;  %410 = vst.msk [vmem:[#allocation2 + $0x69] sm:$0xff] %vm292_vm1, %v235_v61  ;;  %v116_v8 = vmul.f32 %v8897_v6, %v45_v49  ;;  %v117_v10 = vmul.f32 %v8897_v6, %v46_v50  ;;  %v54_v31 = vld [vmem:[%s10222_s0 + $0x100] sm:$0xff] }
  0x3b   :  { %411 = vst.msk [vmem:[#allocation2 + $0x79] sm:$0xff] %vm292_vm1, %v236_v2  ;;  %412 = vst.msk [vmem:[#allocation2 + $0x81] sm:$0xff] %vm292_vm1, %v237_v3  ;;  %v184_v3 = vadd.f32 %v8906_v9, %v113_v59  ;;  %v191_v41 = vadd.f32 %v8906_v9, %v120_v30 }
  0x3c   :  { %413 = vst.msk [vmem:[#allocation2 + $0x91] sm:$0xff] %vm292_vm1, %v238_v13  ;;  %414 = vst.msk [vmem:[#allocation2 + $0x99] sm:$0xff] %vm292_vm1, %v239_v22  ;;  %v186_v13 = vadd.f32 %v8906_v9, %v115_v4  ;;  %v187_v18 = vadd.f32 %v8906_v9, %v116_v8 }
  0x3d   :  { %415 = vst.msk [vmem:[#allocation2 + $0xa9] sm:$0xff] %vm292_vm1, %v240_v23  ;;  %416 = vst.msk [vmem:[#allocation2 + $0xb1] sm:$0xff] %vm292_vm1, %v241_v29  ;;  %v248_v12 = vmax.f32 %v184_v3, 0.0  ;;  %v188_v23 = vadd.f32 %v8906_v9, %v117_v10  ;;  %v255_v50 = vmax.f32 %v191_v41, 0.0  ;;  %v67_v41 = vld [vmem:[%s10222_s0 + $0x168] sm:$0xff] }
  0x3e   :  { %v540_v19 = vld [vmem:[#allocation2 + $0x18] sm:$0xff]  ;;  %v541_v20 = vld [vmem:[#allocation2 + $0x20] sm:$0xff]  ;;  %417 = vst.msk [vmem:[#allocation2 + $0xc1] sm:$0xff] %vm292_vm1, %v242_v38  ;;  %418 = vst.msk [vmem:[#allocation2 + $0xc9] sm:$0xff] %vm292_vm1, %v243_v39  ;;  %v250_v22 = vmax.f32 %v186_v13, 0.0 }
  0x3f   :  { %v1218_v21 = vld [vmem:[#allocation2 + $0x19] sm:$0xff]  ;;  %v603_v27 = vpack.c.bf16 %v541_v20, %v540_v19  ;;  %v1219_v28 = vld [vmem:[#allocation2 + $0x21] sm:$0xff]  ;;  %v542_v35 = vld [vmem:[#allocation2 + $0x30] sm:$0xff]  ;;  %419 = vst.msk [vmem:[#allocation2 + $0xd9] sm:$0xff] %vm292_vm1, %v244_v46  ;;  %v125_v46 = vmul.f32 %v8897_v6, %v54_v31 }
  0x40   :  { %v1281_v34 = vpack.c.bf16 %v1219_v28, %v1218_v21  ;;  %v543_v36 = vld [vmem:[#allocation2 + $0x38] sm:$0xff]  ;;  %v544_v43 = vld [vmem:[#allocation2 + $0x48] sm:$0xff]  ;;  %v545_v44 = vld [vmem:[#allocation2 + $0x50] sm:$0xff]  ;;  %420 = vst.msk [vmem:[#allocation2 + $0xe1] sm:$0xff] %vm292_vm1, %v245_v47  ;;  %v251_v28 = vmax.f32 %v187_v18, 0.0  ;;  %v131_v18 = vmul.f32 %v8897_v6, %v60_v63 }
  0x41   :  { %v1220_v37 = vld [vmem:[#allocation2 + $0x31] sm:$0xff]  ;;  %7936 = vmatmul.mubr.msk.bf16.vlgmr.msra.gmra.mxu0 %vm292_vm1, %v603_v27  ;;  %v604_v42 = vpack.c.bf16 %v543_v36, %v542_v35  ;;  %v1221_v45 = vld [vmem:[#allocation2 + $0x39] sm:$0xff]  ;;  %v1222_v52 = vld [vmem:[#allocation2 + $0x49] sm:$0xff]  ;;  %v605_v60 = vpack.c.bf16 %v545_v44, %v544_v43  ;;  %421 = vst.msk [vmem:[#allocation2 + $0xf1] sm:$0xff] %vm292_vm1, %v246_v62  ;;  %v190_v35 = vadd.f32 %v8906_v9, %v119_v16 }
  0x42   :  { %8066 = vmatpush3.bf16.msra.mxu0 %v8986_v11  ;;  %8002 = vmatmul.mubr.msk.bf16.vlgmr.msra.gmra.mxu1 %vm292_vm1, %v1281_v34  ;;  %v1282_v51 = vpack.c.bf16 %v1221_v45, %v1220_v37  ;;  %v1223_v53 = vld [vmem:[#allocation2 + $0x51] sm:$0xff]  ;;  %v546_v54 = vld [vmem:[#allocation2 + $0x60] sm:$0xff]  ;;  %v547_v56 = vld [vmem:[#allocation2 + $0x68] sm:$0xff]  ;;  %v183_v11 = vadd.f32 %v8906_v9, %v112_v48  ;;  %423 = vst.msk [vmem:[#allocation2 + $0x109] sm:$0xff] %vm292_vm1, %v248_v12  ;;  %v252_v34 = vmax.f32 %v188_v23, 0.0 }
  0x43   :  { %7939 = vmatprep.mubr.msk.bf16.mxu0 %vm292_vm1, %v604_v42  ;;  %8132 = vmatpush3.bf16.msra.mxu1 %v9015_v25  ;;  %v1224_v57 = vld [vmem:[#allocation2 + $0x61] sm:$0xff]  ;;  %v1225_v58 = vld [vmem:[#allocation2 + $0x69] sm:$0xff]  ;;  %v1283_v61 = vpack.c.bf16 %v1223_v53, %v1222_v52  ;;  %v606_v1 = vpack.c.bf16 %v547_v56, %v546_v54  ;;  %v548_v20 = vld [vmem:[#allocation2 + $0x78] sm:$0xff]  ;;  %424 = vst.msk [vmem:[#allocation2 + $0x111] sm:$0xff] %vm292_vm1, %v249_v17  ;;  %v254_v44 = vmax.f32 %v190_v35, 0.0 }
  0x44   :  { %8005 = vmatprep.mubr.msk.bf16.mxu1 %vm292_vm1, %v1282_v51  ;;  %v47_v25 = vld [vmem:[%s10222_s0 + $0xc8] sm:$0xff]  ;;  %v247_v2 = vmax.f32 %v183_v11, 0.0  ;;  %v1284_v5 = vpack.c.bf16 %v1225_v58, %v1224_v57  ;;  %v50_v19 = vld [vmem:[%s10222_s0 + $0xe0] sm:$0xff]  ;;  %v550_v32 = vld [vmem:[#allocation2 + $0x90] sm:$0xff]  ;;  %425 = vst.msk [vmem:[#allocation2 + $0x121] sm:$0xff] %vm292_vm1, %v250_v22  ;;  %v122_v45 = vmul.f32 %v8897_v6, %v51_v24  ;;  %v196_v57 = vadd.f32 %v8906_v9, %v125_v46 }
  0x45   :  { %v118_v14 = vmul.f32 %v8897_v6, %v47_v25  ;;  %v549_v21 = vld [vmem:[#allocation2 + $0x80] sm:$0xff]  ;;  %v551_v33 = vld [vmem:[#allocation2 + $0x98] sm:$0xff]  ;;  %v55_v36 = vld [vmem:[%s10222_s0 + $0x108] sm:$0xff]  ;;  %426 = vst.msk [vmem:[#allocation2 + $0x129] sm:$0xff] %vm292_vm1, %v251_v28  ;;  %v121_v42 = vmul.f32 %v8897_v6, %v50_v19  ;;  %v202_v31 = vadd.f32 %v8906_v9, %v131_v18 }
  0x46   :  { %422 = vst.msk [vmem:[#allocation2 + $0xf9] sm:$0xff] %vm292_vm1, %v247_v2  ;;  %v1226_v26 = vld [vmem:[#allocation2 + $0x79] sm:$0xff]  ;;  %v1227_v27 = vld [vmem:[#allocation2 + $0x81] sm:$0xff]  ;;  %v607_v37 = vpack.c.bf16 %v549_v21, %v548_v20  ;;  %v1228_v38 = vld [vmem:[#allocation2 + $0x91] sm:$0xff]  ;;  %v9186_v49 = vpack.c.bf16 %v551_v33, %v550_v32  ;;  %v126_v52 = vmul.f32 %v8897_v6, %v55_v36  ;;  %v193_v56 = vadd.f32 %v8906_v9, %v122_v45 }
  0x47   :  { %v189_v29 = vadd.f32 %v8906_v9, %v118_v14  ;;  %v1229_v39 = vld [vmem:[#allocation2 + $0x99] sm:$0xff]  ;;  %v1285_v43 = vpack.c.bf16 %v1227_v27, %v1226_v26  ;;  %427 = vst.msk [vmem:[#allocation2 + $0x139] sm:$0xff] %vm292_vm1, %v252_v34  ;;  %v56_v47 = vld [vmem:[%s10222_s0 + $0x110] sm:$0xff]  ;;  %v192_v51 = vadd.f32 %v8906_v9, %v121_v42  ;;  %v59_v54 = vld [vmem:[%s10222_s0 + $0x128] sm:$0xff]  ;;  %v260_v2 = vmax.f32 %v196_v57, 0.0 }
  0x48   :  { %v57_v48 = vld [vmem:[%s10222_s0 + $0x118] sm:$0xff]  ;;  %v58_v53 = vld [vmem:[%s10222_s0 + $0x120] sm:$0xff]  ;;  %v1286_v55 = vpack.c.bf16 %v1229_v39, %v1228_v38  ;;  %429 = vst.msk [vmem:[#allocation2 + $0x151] sm:$0xff] %vm292_vm1, %v254_v44  ;;  %v552_v58 = vld [vmem:[#allocation2 + $0xa8] sm:$0xff]  ;;  %v130_v4 = vmul.f32 %v8897_v6, %v59_v54 }
  0x49   :  { %7940 = vmatmul.mubr.msk.bf16.gmra.mxu0 %vm292_vm1, %v605_v60  ;;  %v253_v40 = vmax.f32 %v189_v29, 0.0  ;;  %v553_v11 = vld [vmem:[#allocation2 + $0xb0] sm:$0xff]  ;;  %430 = vst.msk [vmem:[#allocation2 + $0x159] sm:$0xff] %vm292_vm1, %v255_v50  ;;  %v256_v59 = vmax.f32 %v192_v51, 0.0  ;;  %v197_v60 = vadd.f32 %v8906_v9, %v126_v52  ;;  %v128_v62 = vmul.f32 %v8897_v6, %v57_v48  ;;  %v554_v7 = vld [vmem:[#allocation2 + $0xc0] sm:$0xff]  ;;  %v555_v8 = vld [vmem:[#allocation2 + $0xc8] sm:$0xff] }
  0x4a   :  { %8006 = vmatmul.mubr.msk.bf16.gmra.mxu1 %vm292_vm1, %v1283_v61  ;;  %7943 = vmatprep.mubr.msk.bf16.mxu0 %vm292_vm1, %v606_v1  ;;  %v127_v61 = vmul.f32 %v8897_v6, %v56_v47  ;;  %v9208_v25 = vld [vmem:[#allocation2 + $0xa9] sm:$0xff]  ;;  %v9210_v0 = vld [vmem:[#allocation2 + $0xb1] sm:$0xff]  ;;  %v257_v1 = vmax.f32 %v193_v56, 0.0  ;;  %v129_v3 = vmul.f32 %v8897_v6, %v58_v53  ;;  %v1232_v13 = vld [vmem:[#allocation2 + $0xc1] sm:$0xff]  ;;  %435 = vst.msk [vmem:[#allocation2 + $0x1c9] sm:$0xff] %vm292_vm1, %v260_v2 }
  0x4b   :  { %8009 = vmatprep.mubr.msk.bf16.mxu1 %vm292_vm1, %v1284_v5  ;;  %428 = vst.msk [vmem:[#allocation2 + $0x141] sm:$0xff] %vm292_vm1, %v253_v40  ;;  %v61_v5 = vld [vmem:[%s10222_s0 + $0x138] sm:$0xff]  ;;  %431 = vst.msk [vmem:[#allocation2 + $0x169] sm:$0xff] %vm292_vm1, %v256_v59  ;;  %v261_v10 = vmax.f32 %v197_v60, 0.0  ;;  %v1233_v14 = vld [vmem:[#allocation2 + $0xc9] sm:$0xff]  ;;  %v199_v15 = vadd.f32 %v8906_v9, %v128_v62  ;;  %v201_v17 = vadd.f32 %v8906_v9, %v130_v4 }
  0x4c   :  { %v198_v12 = vadd.f32 %v8906_v9, %v127_v61  ;;  %432 = vst.msk [vmem:[#allocation2 + $0x171] sm:$0xff] %vm292_vm1, %v257_v1  ;;  %v200_v16 = vadd.f32 %v8906_v9, %v129_v3  ;;  %v62_v19 = vld [vmem:[%s10222_s0 + $0x140] sm:$0xff]  ;;  %v9232_v20 = vpack.c.bf16 %v553_v11, %v552_v58  ;;  %v1287_v21 = vpack.c.bf16 %v9210_v0, %v9208_v25  ;;  %v63_v24 = vld [vmem:[%s10222_s0 + $0x148] sm:$0xff]  ;;  %v64_v26 = vld [vmem:[%s10222_s0 + $0x150] sm:$0xff] }
  0x4d   :  { %436 = vst.msk [vmem:[#allocation2 + $0x1d1] sm:$0xff] %vm292_vm1, %v261_v10  ;;  %v132_v23 = vmul.f32 %v8897_v6, %v61_v5  ;;  %v65_v27 = vld [vmem:[%s10222_s0 + $0x158] sm:$0xff]  ;;  %v263_v28 = vmax.f32 %v199_v15, 0.0  ;;  %v265_v30 = vmax.f32 %v201_v17, 0.0  ;;  %v9248_v32 = vpack.c.bf16 %v555_v8, %v554_v7  ;;  %v66_v36 = vld [vmem:[%s10222_s0 + $0x160] sm:$0xff]  ;;  %v68_v42 = vld [vmem:[%s10222_s0 + $0x170] sm:$0xff] }
  0x4e   :  { %v262_v22 = vmax.f32 %v198_v12, 0.0  ;;  %v264_v29 = vmax.f32 %v200_v16, 0.0  ;;  %v1288_v33 = vpack.c.bf16 %v1233_v14, %v1232_v13  ;;  %v133_v35 = vmul.f32 %v8897_v6, %v62_v19  ;;  %v556_v44 = vld [vmem:[#allocation2 + $0xd8] sm:$0xff]  ;;  %v557_v45 = vld [vmem:[#allocation2 + $0xe0] sm:$0xff]  ;;  %v558_v51 = vld [vmem:[#allocation2 + $0xf0] sm:$0xff] }
  0x4f   :  { %v203_v34 = vadd.f32 %v8906_v9, %v132_v23  ;;  %438 = vst.msk [vmem:[#allocation2 + $0x1e9] sm:$0xff] %vm292_vm1, %v263_v28  ;;  %440 = vst.msk [vmem:[#allocation2 + $0x201] sm:$0xff] %vm292_vm1, %v265_v30  ;;  %v134_v38 = vmul.f32 %v8897_v6, %v63_v24  ;;  %v135_v39 = vmul.f32 %v8897_v6, %v64_v26  ;;  %v9271_v46 = vld [vmem:[#allocation2 + $0xd9] sm:$0xff]  ;;  %v9276_v50 = vld [vmem:[#allocation2 + $0xe1] sm:$0xff] }
  0x50   :  { %437 = vst.msk [vmem:[#allocation2 + $0x1e1] sm:$0xff] %vm292_vm1, %v262_v22  ;;  %439 = vst.msk [vmem:[#allocation2 + $0x1f9] sm:$0xff] %vm292_vm1, %v264_v29  ;;  %v136_v40 = vmul.f32 %v8897_v6, %v65_v27  ;;  %v204_v48 = vadd.f32 %v8906_v9, %v133_v35  ;;  %v559_v52 = vld [vmem:[#allocation2 + $0xf8] sm:$0xff]  ;;  %v137_v56 = vmul.f32 %v8897_v6, %v66_v36  ;;  %v70_v60 = vld [vmem:[%s10222_s0 + $0x180] sm:$0xff] }
  0x51   :  { %7944 = vmatmul.mubr.msk.bf16.gmra.mxu0 %vm292_vm1, %v607_v37  ;;  %v266_v37 = vmax.f32 %v202_v31, 0.0  ;;  %v267_v47 = vmax.f32 %v203_v34, 0.0  ;;  %v205_v53 = vadd.f32 %v8906_v9, %v134_v38  ;;  %v206_v54 = vadd.f32 %v8906_v9, %v135_v39  ;;  %v71_v25 = vld [vmem:[%s10222_s0 + $0x188] sm:$0xff]  ;;  %v72_v0 = vld [vmem:[%s10222_s0 + $0x190] sm:$0xff]  ;;  %v73_v1 = vld [vmem:[%s10222_s0 + $0x198] sm:$0xff] }
  0x52   :  { %8010 = vmatmul.mubr.msk.bf16.gmra.mxu1 %vm292_vm1, %v1285_v43  ;;  %7947 = vmatprep.mubr.msk.bf16.mxu0 %vm292_vm1, %v9186_v49  ;;  %v69_v43 = vld [vmem:[%s10222_s0 + $0x178] sm:$0xff]  ;;  %v268_v57 = vmax.f32 %v204_v48, 0.0  ;;  %v138_v58 = vmul.f32 %v8897_v6, %v67_v41  ;;  %v139_v11 = vmul.f32 %v8897_v6, %v68_v42  ;;  %v9293_v61 = vpack.c.bf16 %v557_v45, %v556_v44  ;;  %v74_v19 = vld [vmem:[%s10222_s0 + $0x1a0] sm:$0xff]  ;;  %v75_v24 = vld [vmem:[%s10222_s0 + $0x1a8] sm:$0xff] }
  0x53   :  { %8013 = vmatprep.mubr.msk.bf16.mxu1 %vm292_vm1, %v1286_v55  ;;  %441 = vst.msk [vmem:[#allocation2 + $0x211] sm:$0xff] %vm292_vm1, %v266_v37  ;;  %v207_v55 = vadd.f32 %v8906_v9, %v136_v40  ;;  %442 = vst.msk [vmem:[#allocation2 + $0x219] sm:$0xff] %vm292_vm1, %v267_v47  ;;  %v140_v59 = vmul.f32 %v8897_v6, %v69_v43  ;;  %v269_v62 = vmax.f32 %v205_v53, 0.0  ;;  %v270_v63 = vmax.f32 %v206_v54, 0.0  ;;  %v1236_v4 = vld [vmem:[#allocation2 + $0xf1] sm:$0xff]  ;;  %v1237_v5 = vld [vmem:[#allocation2 + $0xf9] sm:$0xff] }
  0x54   :  { %v1289_v2 = vpack.c.bf16 %v9276_v50, %v9271_v46  ;;  %v9307_v3 = vpack.c.bf16 %v559_v52, %v558_v51  ;;  %443 = vst.msk [vmem:[#allocation2 + $0x229] sm:$0xff] %vm292_vm1, %v268_v57  ;;  %v208_v8 = vadd.f32 %v8906_v9, %v137_v56  ;;  %v209_v10 = vadd.f32 %v8906_v9, %v138_v58  ;;  %v560_v26 = vld [vmem:[#allocation2 + $0x108] sm:$0xff]  ;;  %v561_v27 = vld [vmem:[#allocation2 + $0x110] sm:$0xff]  ;;  %v77_v38 = vld [vmem:[%s10222_s0 + $0x1b8] sm:$0xff] }
  0x55   :  { %v271_v7 = vmax.f32 %v207_v55, 0.0  ;;  %444 = vst.msk [vmem:[#allocation2 + $0x231] sm:$0xff] %vm292_vm1, %v269_v62  ;;  %445 = vst.msk [vmem:[#allocation2 + $0x241] sm:$0xff] %vm292_vm1, %v270_v63  ;;  %v210_v12 = vadd.f32 %v8906_v9, %v139_v11  ;;  %v211_v13 = vadd.f32 %v8906_v9, %v140_v59  ;;  %v141_v14 = vmul.f32 %v8897_v6, %v70_v60  ;;  %v9327_v28 = vld [vmem:[#allocation2 + $0x109] sm:$0xff]  ;;  %v9329_v29 = vld [vmem:[#allocation2 + $0x111] sm:$0xff] }
  0x56   :  { %v272_v15 = vmax.f32 %v208_v8, 0.0  ;;  %v142_v16 = vmul.f32 %v8897_v6, %v71_v25  ;;  %v143_v17 = vmul.f32 %v8897_v6, %v72_v0  ;;  %v144_v18 = vmul.f32 %v8897_v6, %v73_v1  ;;  %v76_v37 = vld [vmem:[%s10222_s0 + $0x1b0] sm:$0xff]  ;;  %v78_v39 = vld [vmem:[%s10222_s0 + $0x1c0] sm:$0xff]  ;;  %v79_v43 = vld [vmem:[%s10222_s0 + $0x1c8] sm:$0xff] }
  0x57   :  { %446 = vst.msk [vmem:[#allocation2 + $0x249] sm:$0xff] %vm292_vm1, %v271_v7  ;;  %v273_v22 = vmax.f32 %v209_v10, 0.0  ;;  %v274_v23 = vmax.f32 %v210_v12, 0.0  ;;  %v275_v30 = vmax.f32 %v211_v13, 0.0  ;;  %v212_v31 = vadd.f32 %v8906_v9, %v141_v14  ;;  %v562_v40 = vld [vmem:[#allocation2 + $0x120] sm:$0xff]  ;;  %v563_v45 = vld [vmem:[#allocation2 + $0x128] sm:$0xff] }
  0x58   :  { %447 = vst.msk [vmem:[#allocation2 + $0x259] sm:$0xff] %vm292_vm1, %v272_v15  ;;  %v214_v34 = vadd.f32 %v8906_v9, %v143_v17  ;;  %v215_v35 = vadd.f32 %v8906_v9, %v144_v18  ;;  %v145_v36 = vmul.f32 %v8897_v6, %v74_v19  ;;  %v146_v42 = vmul.f32 %v8897_v6, %v75_v24  ;;  %v9361_v44 = vld [vmem:[%s10225_s3 + $0x8] sm:$0x3]  ;;  %v80_v57 = vld [vmem:[%s10222_s0 + $0x1d0] sm:$0xff]  ;;  %v81_v62 = vld [vmem:[%s10222_s0 + $0x1d8] sm:$0xff] }
  0x59   :  { %7948 = vmatmul.mubr.msk.bf16.gmra.mxu0 %vm292_vm1, %v9232_v20  ;;  %448 = vst.msk [vmem:[#allocation2 + $0x261] sm:$0xff] %vm292_vm1, %v273_v22  ;;  %449 = vst.msk [vmem:[#allocation2 + $0x271] sm:$0xff] %vm292_vm1, %v274_v23  ;;  %v276_v41 = vmax.f32 %v212_v31, 0.0  ;;  %v1240_v46 = vld [vmem:[#allocation2 + $0x121] sm:$0xff]  ;;  %v1241_v47 = vld [vmem:[#allocation2 + $0x129] sm:$0xff]  ;;  %8597 = vmatprep.subr.msk.bf16.mxu0 %vm795_vm0, %v9361_v44  ;;  %v147_v54 = vmul.f32 %v8897_v6, %v76_v37  ;;  %v148_v55 = vmul.f32 %v8897_v6, %v77_v38 }
  0x5a   :  { %8014 = vmatmul.mubr.msk.bf16.gmra.mxu1 %vm292_vm1, %v1287_v21  ;;  %7951 = vmatprep.mubr.msk.bf16.mxu0 %vm292_vm1, %v9248_v32  ;;  %v1290_v21 = vpack.c.bf16 %v1237_v5, %v1236_v4  ;;  %450 = vst.msk [vmem:[#allocation2 + $0x279] sm:$0xff] %vm292_vm1, %v275_v30  ;;  %v278_v50 = vmax.f32 %v214_v34, 0.0  ;;  %v279_v51 = vmax.f32 %v215_v35, 0.0  ;;  %v216_v52 = vadd.f32 %v8906_v9, %v145_v36  ;;  %v82_v63 = vld [vmem:[%s10222_s0 + $0x1e0] sm:$0xff]  ;;  %v83_v25 = vld [vmem:[%s10222_s0 + $0x1e8] sm:$0xff]  ;;  %v564_v18 = vld [vmem:[#allocation2 + $0x138] sm:$0xff] }
  0x5b   :  { %8017 = vmatprep.mubr.msk.bf16.mxu1 %vm292_vm1, %v1288_v33  ;;  %v213_v33 = vadd.f32 %v8906_v9, %v142_v16  ;;  %451 = vst.msk [vmem:[#allocation2 + $0x289] sm:$0xff] %vm292_vm1, %v276_v41  ;;  %v217_v53 = vadd.f32 %v8906_v9, %v146_v42  ;;  %v149_v56 = vmul.f32 %v8897_v6, %v78_v39  ;;  %v565_v19 = vld [vmem:[#allocation2 + $0x140] sm:$0xff]  ;;  %v1244_v31 = vld [vmem:[#allocation2 + $0x151] sm:$0xff]  ;;  %v9426_v41 = vld [vmem:[%s10225_s3 + $0xa] sm:$0x3] }
  0x5c   :  { %v9375_v58 = vpack.c.bf16 %v561_v27, %v560_v26  ;;  %v1291_v11 = vpack.c.bf16 %v9329_v29, %v9327_v28  ;;  %453 = vst.msk [vmem:[#allocation2 + $0x2a1] sm:$0xff] %vm292_vm1, %v278_v50  ;;  %454 = vst.msk [vmem:[#allocation2 + $0x2a9] sm:$0xff] %vm292_vm1, %v279_v51  ;;  %v280_v59 = vmax.f32 %v216_v52, 0.0  ;;  %v150_v60 = vmul.f32 %v8897_v6, %v79_v43  ;;  %v1243_v24 = vld [vmem:[#allocation2 + $0x141] sm:$0xff]  ;;  %v566_v26 = vld [vmem:[#allocation2 + $0x150] sm:$0xff] }
  0x5d   :  { %v277_v48 = vmax.f32 %v213_v33, 0.0  ;;  %v9392_v0 = vpack.c.bf16 %v563_v45, %v562_v40  ;;  %v1292_v1 = vpack.c.bf16 %v1241_v47, %v1240_v46  ;;  %v218_v4 = vadd.f32 %v8906_v9, %v147_v54  ;;  %v567_v27 = vld [vmem:[#allocation2 + $0x158] sm:$0xff]  ;;  %8598 = vmatprep.subr.msk.bf16.mxu1 %vm795_vm0, %v9426_v41  ;;  %v568_v42 = vld [vmem:[#allocation2 + $0x168] sm:$0xff]  ;;  %v569_v43 = vld [vmem:[#allocation2 + $0x170] sm:$0xff] }
  0x5e   :  { %455 = vst.msk [vmem:[#allocation2 + $0x2b9] sm:$0xff] %vm292_vm1, %v280_v59  ;;  %v219_v5 = vadd.f32 %v8906_v9, %v148_v55  ;;  %v220_v7 = vadd.f32 %v8906_v9, %v149_v56  ;;  %v221_v8 = vadd.f32 %v8906_v9, %v150_v60  ;;  %v151_v10 = vmul.f32 %v8897_v6, %v80_v57  ;;  %v1245_v33 = vld [vmem:[#allocation2 + $0x159] sm:$0xff]  ;;  %v570_v45 = vld [vmem:[#allocation2 + $0x1b0] sm:$0xff]  ;;  %v572_v56 = vld [vmem:[#allocation2 + $0x1c8] sm:$0xff] }
  0x5f   :  { %452 = vst.msk [vmem:[#allocation2 + $0x291] sm:$0xff] %vm292_vm1, %v277_v48  ;;  %v282_v12 = vmax.f32 %v218_v4, 0.0  ;;  %v152_v13 = vmul.f32 %v8897_v6, %v81_v62  ;;  %v153_v14 = vmul.f32 %v8897_v6, %v82_v63  ;;  %v154_v15 = vmul.f32 %v8897_v6, %v83_v25  ;;  %v1246_v46 = vld [vmem:[#allocation2 + $0x169] sm:$0xff]  ;;  %v1247_v47 = vld [vmem:[#allocation2 + $0x171] sm:$0xff]  ;;  %v1249_v51 = vld [vmem:[#allocation2 + $0x1b9] sm:$0xff] }
  0x60   :  { %v283_v16 = vmax.f32 %v219_v5, 0.0  ;;  %v284_v17 = vmax.f32 %v220_v7, 0.0  ;;  %v285_v22 = vmax.f32 %v221_v8, 0.0  ;;  %v222_v23 = vadd.f32 %v8906_v9, %v151_v10  ;;  %v571_v48 = vld [vmem:[#allocation2 + $0x1b8] sm:$0xff]  ;;  %v573_v57 = vld [vmem:[#allocation2 + $0x1d0] sm:$0xff]  ;;  %v574_v60 = vld [vmem:[#allocation2 + $0x1e0] sm:$0xff] }
  0x61   :  { %7952 = vmatmul.mubr.msk.bf16.gmra.mxu0 %vm292_vm1, %v9293_v61  ;;  %457 = vst.msk [vmem:[#allocation2 + $0x2d1] sm:$0xff] %vm292_vm1, %v282_v12  ;;  %v223_v28 = vadd.f32 %v8906_v9, %v152_v13  ;;  %v224_v29 = vadd.f32 %v8906_v9, %v153_v14  ;;  %v225_v30 = vadd.f32 %v8906_v9, %v154_v15  ;;  %v1248_v50 = vld [vmem:[#allocation2 + $0x1b1] sm:$0xff]  ;;  %v575_v62 = vld [vmem:[#allocation2 + $0x1e8] sm:$0xff]  ;;  %v9461_v13 = vld [vmem:[%s10226_s4] ss:$0 sm:$0xff] }
  0x62   :  { %8018 = vmatmul.mubr.msk.bf16.gmra.mxu1 %vm292_vm1, %v1289_v2  ;;  %7955 = vmatprep.mubr.msk.bf16.mxu0 %vm292_vm1, %v9307_v3  ;;  %v281_v2 = vmax.f32 %v217_v53, 0.0  ;;  %458 = vst.msk [vmem:[#allocation2 + $0x2d9] sm:$0xff] %vm292_vm1, %v283_v16  ;;  %459 = vst.msk [vmem:[#allocation2 + $0x2e9] sm:$0xff] %vm292_vm1, %v284_v17  ;;  %v286_v34 = vmax.f32 %v222_v23, 0.0  ;;  %v9418_v35 = vpack.c.bf16 %v565_v19, %v564_v18  ;;  %v1251_v59 = vld [vmem:[#allocation2 + $0x1d1] sm:$0xff]  ;;  %v1252_v63 = vld [vmem:[#allocation2 + $0x1e1] sm:$0xff] }
  0x63   :  { %8021 = vmatprep.mubr.msk.bf16.mxu1 %vm292_vm1, %v1290_v21  ;;  %v1242_v21 = vld [vmem:[#allocation2 + $0x139] sm:$0xff]  ;;  %460 = vst.msk [vmem:[#allocation2 + $0x2f1] sm:$0xff] %vm292_vm1, %v285_v22  ;;  %v287_v36 = vmax.f32 %v223_v28, 0.0  ;;  %v288_v37 = vmax.f32 %v224_v29, 0.0  ;;  %v9420_v39 = vpack.c.bf16 %v567_v27, %v566_v26  ;;  %v289_v40 = vmax.f32 %v225_v30, 0.0  ;;  %v1253_v25 = vld [vmem:[#allocation2 + $0x1e9] sm:$0xff] }
  0x64   :  { %456 = vst.msk [vmem:[#allocation2 + $0x2c1] sm:$0xff] %vm292_vm1, %v281_v2  ;;  %v1293_v38 = vpack.c.bf16 %v1243_v24, %v1242_v21  ;;  %461 = vst.msk [vmem:[#allocation2 + $0x301] sm:$0xff] %vm292_vm1, %v286_v34  ;;  %v1294_v9 = vpack.c.bf16 %v1245_v33, %v1244_v31  ;;  %v9439_v52 = vpack.c.bf16 %v569_v43, %v568_v42  ;;  %v52_v7 = vld [vmem:[%s10222_s0 + $0xf0] sm:$0xff]  ;;  %v53_v8 = vld [vmem:[%s10222_s0 + $0xf8] sm:$0xff] }
  0x65   :  { %462 = vst.msk [vmem:[#allocation2 + $0x309] sm:$0xff] %vm292_vm1, %v287_v36  ;;  %463 = vst.msk [vmem:[#allocation2 + $0x319] sm:$0xff] %vm292_vm1, %v288_v37  ;;  %v1295_v53 = vpack.c.bf16 %v1247_v47, %v1246_v46  ;;  %v618_v54 = vpack.c.bf16 %v571_v48, %v570_v45  ;;  %v1296_v55 = vpack.c.bf16 %v1249_v51, %v1248_v50 }
  0x66   :  { %464 = vst.msk [vmem:[#allocation2 + $0x321] sm:$0xff] %vm292_vm1, %v289_v40  ;;  %v9448_v4 = vpack.c.bf16 %v575_v62, %v574_v60  ;;  %v1298_v5 = vpack.c.bf16 %v1253_v25, %v1252_v63  ;;  %v123_v10 = vmul.f32 %v8897_v6, %v52_v7  ;;  %v124_v12 = vmul.f32 %v8897_v6, %v53_v8 }
  0x67   :  { %514 = vst [vmem:[#allocation3 + $0x140] sm:$0xff] %v9461_v13  ;;  %515 = vst [vmem:[#allocation3 + $0x148] sm:$0xff] %v9461_v13 }
  0x68   :  { %517 = vst [vmem:[#allocation3 + $0x158] sm:$0xff] %v9461_v13  ;;  %518 = vst [vmem:[#allocation3 + $0x160] sm:$0xff] %v9461_v13 }
  0x69   :  { %7956 = vmatmul.mubr.msk.bf16.gmra.mxu0 %vm292_vm1, %v9375_v58  ;;  %519 = vst [vmem:[#allocation3 + $0x168] sm:$0xff] %v9461_v13  ;;  %520 = vst [vmem:[#allocation3 + $0x170] sm:$0xff] %v9461_v13 }
  0x6a   :  { %8022 = vmatmul.mubr.msk.bf16.gmra.mxu1 %vm292_vm1, %v1291_v11  ;;  %7959 = vmatprep.mubr.msk.bf16.mxu0 %vm292_vm1, %v9392_v0  ;;  %v1250_v11 = vld [vmem:[#allocation2 + $0x1c9] sm:$0xff]  ;;  %521 = vst [vmem:[#allocation3 + $0x178] sm:$0xff] %v9461_v13  ;;  %522 = vst [vmem:[#allocation3 + $0x180] sm:$0xff] %v9461_v13 }
  0x6b   :  { %8025 = vmatprep.mubr.msk.bf16.mxu1 %vm292_vm1, %v1292_v1  ;;  %v9446_v1 = vpack.c.bf16 %v573_v57, %v572_v56  ;;  %v1297_v2 = vpack.c.bf16 %v1251_v59, %v1250_v11  ;;  %523 = vst [vmem:[#allocation3 + $0x188] sm:$0xff] %v9461_v13  ;;  %524 = vst [vmem:[#allocation3 + $0x190] sm:$0xff] %v9461_v13 }
  0x6c   :  { %525 = vst [vmem:[#allocation3 + $0x198] sm:$0xff] %v9461_v13  ;;  %526 = vst [vmem:[#allocation3 + $0x1a0] sm:$0xff] %v9461_v13 }
  0x6d   :  { %527 = vst [vmem:[#allocation3 + $0x1a8] sm:$0xff] %v9461_v13  ;;  %528 = vst [vmem:[#allocation3 + $0x1b0] sm:$0xff] %v9461_v13 }
  0x6e   :  { %529 = vst [vmem:[#allocation3 + $0x1b8] sm:$0xff] %v9461_v13  ;;  %530 = vst [vmem:[#allocation3 + $0x1c0] sm:$0xff] %v9461_v13 }
  0x6f   :  { %531 = vst [vmem:[#allocation3 + $0x1c8] sm:$0xff] %v9461_v13  ;;  %532 = vst [vmem:[#allocation3 + $0x1d0] sm:$0xff] %v9461_v13 }
  0x70   :  { %533 = vst [vmem:[#allocation3 + $0x1d8] sm:$0xff] %v9461_v13  ;;  %534 = vst [vmem:[#allocation3 + $0x1e0] sm:$0xff] %v9461_v13 }
  0x71   :  { %7960 = vmatmul.mubr.msk.bf16.gmra.mxu0 %vm292_vm1, %v9418_v35  ;;  %535 = vst [vmem:[#allocation3 + $0x1e8] sm:$0xff] %v9461_v13  ;;  %536 = vst [vmem:[#allocation3 + $0x1f0] sm:$0xff] %v9461_v13 }
  0x72   :  { %8026 = vmatmul.mubr.msk.bf16.gmra.mxu1 %vm292_vm1, %v1293_v38  ;;  %7963 = vmatprep.mubr.msk.bf16.mxu0 %vm292_vm1, %v9420_v39  ;;  %537 = vst [vmem:[#allocation3 + $0x1f8] sm:$0xff] %v9461_v13 }
  0x73   :  { %8029 = vmatprep.mubr.msk.bf16.mxu1 %vm292_vm1, %v1294_v9 }
  0x79   :  { %7964 = vmatmul.mubr.msk.bf16.gmra.mxu0 %vm292_vm1, %v9439_v52 }
  0x7a   :  { %8030 = vmatmul.mubr.msk.bf16.gmra.mxu1 %vm292_vm1, %v1295_v53  ;;  %7967 = vmatprep.mubr.msk.bf16.mxu0 %vm292_vm1, %v618_v54 }
  0x7b   :  { %8033 = vmatprep.mubr.msk.bf16.mxu1 %vm292_vm1, %v1296_v55 }
  0x81   :  { %7968 = vmatmul.mubr.msk.bf16.gmra.mxu0 %vm292_vm1, %v9446_v1 }
  0x82   :  { %10 = vsyncpa [#allocation4], 0  ;;  %8034 = vmatmul.mubr.msk.bf16.gmra.mxu1 %vm292_vm1, %v1297_v2  ;;  %7971 = vmatprep.mubr.msk.bf16.mxu0 %vm292_vm1, %v9448_v4  ;;  %v576_v6 = vld [vmem:[#allocation2 + $0x1f8] sm:$0xff]  ;;  %v577_v14 = vld [vmem:[#allocation2 + $0x200] sm:$0xff] }
  0x83   :  { %v1254_v15 = vld [vmem:[#allocation2 + $0x1f9] sm:$0xff]  ;;  %8037 = vmatprep.mubr.msk.bf16.mxu1 %vm292_vm1, %v1298_v5  ;;  %v1255_v19 = vld [vmem:[#allocation2 + $0x201] sm:$0xff]  ;;  %v578_v21 = vld [vmem:[#allocation2 + $0x210] sm:$0xff]  ;;  %v9499_v28 = vpack.c.bf16 %v577_v14, %v576_v6 }
  0x84   :  { %v9494_v16 = vld [vmem:[%s10224_s2] ss:$0 sm:$0xff]  ;;  %v579_v22 = vld [vmem:[#allocation2 + $0x218] sm:$0xff]  ;;  %v1299_v29 = vpack.c.bf16 %v1255_v19, %v1254_v15  ;;  %v580_v33 = vld [vmem:[#allocation2 + $0x228] sm:$0xff] }
  0x85   :  { %v194_v17 = vadd.f32 %v9494_v16, %v123_v10  ;;  %v195_v18 = vadd.f32 %v9494_v16, %v124_v12  ;;  %v1256_v23 = vld [vmem:[#allocation2 + $0x211] sm:$0xff]  ;;  %v1257_v24 = vld [vmem:[#allocation2 + $0x219] sm:$0xff]  ;;  %v9501_v30 = vpack.c.bf16 %v579_v22, %v578_v21  ;;  %v1258_v36 = vld [vmem:[#allocation2 + $0x229] sm:$0xff] }
  0x86   :  { %v1300_v31 = vpack.c.bf16 %v1257_v24, %v1256_v23  ;;  %v581_v34 = vld [vmem:[#allocation2 + $0x230] sm:$0xff]  ;;  %v582_v38 = vld [vmem:[#allocation2 + $0x240] sm:$0xff]  ;;  %v583_v40 = vld [vmem:[#allocation2 + $0x248] sm:$0xff] }
  0x87   :  { %v258_v26 = vmax.f32 %v194_v17, 0.0  ;;  %v259_v27 = vmax.f32 %v195_v18, 0.0  ;;  %v1259_v37 = vld [vmem:[#allocation2 + $0x231] sm:$0xff]  ;;  %v1260_v9 = vld [vmem:[#allocation2 + $0x241] sm:$0xff]  ;;  %v1261_v42 = vld [vmem:[#allocation2 + $0x249] sm:$0xff]  ;;  %v623_v43 = vpack.c.bf16 %v581_v34, %v580_v33  ;;  %v9511_v46 = vpack.c.bf16 %v583_v40, %v582_v38 }
  0x88   :  { %v1301_v45 = vpack.c.bf16 %v1259_v37, %v1258_v36  ;;  %v1302_v47 = vpack.c.bf16 %v1261_v42, %v1260_v9  ;;  %v584_v48 = vld [vmem:[#allocation2 + $0x258] sm:$0xff]  ;;  %v585_v50 = vld [vmem:[#allocation2 + $0x260] sm:$0xff]  ;;  %v586_v54 = vld [vmem:[#allocation2 + $0x270] sm:$0xff] }
  0x89   :  { %433 = vst.msk [vmem:[#allocation2 + $0x181] sm:$0xff] %vm292_vm1, %v258_v26  ;;  %434 = vst.msk [vmem:[#allocation2 + $0x189] sm:$0xff] %vm292_vm1, %v259_v27  ;;  %7972 = vmatmul.mubr.msk.bf16.gmra.mxu0 %vm292_vm1, %v9499_v28  ;;  %v1262_v51 = vld [vmem:[#allocation2 + $0x259] sm:$0xff]  ;;  %v1263_v53 = vld [vmem:[#allocation2 + $0x261] sm:$0xff]  ;;  %v625_v11 = vpack.c.bf16 %v585_v50, %v584_v48 }
  0x8a   :  { %8038 = vmatmul.mubr.msk.bf16.gmra.mxu1 %vm292_vm1, %v1299_v29  ;;  %7975 = vmatprep.mubr.msk.bf16.mxu0 %vm292_vm1, %v9501_v30  ;;  %v587_v55 = vld [vmem:[#allocation2 + $0x278] sm:$0xff]  ;;  %v1303_v59 = vpack.c.bf16 %v1263_v53, %v1262_v51  ;;  %v588_v63 = vld [vmem:[#allocation2 + $0x288] sm:$0xff]  ;;  %v589_v25 = vld [vmem:[#allocation2 + $0x290] sm:$0xff] }
  0x8b   :  { %8041 = vmatprep.mubr.msk.bf16.mxu1 %vm292_vm1, %v1300_v31  ;;  %v1264_v56 = vld [vmem:[#allocation2 + $0x271] sm:$0xff]  ;;  %v1265_v57 = vld [vmem:[#allocation2 + $0x279] sm:$0xff]  ;;  %v626_v60 = vpack.c.bf16 %v587_v55, %v586_v54  ;;  %v1266_v2 = vld [vmem:[#allocation2 + $0x289] sm:$0xff]  ;;  %v627_v6 = vpack.c.bf16 %v589_v25, %v588_v63 }
  0x8c   :  { %v1304_v62 = vpack.c.bf16 %v1265_v57, %v1264_v56  ;;  %v1267_v5 = vld [vmem:[#allocation2 + $0x291] sm:$0xff]  ;;  %v590_v7 = vld [vmem:[#allocation2 + $0x2a0] sm:$0xff]  ;;  %v591_v8 = vld [vmem:[#allocation2 + $0x2a8] sm:$0xff] }
  0x8d   :  { %v1268_v10 = vld [vmem:[#allocation2 + $0x2a1] sm:$0xff]  ;;  %v1269_v12 = vld [vmem:[#allocation2 + $0x2a9] sm:$0xff]  ;;  %v1305_v14 = vpack.c.bf16 %v1267_v5, %v1266_v2  ;;  %v628_v15 = vpack.c.bf16 %v591_v8, %v590_v7  ;;  %v592_v18 = vld [vmem:[#allocation2 + $0x2b8] sm:$0xff] }
  0x8e   :  { %v1306_v17 = vpack.c.bf16 %v1269_v12, %v1268_v10  ;;  %v593_v19 = vld [vmem:[#allocation2 + $0x2c0] sm:$0xff]  ;;  %v594_v23 = vld [vmem:[#allocation2 + $0x2d0] sm:$0xff]  ;;  %v595_v24 = vld [vmem:[#allocation2 + $0x2d8] sm:$0xff] }
  0x8f   :  { %v1270_v21 = vld [vmem:[#allocation2 + $0x2b9] sm:$0xff]  ;;  %v1271_v22 = vld [vmem:[#allocation2 + $0x2c1] sm:$0xff]  ;;  %v1272_v26 = vld [vmem:[#allocation2 + $0x2d1] sm:$0xff]  ;;  %v629_v29 = vpack.c.bf16 %v593_v19, %v592_v18  ;;  %v630_v33 = vpack.c.bf16 %v595_v24, %v594_v23 }
  0x90   :  { %v1273_v27 = vld [vmem:[#allocation2 + $0x2d9] sm:$0xff]  ;;  %v1307_v31 = vpack.c.bf16 %v1271_v22, %v1270_v21  ;;  %v84_v36 = vld [vmem:[%s10222_s0 + $0x1f0] sm:$0xff]  ;;  %v596_v38 = vld [vmem:[#allocation2 + $0x2e8] sm:$0xff] }
  0x91   :  { %7976 = vmatmul.mubr.msk.bf16.gmra.mxu0 %vm292_vm1, %v623_v43  ;;  %v1308_v34 = vpack.c.bf16 %v1273_v27, %v1272_v26  ;;  %v85_v37 = vld [vmem:[%s10222_s0 + $0x1f8] sm:$0xff]  ;;  %v597_v40 = vld [vmem:[#allocation2 + $0x2f0] sm:$0xff]  ;;  %v8608_v42 = vld [vmem:[%s10223_s1] ss:$0 sm:$0xff] }
  0x92   :  { %8042 = vmatmul.mubr.msk.bf16.gmra.mxu1 %vm292_vm1, %v1301_v45  ;;  %7979 = vmatprep.mubr.msk.bf16.mxu0 %vm292_vm1, %v9511_v46  ;;  %v1274_v9 = vld [vmem:[#allocation2 + $0x2e9] sm:$0xff]  ;;  %v155_v43 = vmul.f32 %v8608_v42, %v84_v36  ;;  %v156_v45 = vmul.f32 %v8608_v42, %v85_v37  ;;  %v598_v48 = vld [vmem:[#allocation2 + $0x300] sm:$0xff]  ;;  %v631_v56 = vpack.c.bf16 %v597_v40, %v596_v38  ;;  %v600_v63 = vld [vmem:[#allocation2 + $0x318] sm:$0xff] }
  0x93   :  { %8045 = vmatprep.mubr.msk.bf16.mxu1 %vm292_vm1, %v1302_v47  ;;  %v1275_v47 = vld [vmem:[#allocation2 + $0x2f1] sm:$0xff]  ;;  %v599_v50 = vld [vmem:[#allocation2 + $0x308] sm:$0xff]  ;;  %v601_v25 = vld [vmem:[#allocation2 + $0x320] sm:$0xff] }
  0x94   :  { %v1276_v51 = vld [vmem:[#allocation2 + $0x301] sm:$0xff]  ;;  %v1277_v53 = vld [vmem:[#allocation2 + $0x309] sm:$0xff]  ;;  %v226_v54 = vadd.f32 %v9494_v16, %v155_v43  ;;  %v227_v55 = vadd.f32 %v9494_v16, %v156_v45  ;;  %v1309_v57 = vpack.c.bf16 %v1275_v47, %v1274_v9  ;;  %v1278_v16 = vld [vmem:[#allocation2 + $0x319] sm:$0xff]  ;;  %v633_v12 = vpack.c.bf16 %v601_v25, %v600_v63 }
  0x95   :  { %v1894_v2 = vld [vmem:[#allocation2 + $0x2] sm:$0xff]  ;;  %v1895_v7 = vld [vmem:[#allocation2 + $0xa] sm:$0xff]  ;;  %v2572_v8 = vld [vmem:[#allocation2 + $0x18] sm:$0xff] }
  0x96   :  { %v1279_v5 = vld [vmem:[#allocation2 + $0x321] sm:$0xff]  ;;  %v2574_v19 = vld [vmem:[#allocation2 + $0x30] sm:$0xff]  ;;  %v2575_v21 = vld [vmem:[#allocation2 + $0x38] sm:$0xff] }
  0x97   :  { %v2573_v10 = vld [vmem:[#allocation2 + $0x20] sm:$0xff]  ;;  %v1898_v22 = vld [vmem:[#allocation2 + $0x32] sm:$0xff]  ;;  %v2576_v26 = vld [vmem:[#allocation2 + $0x48] sm:$0xff] }
  0x98   :  { %v1897_v18 = vld [vmem:[#allocation2 + $0x22] sm:$0xff]  ;;  %v1899_v23 = vld [vmem:[#allocation2 + $0x3a] sm:$0xff]  ;;  %v2577_v27 = vld [vmem:[#allocation2 + $0x50] sm:$0xff] }
  0x99   :  { %7980 = vmatmul.mubr.msk.bf16.gmra.mxu0 %vm292_vm1, %v625_v11  ;;  %v632_v11 = vpack.c.bf16 %v599_v50, %v598_v48  ;;  %v2638_v36 = vpack.c.bf16 %v2577_v27, %v2576_v26  ;;  %v9559_v37 = vld [vmem:[%s10225_s3 + $0xc] sm:$0x3]  ;;  %v1901_v40 = vld [vmem:[#allocation2 + $0x52] sm:$0xff]  ;;  %v2578_v9 = vld [vmem:[#allocation2 + $0x60] sm:$0xff] }
  0x9a   :  { %8046 = vmatmul.mubr.msk.bf16.gmra.mxu1 %vm292_vm1, %v1303_v59  ;;  %7983 = vmatprep.mubr.msk.bf16.mxu0 %vm292_vm1, %v626_v60  ;;  %v290_v59 = vmax.f32 %v226_v54, 0.0  ;;  %v291_v60 = vmax.f32 %v227_v55, 0.0  ;;  %v1900_v38 = vld [vmem:[#allocation2 + $0x4a] sm:$0xff]  ;;  %v1902_v42 = vld [vmem:[#allocation2 + $0x62] sm:$0xff]  ;;  %v2580_v43 = vld [vmem:[#allocation2 + $0x78] sm:$0xff] }
  0x9b   :  { %8049 = vmatprep.mubr.msk.bf16.mxu1 %vm292_vm1, %v1304_v62  ;;  %v1310_v62 = vpack.c.bf16 %v1277_v53, %v1276_v51  ;;  %v2581_v45 = vld [vmem:[#allocation2 + $0x80] sm:$0xff]  ;;  %v1961_v47 = vpack.c.bf16 %v1901_v40, %v1900_v38  ;;  %v9572_v55 = vld [vmem:[%s10225_s3 + $0xe] sm:$0x3] }
  0x9c   :  { %465 = vst.msk [vmem:[#allocation2 + $0x331] sm:$0xff] %vm292_vm1, %v290_v59  ;;  %466 = vst.msk [vmem:[#allocation2 + $0x339] sm:$0xff] %vm292_vm1, %v291_v60  ;;  %v2640_v51 = vpack.c.bf16 %v2581_v45, %v2580_v43  ;;  %v1904_v53 = vld [vmem:[#allocation2 + $0x7a] sm:$0xff]  ;;  %v1905_v54 = vld [vmem:[#allocation2 + $0x82] sm:$0xff] }
  0x9d   :  { %v1908_v60 = vld [vmem:[#allocation2 + $0xaa] sm:$0xff]  ;;  %v1910_v63 = vld [vmem:[#allocation2 + $0xc2] sm:$0xff]  ;;  %v1935_v45 = vld [vmem:[#allocation2 + $0x21a] sm:$0xff] }
  0x9e   :  { %v1911_v25 = vld [vmem:[#allocation2 + $0xca] sm:$0xff] }
  0x9f   :  { %v2603_v26 = vld [vmem:[#allocation2 + $0x188] sm:$0xff] }
  0xa1   :  { %7984 = vmatmul.mubr.msk.bf16.gmra.mxu0 %vm292_vm1, %v627_v6  ;;  %v1311_v6 = vpack.c.bf16 %v1279_v5, %v1278_v16  ;;  %v1966_v16 = vpack.c.bf16 %v1911_v25, %v1910_v63  ;;  %v1912_v5 = vld [vmem:[#allocation2 + $0xda] sm:$0xff] }
  0xa2   :  { %8050 = vmatmul.mubr.msk.bf16.gmra.mxu1 %vm292_vm1, %v1305_v14  ;;  %7987 = vmatprep.mubr.msk.bf16.mxu0 %vm292_vm1, %v628_v15  ;;  %v1958_v14 = vpack.c.bf16 %v1895_v7, %v1894_v2  ;;  %v2636_v15 = vpack.c.bf16 %v2573_v10, %v2572_v8  ;;  %v1914_v7 = vld [vmem:[#allocation2 + $0xf2] sm:$0xff]  ;;  %v1915_v8 = vld [vmem:[#allocation2 + $0xfa] sm:$0xff] }
  0xa3   :  { %8053 = vmatprep.mubr.msk.bf16.mxu1 %vm292_vm1, %v1306_v17  ;;  %v1896_v17 = vld [vmem:[#allocation2 + $0x1a] sm:$0xff] }
  0xa4   :  { %v1959_v24 = vpack.c.bf16 %v1897_v18, %v1896_v17  ;;  %v1920_v17 = vld [vmem:[#allocation2 + $0x13a] sm:$0xff]  ;;  %v1922_v18 = vld [vmem:[#allocation2 + $0x152] sm:$0xff] }
  0xa9   :  { %7988 = vmatmul.mubr.msk.bf16.gmra.mxu0 %vm292_vm1, %v629_v29  ;;  %v2637_v29 = vpack.c.bf16 %v2575_v21, %v2574_v19  ;;  %v1923_v19 = vld [vmem:[#allocation2 + $0x15a] sm:$0xff] }
  0xaa   :  { %8054 = vmatmul.mubr.msk.bf16.gmra.mxu1 %vm292_vm1, %v1307_v31  ;;  %7991 = vmatprep.mubr.msk.bf16.mxu0 %vm292_vm1, %v630_v33  ;;  %v3509_v31 = vsel %vm795_vm0, %v9361_v44, 0  ;;  %v1960_v33 = vpack.c.bf16 %v1899_v23, %v1898_v22  ;;  %v2579_v44 = vld [vmem:[#allocation2 + $0x68] sm:$0xff]  ;;  %v1926_v23 = vld [vmem:[#allocation2 + $0x1b2] sm:$0xff] }
  0xab   :  { %8057 = vmatprep.mubr.msk.bf16.mxu1 %vm292_vm1, %v1308_v34  ;;  %v4187_v34 = vsel %vm795_vm0, %v9426_v41, 0  ;;  %v1903_v41 = vld [vmem:[#allocation2 + $0x6a] sm:$0xff]  ;;  %v2639_v48 = vpack.c.bf16 %v2579_v44, %v2578_v9 }
  0xac   :  { %v1962_v50 = vpack.c.bf16 %v1903_v41, %v1902_v42  ;;  %v1924_v22 = vld [vmem:[#allocation2 + $0x16a] sm:$0xff]  ;;  %v1932_v42 = vld [vmem:[#allocation2 + $0x1fa] sm:$0xff]  ;;  %v1933_v41 = vld [vmem:[#allocation2 + $0x202] sm:$0xff] }
  0xb1   :  { %7992 = vmatmul.mubr.msk.bf16.gmra.mxu0 %vm292_vm1, %v631_v56  ;;  %v1906_v56 = vld [vmem:[#allocation2 + $0x92] sm:$0xff] }
  0xb2   :  { %8058 = vmatmul.mubr.msk.bf16.gmra.mxu1 %vm292_vm1, %v1309_v57  ;;  %7995 = vmatprep.mubr.msk.bf16.mxu0 %vm292_vm1, %v632_v11  ;;  %v1907_v57 = vld [vmem:[#allocation2 + $0x9a] sm:$0xff]  ;;  %v1963_v11 = vpack.c.bf16 %v1905_v54, %v1904_v53  ;;  %v2613_v53 = vld [vmem:[#allocation2 + $0x230] sm:$0xff] }
  0xb3   :  { %8061 = vmatprep.mubr.msk.bf16.mxu1 %vm292_vm1, %v1310_v62  ;;  %v1964_v59 = vpack.c.bf16 %v1907_v57, %v1906_v56  ;;  %v1909_v62 = vld [vmem:[#allocation2 + $0xb2] sm:$0xff]  ;;  %v1977_v56 = vpack.c.bf16 %v1933_v41, %v1932_v42  ;;  %v2620_v42 = vld [vmem:[#allocation2 + $0x288] sm:$0xff] }
  0xb4   :  { %v1965_v2 = vpack.c.bf16 %v1909_v62, %v1908_v60  ;;  %v2621_v41 = vld [vmem:[#allocation2 + $0x290] sm:$0xff] }
  0xb9   :  { %7996 = vmatmul.mubr.msk.bf16.gmra.mxu0 %vm292_vm1, %v633_v12  ;;  %v1916_v12 = vld [vmem:[#allocation2 + $0x10a] sm:$0xff] }
  0xba   :  { %8062 = vmatmul.mubr.msk.bf16.gmra.mxu1 %vm292_vm1, %v1311_v6  ;;  %8067 = vmatprep.mubr.msk.bf16.mxu0 %vm292_vm1, %v1958_v14  ;;  %v1918_v6 = vld [vmem:[#allocation2 + $0x122] sm:$0xff]  ;;  %v1919_v14 = vld [vmem:[#allocation2 + $0x12a] sm:$0xff] }
  0xbb   :  { %8133 = vmatprep.mubr.msk.bf16.mxu1 %vm292_vm1, %v2636_v15 }
  0xc1   :  { %8068 = vmatmul.mubr.msk.bf16.vlgmr.msra.gmra.mxu0 %vm292_vm1, %v1959_v24  ;;  %v2602_v24 = vld [vmem:[#allocation2 + $0x180] sm:$0xff] }
  0xc2   :  { %8198 = vmatpush3.bf16.msra.mxu0 %v3509_v31  ;;  %8134 = vmatmul.mubr.msk.bf16.vlgmr.msra.gmra.mxu1 %vm292_vm1, %v2637_v29  ;;  %v2651_v29 = vpack.c.bf16 %v2603_v26, %v2602_v24 }
  0xc3   :  { %8071 = vmatprep.mubr.msk.bf16.mxu0 %vm292_vm1, %v1960_v33  ;;  %8264 = vmatpush3.bf16.msra.mxu1 %v4187_v34  ;;  %v1929_v33 = vld [vmem:[#allocation2 + $0x1d2] sm:$0xff]  ;;  %v1930_v34 = vld [vmem:[#allocation2 + $0x1e2] sm:$0xff] }
  0xc4   :  { %8137 = vmatprep.mubr.msk.bf16.mxu1 %vm292_vm1, %v2638_v36  ;;  %8599 = vmatprep.subr.msk.bf16.mxu0 %vm795_vm0, %v9559_v37  ;;  %v1931_v36 = vld [vmem:[#allocation2 + $0x1ea] sm:$0xff] }
  0xc5   :  { %8600 = vmatprep.subr.msk.bf16.mxu1 %vm795_vm0, %v9572_v55  ;;  %v1976_v38 = vpack.c.bf16 %v1931_v36, %v1930_v34  ;;  %v2619_v36 = vld [vmem:[#allocation2 + $0x278] sm:$0xff] }
  0xc9   :  { %8072 = vmatmul.mubr.msk.bf16.gmra.mxu0 %vm292_vm1, %v1961_v47 }
  0xca   :  { %8138 = vmatmul.mubr.msk.bf16.gmra.mxu1 %vm292_vm1, %v2639_v48  ;;  %8075 = vmatprep.mubr.msk.bf16.mxu0 %vm292_vm1, %v1962_v50 }
  0xcb   :  { %8141 = vmatprep.mubr.msk.bf16.mxu1 %vm292_vm1, %v2640_v51  ;;  %v2612_v51 = vld [vmem:[#allocation2 + $0x228] sm:$0xff] }
  0xcc   :  { %v2656_v62 = vpack.c.bf16 %v2613_v53, %v2612_v51  ;;  %v2660_v53 = vpack.c.bf16 %v2621_v41, %v2620_v42 }
  0xd1   :  { %8076 = vmatmul.mubr.msk.bf16.gmra.mxu0 %vm292_vm1, %v1963_v11 }
  0xd2   :  { %8142 = vmatmul.mubr.msk.bf16.gmra.mxu1 %vm292_vm1, %v9186_v49  ;;  %8079 = vmatprep.mubr.msk.bf16.mxu0 %vm292_vm1, %v1964_v59  ;;  %v1913_v49 = vld [vmem:[#allocation2 + $0xe2] sm:$0xff] }
  0xd3   :  { %8145 = vmatprep.mubr.msk.bf16.mxu1 %vm292_vm1, %v9232_v20  ;;  %v1967_v10 = vpack.c.bf16 %v1913_v49, %v1912_v5  ;;  %v1968_v20 = vpack.c.bf16 %v1915_v8, %v1914_v7  ;;  %v1936_v7 = vld [vmem:[#allocation2 + $0x22a] sm:$0xff]  ;;  %v1937_v8 = vld [vmem:[#allocation2 + $0x232] sm:$0xff] }
  0xd9   :  { %8080 = vmatmul.mubr.msk.bf16.gmra.mxu0 %vm292_vm1, %v1965_v2 }
  0xda   :  { %8146 = vmatmul.mubr.msk.bf16.gmra.mxu1 %vm292_vm1, %v9248_v32  ;;  %8083 = vmatprep.mubr.msk.bf16.mxu0 %vm292_vm1, %v1966_v16  ;;  %v1917_v32 = vld [vmem:[#allocation2 + $0x112] sm:$0xff] }
  0xdb   :  { %8149 = vmatprep.mubr.msk.bf16.mxu1 %vm292_vm1, %v9293_v61  ;;  %v1969_v15 = vpack.c.bf16 %v1917_v32, %v1916_v12  ;;  %v1970_v61 = vpack.c.bf16 %v1919_v14, %v1918_v6  ;;  %v1939_v12 = vld [vmem:[#allocation2 + $0x24a] sm:$0xff] }
  0xe1   :  { %8084 = vmatmul.mubr.msk.bf16.gmra.mxu0 %vm292_vm1, %v1967_v10 }
  0xe2   :  { %8150 = vmatmul.mubr.msk.bf16.gmra.mxu1 %vm292_vm1, %v9307_v3  ;;  %8087 = vmatprep.mubr.msk.bf16.mxu0 %vm292_vm1, %v1968_v20  ;;  %v1921_v3 = vld [vmem:[#allocation2 + $0x142] sm:$0xff] }
  0xe3   :  { %8153 = vmatprep.mubr.msk.bf16.mxu1 %vm292_vm1, %v9375_v58  ;;  %v1971_v21 = vpack.c.bf16 %v1921_v3, %v1920_v17  ;;  %v1972_v58 = vpack.c.bf16 %v1923_v19, %v1922_v18  ;;  %v1938_v20 = vld [vmem:[#allocation2 + $0x242] sm:$0xff]  ;;  %v1979_v3 = vpack.c.bf16 %v1937_v8, %v1936_v7 }
  0xe9   :  { %8088 = vmatmul.mubr.msk.bf16.gmra.mxu0 %vm292_vm1, %v1969_v15  ;;  %v2616_v15 = vld [vmem:[#allocation2 + $0x258] sm:$0xff] }
  0xea   :  { %8154 = vmatmul.mubr.msk.bf16.gmra.mxu1 %vm292_vm1, %v9392_v0  ;;  %8091 = vmatprep.mubr.msk.bf16.mxu0 %vm292_vm1, %v1970_v61  ;;  %v1925_v0 = vld [vmem:[#allocation2 + $0x172] sm:$0xff]  ;;  %v2617_v61 = vld [vmem:[#allocation2 + $0x260] sm:$0xff] }
  0xeb   :  { %8157 = vmatprep.mubr.msk.bf16.mxu1 %vm292_vm1, %v9418_v35  ;;  %v1927_v35 = vld [vmem:[#allocation2 + $0x1ba] sm:$0xff]  ;;  %v1973_v27 = vpack.c.bf16 %v1925_v0, %v1924_v22  ;;  %v2658_v22 = vpack.c.bf16 %v2617_v61, %v2616_v15 }
  0xec   :  { %v1974_v31 = vpack.c.bf16 %v1927_v35, %v1926_v23 }
  0xf1   :  { %8092 = vmatmul.mubr.msk.bf16.gmra.mxu0 %vm292_vm1, %v1971_v21  ;;  %v1980_v21 = vpack.c.bf16 %v1939_v12, %v1938_v20  ;;  %v2625_v20 = vld [vmem:[#allocation2 + $0x2c0] sm:$0xff] }
  0xf2   :  { %8158 = vmatmul.mubr.msk.bf16.gmra.mxu1 %vm292_vm1, %v9420_v39  ;;  %8095 = vmatprep.mubr.msk.bf16.mxu0 %vm292_vm1, %v1972_v58  ;;  %v1928_v39 = vld [vmem:[#allocation2 + $0x1ca] sm:$0xff] }
  0xf3   :  { %8161 = vmatprep.mubr.msk.bf16.mxu1 %vm292_vm1, %v9439_v52  ;;  %v1975_v52 = vpack.c.bf16 %v1929_v33, %v1928_v39  ;;  %v1941_v39 = vld [vmem:[#allocation2 + $0x262] sm:$0xff]  ;;  %v2618_v33 = vld [vmem:[#allocation2 + $0x270] sm:$0xff] }
  0xf9   :  { %8096 = vmatmul.mubr.msk.bf16.gmra.mxu0 %vm292_vm1, %v1973_v27 }
  0xfa   :  { %8162 = vmatmul.mubr.msk.bf16.gmra.mxu1 %vm292_vm1, %v2651_v29  ;;  %8099 = vmatprep.mubr.msk.bf16.mxu0 %vm292_vm1, %v1974_v31  ;;  %v1940_v31 = vld [vmem:[#allocation2 + $0x25a] sm:$0xff] }
  0xfb   :  { %8165 = vmatprep.mubr.msk.bf16.mxu1 %vm292_vm1, %v9446_v1  ;;  %v1934_v1 = vld [vmem:[#allocation2 + $0x212] sm:$0xff] }
  0xfc   :  { %v1978_v59 = vpack.c.bf16 %v1935_v45, %v1934_v1 }
 0x101   :  { %v7937_v40 = vpop.f32.mrf.mxu0  ;;  %8100 = vmatmul.mubr.msk.bf16.gmra.mxu0 %vm292_vm1, %v1975_v52  ;;  %v1942_v52 = vld [vmem:[#allocation2 + $0x272] sm:$0xff] }
 0x102   :  { %v1090_v9 = vadd.f32 %v7937_v40, %v9461_v13  ;;  %v8003_v44 = vpop.f32.mrf.mxu1  ;;  %8166 = vmatmul.mubr.msk.bf16.gmra.mxu1 %vm292_vm1, %v9448_v4  ;;  %8103 = vmatprep.mubr.msk.bf16.mxu0 %vm292_vm1, %v1976_v38  ;;  %v1943_v38 = vld [vmem:[#allocation2 + $0x27a] sm:$0xff] }
 0x103   :  { %v833_v43 = vpop.f32.mrf.mxu0  ;;  %8169 = vmatprep.mubr.msk.bf16.mxu1 %vm292_vm1, %v9499_v28 }
 0x104   :  { %v1088_v47 = vadd.f32 %v9461_v13, %v833_v43  ;;  %v1768_v48 = vadd.f32 %v8003_v44, %v1090_v9  ;;  %v1511_v50 = vpop.f32.mrf.mxu1 }
 0x105   :  { %v7938_v54 = vpop.f32.mrf.mxu0 }
 0x106   :  { %v1091_v4 = vadd.f32 %v7938_v54, %v9461_v13  ;;  %1832 = vst [vmem:[#allocation3 + $0x10] sm:$0xff] %v1768_v48  ;;  %v1766_v57 = vadd.f32 %v1511_v50, %v1088_v47  ;;  %v8004_v11 = vpop.f32.mrf.mxu1  ;;  %v2659_v48 = vpack.c.bf16 %v2619_v36, %v2618_v33  ;;  %v1982_v50 = vpack.c.bf16 %v1943_v38, %v1942_v52  ;;  %v2628_v52 = vld [vmem:[#allocation2 + $0x2e8] sm:$0xff]  ;;  %v2629_v38 = vld [vmem:[#allocation2 + $0x2f0] sm:$0xff] }
 0x107   :  { %v836_v60 = vpop.f32.mrf.mxu0 }
 0x108   :  { %v1089_v28 = vadd.f32 %v9461_v13, %v836_v60  ;;  %1830 = vst [vmem:[#allocation3] sm:$0xff] %v1766_v57  ;;  %v1769_v63 = vadd.f32 %v8004_v11, %v1091_v4  ;;  %v1514_v25 = vpop.f32.mrf.mxu1 }
 0x109   :  { %v7941_v2 = vpop.f32.mrf.mxu0  ;;  %8104 = vmatmul.mubr.msk.bf16.gmra.mxu0 %vm292_vm1, %v1977_v56 }
 0x10a   :  { %v1094_v16 = vadd.f32 %v7941_v2, %v9461_v13  ;;  %1833 = vst [vmem:[#allocation3 + $0x18] sm:$0xff] %v1769_v63  ;;  %v1767_v5 = vadd.f32 %v1514_v25, %v1089_v28  ;;  %v8007_v49 = vpop.f32.mrf.mxu1  ;;  %8170 = vmatmul.mubr.msk.bf16.gmra.mxu1 %vm292_vm1, %v9501_v30  ;;  %8107 = vmatprep.mubr.msk.bf16.mxu0 %vm292_vm1, %v1978_v59  ;;  %v1945_v28 = vld [vmem:[#allocation2 + $0x292] sm:$0xff]  ;;  %v2622_v63 = vld [vmem:[#allocation2 + $0x2a0] sm:$0xff]  ;;  %v2623_v2 = vld [vmem:[#allocation2 + $0x2a8] sm:$0xff] }
 0x10b   :  { %v849_v10 = vpop.f32.mrf.mxu0  ;;  %8173 = vmatprep.mubr.msk.bf16.mxu1 %vm292_vm1, %v2656_v62  ;;  %v1944_v62 = vld [vmem:[#allocation2 + $0x28a] sm:$0xff]  ;;  %v2661_v61 = vpack.c.bf16 %v2623_v2, %v2622_v63 }
 0x10c   :  { %v1092_v32 = vadd.f32 %v9461_v13, %v849_v10  ;;  %1831 = vst [vmem:[#allocation3 + $0x8] sm:$0xff] %v1767_v5  ;;  %v1772_v6 = vadd.f32 %v8007_v49, %v1094_v16  ;;  %v1527_v14 = vpop.f32.mrf.mxu1  ;;  %v1946_v16 = vld [vmem:[#allocation2 + $0x2a2] sm:$0xff]  ;;  %v1947_v5 = vld [vmem:[#allocation2 + $0x2aa] sm:$0xff]  ;;  %v2624_v10 = vld [vmem:[#allocation2 + $0x2b8] sm:$0xff] }
 0x10d   :  { %v7942_v17 = vpop.f32.mrf.mxu0 }
 0x10e   :  { %v1095_v30 = vadd.f32 %v7942_v17, %v9461_v13  ;;  %1836 = vst [vmem:[#allocation3 + $0x30] sm:$0xff] %v1772_v6  ;;  %v1770_v18 = vadd.f32 %v1527_v14, %v1092_v32  ;;  %v8008_v19 = vpop.f32.mrf.mxu1  ;;  %v1983_v32 = vpack.c.bf16 %v1945_v28, %v1944_v62  ;;  %v1984_v17 = vpack.c.bf16 %v1947_v5, %v1946_v16  ;;  %v1954_v62 = vld [vmem:[#allocation2 + $0x302] sm:$0xff]  ;;  %v1955_v28 = vld [vmem:[#allocation2 + $0x30a] sm:$0xff]  ;;  %v2632_v16 = vld [vmem:[#allocation2 + $0x318] sm:$0xff] }
 0x10f   :  { %v852_v58 = vpop.f32.mrf.mxu0  ;;  %v2633_v5 = vld [vmem:[#allocation2 + $0x320] sm:$0xff] }
 0x110   :  { %v1093_v0 = vadd.f32 %v9461_v13, %v852_v58  ;;  %1834 = vst [vmem:[#allocation3 + $0x20] sm:$0xff] %v1770_v18  ;;  %v1773_v23 = vadd.f32 %v8008_v19, %v1095_v30  ;;  %v1530_v24 = vpop.f32.mrf.mxu1  ;;  %v2662_v30 = vpack.c.bf16 %v2625_v20, %v2624_v10 }
 0x111   :  { %v7945_v26 = vpop.f32.mrf.mxu0  ;;  %8108 = vmatmul.mubr.msk.bf16.gmra.mxu0 %vm292_vm1, %v1979_v3 }
 0x112   :  { %v1098_v35 = vadd.f32 %v7945_v26, %v9461_v13  ;;  %1837 = vst [vmem:[#allocation3 + $0x38] sm:$0xff] %v1773_v23  ;;  %v1771_v27 = vadd.f32 %v1530_v24, %v1093_v0  ;;  %v8011_v29 = vpop.f32.mrf.mxu1  ;;  %8174 = vmatmul.mubr.msk.bf16.gmra.mxu1 %vm292_vm1, %v9511_v46  ;;  %8111 = vmatprep.mubr.msk.bf16.mxu0 %vm292_vm1, %v1980_v21  ;;  %v1948_v24 = vld [vmem:[#allocation2 + $0x2ba] sm:$0xff]  ;;  %v1949_v26 = vld [vmem:[#allocation2 + $0x2c2] sm:$0xff] }
 0x113   :  { %v865_v34 = vpop.f32.mrf.mxu0  ;;  %8177 = vmatprep.mubr.msk.bf16.mxu1 %vm292_vm1, %v2658_v22  ;;  %v1981_v46 = vpack.c.bf16 %v1941_v39, %v1940_v31  ;;  %v1950_v31 = vld [vmem:[#allocation2 + $0x2d2] sm:$0xff]  ;;  %v1951_v39 = vld [vmem:[#allocation2 + $0x2da] sm:$0xff] }
 0x114   :  { %v1096_v40 = vadd.f32 %v9461_v13, %v865_v34  ;;  %1835 = vst [vmem:[#allocation3 + $0x28] sm:$0xff] %v1771_v27  ;;  %v1776_v9 = vadd.f32 %v8011_v29, %v1098_v35  ;;  %v1543_v44 = vpop.f32.mrf.mxu1  ;;  %v2626_v35 = vld [vmem:[#allocation2 + $0x2d0] sm:$0xff]  ;;  %v2627_v29 = vld [vmem:[#allocation2 + $0x2d8] sm:$0xff] }
 0x115   :  { %v7946_v43 = vpop.f32.mrf.mxu0 }
 0x116   :  { %v1099_v1 = vadd.f32 %v7946_v43, %v9461_v13  ;;  %1840 = vst [vmem:[#allocation3 + $0x50] sm:$0xff] %v1776_v9  ;;  %v1774_v45 = vadd.f32 %v1543_v44, %v1096_v40  ;;  %v8012_v47 = vpop.f32.mrf.mxu1  ;;  %v1985_v9 = vpack.c.bf16 %v1949_v26, %v1948_v24  ;;  %v2663_v43 = vpack.c.bf16 %v2627_v29, %v2626_v35  ;;  %v3250_v24 = vld [vmem:[#allocation2 + $0x19] sm:$0xff]  ;;  %v3251_v26 = vld [vmem:[#allocation2 + $0x21] sm:$0xff] }
 0x117   :  { %v868_v51 = vpop.f32.mrf.mxu0 }
 0x118   :  { %v1097_v54 = vadd.f32 %v9461_v13, %v868_v51  ;;  %1838 = vst [vmem:[#allocation3 + $0x40] sm:$0xff] %v1774_v45  ;;  %v1777_v56 = vadd.f32 %v8012_v47, %v1099_v1  ;;  %v1546_v4 = vpop.f32.mrf.mxu1  ;;  %v2664_v45 = vpack.c.bf16 %v2629_v38, %v2628_v52 }
 0x119   :  { %v7949_v57 = vpop.f32.mrf.mxu0  ;;  %8112 = vmatmul.mubr.msk.bf16.gmra.mxu0 %vm292_vm1, %v1981_v46  ;;  %v1986_v46 = vpack.c.bf16 %v1951_v39, %v1950_v31  ;;  %v3928_v31 = vld [vmem:[#allocation2 + $0x1a] sm:$0xff]  ;;  %v3929_v39 = vld [vmem:[#allocation2 + $0x22] sm:$0xff] }
 0x11a   :  { %v1102_v11 = vadd.f32 %v7949_v57, %v9461_v13  ;;  %1841 = vst [vmem:[#allocation3 + $0x58] sm:$0xff] %v1777_v56  ;;  %v1775_v59 = vadd.f32 %v1546_v4, %v1097_v54  ;;  %v8015_v60 = vpop.f32.mrf.mxu1  ;;  %8178 = vmatmul.mubr.msk.bf16.gmra.mxu1 %vm292_vm1, %v2659_v48  ;;  %8115 = vmatprep.mubr.msk.bf16.mxu0 %vm292_vm1, %v1982_v50  ;;  %v1952_v4 = vld [vmem:[#allocation2 + $0x2ea] sm:$0xff]  ;;  %v1953_v57 = vld [vmem:[#allocation2 + $0x2f2] sm:$0xff] }
 0x11b   :  { %v881_v25 = vpop.f32.mrf.mxu0  ;;  %8181 = vmatprep.mubr.msk.bf16.mxu1 %vm292_vm1, %v2660_v53 }
 0x11c   :  { %v1100_v49 = vadd.f32 %v9461_v13, %v881_v25  ;;  %1839 = vst [vmem:[#allocation3 + $0x48] sm:$0xff] %v1775_v59  ;;  %v1780_v7 = vadd.f32 %v8015_v60, %v1102_v11  ;;  %v1559_v8 = vpop.f32.mrf.mxu1  ;;  %v2630_v11 = vld [vmem:[#allocation2 + $0x300] sm:$0xff]  ;;  %v2631_v60 = vld [vmem:[#allocation2 + $0x308] sm:$0xff] }
 0x11d   :  { %v7950_v12 = vpop.f32.mrf.mxu0 }
 0x11e   :  { %v1103_v6 = vadd.f32 %v7950_v12, %v9461_v13  ;;  %1844 = vst [vmem:[#allocation3 + $0x70] sm:$0xff] %v1780_v7  ;;  %v1778_v14 = vadd.f32 %v1559_v8, %v1100_v49  ;;  %v8016_v15 = vpop.f32.mrf.mxu1  ;;  %v1987_v7 = vpack.c.bf16 %v1953_v57, %v1952_v4  ;;  %v2665_v12 = vpack.c.bf16 %v2631_v60, %v2630_v11  ;;  %v9677_v4 = vld [vmem:[#allocation3 + $0x140] sm:$0xff]  ;;  %v3255_v60 = vld [vmem:[#allocation2 + $0x51] sm:$0xff] }
 0x11f   :  { %v884_v3 = vpop.f32.mrf.mxu0 }
 0x120   :  { %v1101_v18 = vadd.f32 %v9461_v13, %v884_v3  ;;  %1842 = vst [vmem:[#allocation3 + $0x60] sm:$0xff] %v1778_v14  ;;  %v1781_v19 = vadd.f32 %v8016_v15, %v1103_v6  ;;  %v1562_v21 = vpop.f32.mrf.mxu1  ;;  %v2666_v14 = vpack.c.bf16 %v2633_v5, %v2632_v16 }
 0x121   :  { %v7953_v58 = vpop.f32.mrf.mxu0  ;;  %8116 = vmatmul.mubr.msk.bf16.gmra.mxu0 %vm292_vm1, %v1983_v32  ;;  %v1988_v32 = vpack.c.bf16 %v1955_v28, %v1954_v62 }
 0x122   :  { %v1106_v22 = vadd.f32 %v7953_v58, %v9461_v13  ;;  %1845 = vst [vmem:[#allocation3 + $0x78] sm:$0xff] %v1781_v19  ;;  %v1779_v0 = vadd.f32 %v1562_v21, %v1101_v18  ;;  %v8019_v23 = vpop.f32.mrf.mxu1  ;;  %8182 = vmatmul.mubr.msk.bf16.gmra.mxu1 %vm292_vm1, %v2661_v61  ;;  %8119 = vmatprep.mubr.msk.bf16.mxu0 %vm292_vm1, %v1984_v17  ;;  %v1956_v21 = vld [vmem:[#allocation2 + $0x31a] sm:$0xff]  ;;  %v1957_v58 = vld [vmem:[#allocation2 + $0x322] sm:$0xff] }
 0x123   :  { %v897_v27 = vpop.f32.mrf.mxu0  ;;  %8185 = vmatprep.mubr.msk.bf16.mxu1 %vm292_vm1, %v2662_v30 }
 0x124   :  { %v1104_v33 = vadd.f32 %v9461_v13, %v897_v27  ;;  %1843 = vst [vmem:[#allocation3 + $0x68] sm:$0xff] %v1779_v0  ;;  %v1784_v34 = vadd.f32 %v8019_v23, %v1106_v22  ;;  %v1575_v36 = vpop.f32.mrf.mxu1  ;;  %v2634_v22 = vld [vmem:[#allocation2 + $0x330] sm:$0xff]  ;;  %v2635_v23 = vld [vmem:[#allocation2 + $0x338] sm:$0xff] }
 0x125   :  { %v7954_v40 = vpop.f32.mrf.mxu0 }
 0x126   :  { %v1107_v44 = vadd.f32 %v7954_v40, %v9461_v13  ;;  %1848 = vst [vmem:[#allocation3 + $0x90] sm:$0xff] %v1784_v34  ;;  %v1782_v42 = vadd.f32 %v1575_v36, %v1104_v33  ;;  %v8020_v41 = vpop.f32.mrf.mxu1  ;;  %v1989_v34 = vpack.c.bf16 %v1957_v58, %v1956_v21  ;;  %v2667_v40 = vpack.c.bf16 %v2635_v23, %v2634_v22  ;;  %v3935_v21 = vld [vmem:[#allocation2 + $0x6a] sm:$0xff]  ;;  %v3258_v58 = vld [vmem:[#allocation2 + $0x79] sm:$0xff]  ;;  %v3259_v22 = vld [vmem:[#allocation2 + $0x81] sm:$0xff] }
 0x127   :  { %v900_v1 = vpop.f32.mrf.mxu0 }
 0x128   :  { %v1105_v47 = vadd.f32 %v9461_v13, %v900_v1  ;;  %1846 = vst [vmem:[#allocation3 + $0x80] sm:$0xff] %v1782_v42  ;;  %v1785_v48 = vadd.f32 %v8020_v41, %v1107_v44  ;;  %v1578_v50 = vpop.f32.mrf.mxu1  ;;  %v3992_v42 = vpack.c.bf16 %v3929_v39, %v3928_v31 }
 0x129   :  { %v7957_v51 = vpop.f32.mrf.mxu0  ;;  %8120 = vmatmul.mubr.msk.bf16.gmra.mxu0 %vm292_vm1, %v1985_v9  ;;  %v3314_v9 = vpack.c.bf16 %v3251_v26, %v3250_v24  ;;  %v3936_v26 = vld [vmem:[#allocation2 + $0x7a] sm:$0xff] }
 0x12a   :  { %v1110_v53 = vadd.f32 %v7957_v51, %v9461_v13  ;;  %1849 = vst [vmem:[#allocation3 + $0x98] sm:$0xff] %v1785_v48  ;;  %v1783_v54 = vadd.f32 %v1578_v50, %v1105_v47  ;;  %v8023_v56 = vpop.f32.mrf.mxu1  ;;  %8186 = vmatmul.mubr.msk.bf16.gmra.mxu1 %vm292_vm1, %v2663_v43  ;;  %8123 = vmatprep.mubr.msk.bf16.mxu0 %vm292_vm1, %v1986_v46  ;;  %v3252_v50 = vld [vmem:[#allocation2 + $0x31] sm:$0xff]  ;;  %v3253_v51 = vld [vmem:[#allocation2 + $0x39] sm:$0xff] }
 0x12b   :  { %v913_v59 = vpop.f32.mrf.mxu0  ;;  %8189 = vmatprep.mubr.msk.bf16.mxu1 %vm292_vm1, %v2664_v45  ;;  %v3315_v28 = vpack.c.bf16 %v3253_v51, %v3252_v50  ;;  %v3939_v51 = vld [vmem:[#allocation2 + $0x9a] sm:$0xff] }
 0x12c   :  { %v1108_v63 = vadd.f32 %v9461_v13, %v913_v59  ;;  %1847 = vst [vmem:[#allocation3 + $0x88] sm:$0xff] %v1783_v54  ;;  %v1788_v25 = vadd.f32 %v8023_v56, %v1110_v53  ;;  %v1591_v2 = vpop.f32.mrf.mxu1  ;;  %v3930_v54 = vld [vmem:[#allocation2 + $0x32] sm:$0xff]  ;;  %v3931_v56 = vld [vmem:[#allocation2 + $0x3a] sm:$0xff]  ;;  %v3254_v59 = vld [vmem:[#allocation2 + $0x49] sm:$0xff] }
 0x12d   :  { %v7958_v49 = vpop.f32.mrf.mxu0 }
 0x12e   :  { %v1111_v8 = vadd.f32 %v7958_v49, %v9461_v13  ;;  %1852 = vst [vmem:[#allocation3 + $0xb0] sm:$0xff] %v1788_v25  ;;  %v1786_v10 = vadd.f32 %v1591_v2, %v1108_v63  ;;  %v8024_v20 = vpop.f32.mrf.mxu1  ;;  %v3932_v63 = vld [vmem:[#allocation2 + $0x4a] sm:$0xff]  ;;  %v3933_v25 = vld [vmem:[#allocation2 + $0x52] sm:$0xff]  ;;  %v3993_v49 = vpack.c.bf16 %v3931_v56, %v3930_v54 }
 0x12f   :  { %v916_v6 = vpop.f32.mrf.mxu0  ;;  %v3263_v54 = vld [vmem:[#allocation2 + $0xb1] sm:$0xff] }
 0x130   :  { %v1109_v15 = vadd.f32 %v9461_v13, %v916_v6  ;;  %1850 = vst [vmem:[#allocation3 + $0xa0] sm:$0xff] %v1786_v10  ;;  %v1789_v61 = vadd.f32 %v8024_v20, %v1111_v8  ;;  %v1594_v17 = vpop.f32.mrf.mxu1  ;;  %v4866_v8 = vsel %vm795_vm0, %v9559_v37, 0  ;;  %v3316_v10 = vpack.c.bf16 %v3255_v60, %v3254_v59  ;;  %v3941_v59 = vld [vmem:[#allocation2 + $0xb2] sm:$0xff] }
 0x131   :  { %v7961_v3 = vpop.f32.mrf.mxu0  ;;  %8124 = vmatmul.mubr.msk.bf16.gmra.mxu0 %vm292_vm1, %v1987_v7  ;;  %v5544_v6 = vsel %vm795_vm0, %v9572_v55, 0 }
 0x132   :  { %v1114_v30 = vadd.f32 %v7961_v3, %v9461_v13  ;;  %1853 = vst [vmem:[#allocation3 + $0xb8] sm:$0xff] %v1789_v61  ;;  %v1787_v18 = vadd.f32 %v1594_v17, %v1109_v15  ;;  %v8027_v19 = vpop.f32.mrf.mxu1  ;;  %8190 = vmatmul.mubr.msk.bf16.gmra.mxu1 %vm292_vm1, %v2665_v12  ;;  %8127 = vmatprep.mubr.msk.bf16.mxu0 %vm292_vm1, %v1988_v32  ;;  %v7537_v61 = vld [vmem:[%s10225_s3 + $0x10] sm:$0x3] }
 0x133   :  { %v929_v0 = vpop.f32.mrf.mxu0  ;;  %8193 = vmatprep.mubr.msk.bf16.mxu1 %vm292_vm1, %v2666_v14  ;;  %v3994_v14 = vpack.c.bf16 %v3933_v25, %v3932_v63 }
 0x134   :  { %v1112_v35 = vadd.f32 %v9461_v13, %v929_v0  ;;  %1851 = vst [vmem:[#allocation3 + $0xa8] sm:$0xff] %v1787_v18  ;;  %v1792_v27 = vadd.f32 %v8027_v19, %v1114_v30  ;;  %v1607_v29 = vpop.f32.mrf.mxu1  ;;  %v3256_v30 = vld [vmem:[#allocation2 + $0x61] sm:$0xff]  ;;  %v3257_v18 = vld [vmem:[#allocation2 + $0x69] sm:$0xff] }
 0x135   :  { %v7962_v33 = vpop.f32.mrf.mxu0  ;;  %v3934_v19 = vld [vmem:[#allocation2 + $0x62] sm:$0xff] }
 0x136   :  { %v1115_v36 = vadd.f32 %v7962_v33, %v9461_v13  ;;  %1856 = vst [vmem:[#allocation3 + $0xd0] sm:$0xff] %v1792_v27  ;;  %v1790_v52 = vadd.f32 %v1607_v29, %v1112_v35  ;;  %v8028_v38 = vpop.f32.mrf.mxu1  ;;  %v3937_v35 = vld [vmem:[#allocation2 + $0x82] sm:$0xff]  ;;  %v3317_v29 = vpack.c.bf16 %v3257_v18, %v3256_v30  ;;  %v3943_v30 = vld [vmem:[#allocation2 + $0xca] sm:$0xff]  ;;  %v3266_v18 = vld [vmem:[#allocation2 + $0xd9] sm:$0xff] }
 0x137   :  { %v932_v44 = vpop.f32.mrf.mxu0 }
 0x138   :  { %v1113_v41 = vadd.f32 %v9461_v13, %v932_v44  ;;  %1854 = vst [vmem:[#allocation3 + $0xc0] sm:$0xff] %v1790_v52  ;;  %v1793_v43 = vadd.f32 %v8028_v38, %v1115_v36  ;;  %v1610_v46 = vpop.f32.mrf.mxu1  ;;  %v3318_v36 = vpack.c.bf16 %v3259_v22, %v3258_v58  ;;  %v3996_v38 = vpack.c.bf16 %v3937_v35, %v3936_v26  ;;  %v3944_v58 = vld [vmem:[#allocation2 + $0xda] sm:$0xff]  ;;  %v3945_v22 = vld [vmem:[#allocation2 + $0xe2] sm:$0xff] }
 0x139   :  { %v7965_v1 = vpop.f32.mrf.mxu0  ;;  %8128 = vmatmul.mubr.msk.bf16.gmra.mxu0 %vm292_vm1, %v1989_v34  ;;  %v3995_v34 = vpack.c.bf16 %v3935_v21, %v3934_v19  ;;  %v3267_v19 = vld [vmem:[#allocation2 + $0xe1] sm:$0xff] }
 0x13a   :  { %v1118_v45 = vadd.f32 %v7965_v1, %v9461_v13  ;;  %1857 = vst [vmem:[#allocation3 + $0xd8] sm:$0xff] %v1793_v43  ;;  %v1791_v47 = vadd.f32 %v1610_v46, %v1113_v41  ;;  %v8031_v48 = vpop.f32.mrf.mxu1  ;;  %8194 = vmatmul.mubr.msk.bf16.gmra.mxu1 %vm292_vm1, %v2667_v40  ;;  %8199 = vmatprep.mubr.msk.bf16.mxu0 %vm292_vm1, %v3314_v9  ;;  %v3260_v41 = vld [vmem:[#allocation2 + $0x91] sm:$0xff] }
 0x13b   :  { %v945_v53 = vpop.f32.mrf.mxu0  ;;  %8265 = vmatprep.mubr.msk.bf16.mxu1 %vm292_vm1, %v3992_v42 }
 0x13c   :  { %v1116_v57 = vadd.f32 %v9677_v4, %v945_v53  ;;  %1855 = vst [vmem:[#allocation3 + $0xc8] sm:$0xff] %v1791_v47  ;;  %v1796_v13 = vadd.f32 %v8031_v48, %v1118_v45  ;;  %v1623_v11 = vpop.f32.mrf.mxu1  ;;  %v3261_v45 = vld [vmem:[#allocation2 + $0x99] sm:$0xff]  ;;  %v7570_v48 = vld [vmem:[%s10225_s3 + $0x12] sm:$0x3]  ;;  %v3262_v53 = vld [vmem:[#allocation2 + $0xa9] sm:$0xff] }
 0x13d   :  { %v7966_v62 = vpop.f32.mrf.mxu0  ;;  %v3938_v47 = vld [vmem:[#allocation2 + $0x92] sm:$0xff] }
 0x13e   :  { %v1119_v2 = vadd.f32 %v9677_v4, %v7966_v62  ;;  %1860 = vst [vmem:[#allocation3 + $0xf0] sm:$0xff] %v1796_v13  ;;  %v1794_v16 = vadd.f32 %v1623_v11, %v1116_v57  ;;  %v8032_v5 = vpop.f32.mrf.mxu1  ;;  %v3940_v11 = vld [vmem:[#allocation2 + $0xaa] sm:$0xff]  ;;  %v3319_v62 = vpack.c.bf16 %v3261_v45, %v3260_v41  ;;  %v3946_v45 = vld [vmem:[#allocation2 + $0xf2] sm:$0xff] }
 0x13f   :  { %v948_v7 = vpop.f32.mrf.mxu0 }
 0x140   :  { %v1117_v20 = vadd.f32 %v9677_v4, %v948_v7  ;;  %1858 = vst [vmem:[#allocation3 + $0xe0] sm:$0xff] %v1794_v16  ;;  %v1797_v12 = vadd.f32 %v8032_v5, %v1119_v2  ;;  %v1626_v32 = vpop.f32.mrf.mxu1  ;;  %v3997_v2 = vpack.c.bf16 %v3939_v51, %v3938_v47  ;;  %v3320_v16 = vpack.c.bf16 %v3263_v54, %v3262_v53  ;;  %v3271_v51 = vld [vmem:[#allocation2 + $0x111] sm:$0xff] }
 0x141   :  { %v7969_v15 = vpop.f32.mrf.mxu0  ;;  %8200 = vmatmul.mubr.msk.bf16.vlgmr.msra.gmra.mxu0 %vm292_vm1, %v3315_v28 }
 0x142   :  { %v1122_v17 = vadd.f32 %v9677_v4, %v7969_v15  ;;  %1861 = vst [vmem:[#allocation3 + $0xf8] sm:$0xff] %v1797_v12  ;;  %8330 = vmatpush3.bf16.msra.mxu0 %v4866_v8  ;;  %v1795_v37 = vadd.f32 %v1626_v32, %v1117_v20  ;;  %v8035_v3 = vpop.f32.mrf.mxu1  ;;  %8266 = vmatmul.mubr.msk.bf16.vlgmr.msra.gmra.mxu1 %vm292_vm1, %v3993_v49  ;;  %v674_v12 = vld [vmem:[#allocation3 + $0x140] sm:$0xff]  ;;  %v677_v32 = vld [vmem:[#allocation3 + $0x158] sm:$0xff] }
 0x143   :  { %v961_v55 = vpop.f32.mrf.mxu0  ;;  %8203 = vmatprep.mubr.msk.bf16.mxu0 %vm292_vm1, %v3316_v10  ;;  %8396 = vmatpush3.bf16.msra.mxu1 %v5544_v6  ;;  %v3998_v49 = vpack.c.bf16 %v3941_v59, %v3940_v11  ;;  %v679_v59 = vld [vmem:[#allocation3 + $0x168] sm:$0xff] }
 0x144   :  { %v1120_v0 = vadd.f32 %v9677_v4, %v961_v55  ;;  %1859 = vst [vmem:[#allocation3 + $0xe8] sm:$0xff] %v1795_v37  ;;  %v1800_v23 = vadd.f32 %v8035_v3, %v1122_v17  ;;  %v1639_v24 = vpop.f32.mrf.mxu1  ;;  %8269 = vmatprep.mubr.msk.bf16.mxu1 %vm292_vm1, %v3994_v14  ;;  %8601 = vmatprep.subr.msk.bf16.mxu0 %vm795_vm0, %v7537_v61  ;;  %v3264_v61 = vld [vmem:[#allocation2 + $0xc1] sm:$0xff]  ;;  %v3265_v17 = vld [vmem:[#allocation2 + $0xc9] sm:$0xff] }
 0x145   :  { %v7970_v27 = vpop.f32.mrf.mxu0  ;;  %8602 = vmatprep.subr.msk.bf16.mxu1 %vm795_vm0, %v7570_v48  ;;  %v3942_v37 = vld [vmem:[#allocation2 + $0xc2] sm:$0xff]  ;;  %v3947_v48 = vld [vmem:[#allocation2 + $0xfa] sm:$0xff] }
 0x146   :  { %v1123_v31 = vadd.f32 %v9677_v4, %v7970_v27  ;;  %1864 = vst [vmem:[#allocation3 + $0x110] sm:$0xff] %v1800_v23  ;;  %v1798_v39 = vadd.f32 %v1639_v24, %v1120_v0  ;;  %v8036_v33 = vpop.f32.mrf.mxu1  ;;  %v675_v23 = vld [vmem:[#allocation3 + $0x148] sm:$0xff]  ;;  %v3321_v24 = vpack.c.bf16 %v3265_v17, %v3264_v61 }
 0x147   :  { %v964_v52 = vpop.f32.mrf.mxu0  ;;  %v3272_v61 = vld [vmem:[#allocation2 + $0x121] sm:$0xff]  ;;  %v3273_v17 = vld [vmem:[#allocation2 + $0x129] sm:$0xff] }
 0x148   :  { %v1121_v40 = vadd.f32 %v9677_v4, %v964_v52  ;;  %1862 = vst [vmem:[#allocation3 + $0x100] sm:$0xff] %v1798_v39  ;;  %v1801_v9 = vadd.f32 %v8036_v33, %v1123_v31  ;;  %v1642_v44 = vpop.f32.mrf.mxu1  ;;  %v3322_v31 = vpack.c.bf16 %v3267_v19, %v3266_v18  ;;  %v680_v33 = vld [vmem:[#allocation3 + $0x170] sm:$0xff]  ;;  %v3274_v18 = vld [vmem:[#allocation2 + $0x139] sm:$0xff]  ;;  %v3275_v19 = vld [vmem:[#allocation2 + $0x141] sm:$0xff] }
 0x149   :  { %v7973_v42 = vpop.f32.mrf.mxu0  ;;  %8204 = vmatmul.mubr.msk.bf16.gmra.mxu0 %vm292_vm1, %v3317_v29  ;;  %v3999_v29 = vpack.c.bf16 %v3943_v30, %v3942_v37  ;;  %v3950_v37 = vld [vmem:[#allocation2 + $0x122] sm:$0xff]  ;;  %v3951_v30 = vld [vmem:[#allocation2 + $0x12a] sm:$0xff] }
 0x14a   :  { %v1126_v43 = vadd.f32 %v9677_v4, %v7973_v42  ;;  %1865 = vst [vmem:[#allocation3 + $0x118] sm:$0xff] %v1801_v9  ;;  %v1799_v46 = vadd.f32 %v1642_v44, %v1121_v40  ;;  %v8039_v1 = vpop.f32.mrf.mxu1  ;;  %8270 = vmatmul.mubr.msk.bf16.gmra.mxu1 %vm292_vm1, %v3995_v34  ;;  %8207 = vmatprep.mubr.msk.bf16.mxu0 %vm292_vm1, %v3318_v36  ;;  %v678_v9 = vld [vmem:[#allocation3 + $0x160] sm:$0xff]  ;;  %v681_v44 = vld [vmem:[#allocation3 + $0x178] sm:$0xff] }
 0x14b   :  { %v977_v50 = vpop.f32.mrf.mxu0  ;;  %8273 = vmatprep.mubr.msk.bf16.mxu1 %vm292_vm1, %v3996_v38  ;;  %v4000_v34 = vpack.c.bf16 %v3945_v22, %v3944_v58  ;;  %v3952_v58 = vld [vmem:[#allocation2 + $0x13a] sm:$0xff]  ;;  %v3953_v22 = vld [vmem:[#allocation2 + $0x142] sm:$0xff] }
 0x14c   :  { %v1124_v56 = vadd.f32 %v9677_v4, %v977_v50  ;;  %1863 = vst [vmem:[#allocation3 + $0x108] sm:$0xff] %v1799_v46  ;;  %v1804_v57 = vadd.f32 %v8039_v1, %v1126_v43  ;;  %v1655_v13 = vpop.f32.mrf.mxu1  ;;  %v3268_v46 = vld [vmem:[#allocation2 + $0xf1] sm:$0xff]  ;;  %v3269_v1 = vld [vmem:[#allocation2 + $0xf9] sm:$0xff]  ;;  %v3270_v50 = vld [vmem:[#allocation2 + $0x109] sm:$0xff] }
 0x14d   :  { %v7974_v60 = vpop.f32.mrf.mxu0 }
 0x14e   :  { %v1127_v28 = vadd.f32 %v9677_v4, %v7974_v60  ;;  %1868 = vst [vmem:[#allocation3 + $0x130] sm:$0xff] %v1804_v57  ;;  %v1802_v63 = vadd.f32 %v1655_v13, %v1124_v56  ;;  %v8040_v25 = vpop.f32.mrf.mxu1  ;;  %v3948_v57 = vld [vmem:[#allocation2 + $0x10a] sm:$0xff]  ;;  %v3949_v13 = vld [vmem:[#allocation2 + $0x112] sm:$0xff]  ;;  %v3323_v60 = vpack.c.bf16 %v3269_v1, %v3268_v46 }
 0x14f   :  { %v980_v5 = vpop.f32.mrf.mxu0  ;;  %v3276_v46 = vld [vmem:[#allocation2 + $0x151] sm:$0xff]  ;;  %v3277_v1 = vld [vmem:[#allocation2 + $0x159] sm:$0xff] }
 0x150   :  { %v1125_v7 = vadd.f32 %v9677_v4, %v980_v5  ;;  %1866 = vst [vmem:[#allocation3 + $0x120] sm:$0xff] %v1802_v63  ;;  %v1805_v8 = vadd.f32 %v8040_v25, %v1127_v28  ;;  %v1658_v10 = vpop.f32.mrf.mxu1  ;;  %v4001_v25 = vpack.c.bf16 %v3947_v48, %v3946_v45  ;;  %v684_v5 = vld [vmem:[#allocation3 + $0x190] sm:$0xff]  ;;  %v3955_v48 = vld [vmem:[#allocation2 + $0x15a] sm:$0xff] }
 0x151   :  { %v7977_v20 = vpop.f32.mrf.mxu0  ;;  %8208 = vmatmul.mubr.msk.bf16.gmra.mxu0 %vm292_vm1, %v3319_v62  ;;  %v3954_v45 = vld [vmem:[#allocation2 + $0x152] sm:$0xff] }
 0x152   :  { %v1130_v6 = vadd.f32 %v9677_v4, %v7977_v20  ;;  %1869 = vst [vmem:[#allocation3 + $0x138] sm:$0xff] %v1805_v8  ;;  %v1803_v14 = vadd.f32 %v1658_v10, %v1125_v7  ;;  %v8043_v15 = vpop.f32.mrf.mxu1  ;;  %8274 = vmatmul.mubr.msk.bf16.gmra.mxu1 %vm292_vm1, %v3997_v2  ;;  %8211 = vmatprep.mubr.msk.bf16.mxu0 %vm292_vm1, %v3320_v16 }
 0x153   :  { %v993_v3 = vpop.f32.mrf.mxu0  ;;  %8277 = vmatprep.mubr.msk.bf16.mxu1 %vm292_vm1, %v3998_v49  ;;  %v3324_v2 = vpack.c.bf16 %v3271_v51, %v3270_v50  ;;  %v4002_v49 = vpack.c.bf16 %v3949_v13, %v3948_v57  ;;  %v3278_v50 = vld [vmem:[#allocation2 + $0x169] sm:$0xff]  ;;  %v3279_v51 = vld [vmem:[#allocation2 + $0x171] sm:$0xff] }
 0x154   :  { %v1128_v55 = vadd.f32 %v993_v3, %v674_v12  ;;  %1867 = vst [vmem:[#allocation3 + $0x128] sm:$0xff] %v1803_v14  ;;  %v1808_v21 = vadd.f32 %v8043_v15, %v1130_v6  ;;  %v1671_v4 = vpop.f32.mrf.mxu1  ;;  %v682_v12 = vld [vmem:[#allocation3 + $0x180] sm:$0xff]  ;;  %v3956_v57 = vld [vmem:[#allocation2 + $0x16a] sm:$0xff]  ;;  %v3957_v13 = vld [vmem:[#allocation2 + $0x172] sm:$0xff] }
 0x155   :  { %v7978_v0 = vpop.f32.mrf.mxu0 }
 0x156   :  { %v1131_v26 = vadd.f32 %v7978_v0, %v677_v32  ;;  %1872 = vst [vmem:[#allocation3 + $0x150] sm:$0xff] %v1808_v21  ;;  %v1806_v35 = vadd.f32 %v1671_v4, %v1128_v55  ;;  %v8044_v27 = vpop.f32.mrf.mxu1  ;;  %v685_v32 = vld [vmem:[#allocation3 + $0x198] sm:$0xff] }
 0x157   :  { %v996_v39 = vpop.f32.mrf.mxu0 }
 0x158   :  { %v1129_v36 = vadd.f32 %v996_v39, %v675_v23  ;;  %1870 = vst [vmem:[#allocation3 + $0x140] sm:$0xff] %v1806_v35  ;;  %v1809_v52 = vadd.f32 %v8044_v27, %v1131_v26  ;;  %v1674_v38 = vpop.f32.mrf.mxu1  ;;  %v683_v23 = vld [vmem:[#allocation3 + $0x188] sm:$0xff] }
 0x159   :  { %v7981_v40 = vpop.f32.mrf.mxu0  ;;  %8212 = vmatmul.mubr.msk.bf16.gmra.mxu0 %vm292_vm1, %v3321_v24  ;;  %v3325_v24 = vpack.c.bf16 %v3273_v17, %v3272_v61  ;;  %v3280_v61 = vld [vmem:[#allocation2 + $0x181] sm:$0xff]  ;;  %v3281_v17 = vld [vmem:[#allocation2 + $0x189] sm:$0xff] }
 0x15a   :  { %v1134_v42 = vadd.f32 %v7981_v40, %v680_v33  ;;  %1873 = vst [vmem:[#allocation3 + $0x158] sm:$0xff] %v1809_v52  ;;  %v1807_v41 = vadd.f32 %v1674_v38, %v1129_v36  ;;  %v8047_v43 = vpop.f32.mrf.mxu1  ;;  %8278 = vmatmul.mubr.msk.bf16.gmra.mxu1 %vm292_vm1, %v3999_v29  ;;  %8215 = vmatprep.mubr.msk.bf16.mxu0 %vm292_vm1, %v3322_v31  ;;  %v688_v33 = vld [vmem:[#allocation3 + $0x1b0] sm:$0xff] }
 0x15b   :  { %v1009_v47 = vpop.f32.mrf.mxu0  ;;  %8281 = vmatprep.mubr.msk.bf16.mxu1 %vm292_vm1, %v4000_v34  ;;  %v4003_v29 = vpack.c.bf16 %v3951_v30, %v3950_v37  ;;  %v3326_v31 = vpack.c.bf16 %v3275_v19, %v3274_v18  ;;  %v4004_v34 = vpack.c.bf16 %v3953_v22, %v3952_v58  ;;  %v3958_v37 = vld [vmem:[#allocation2 + $0x182] sm:$0xff]  ;;  %v3959_v30 = vld [vmem:[#allocation2 + $0x18a] sm:$0xff]  ;;  %v3961_v22 = vld [vmem:[#allocation2 + $0x1d2] sm:$0xff] }
 0x15c   :  { %v1132_v53 = vadd.f32 %v1009_v47, %v678_v9  ;;  %1871 = vst [vmem:[#allocation3 + $0x148] sm:$0xff] %v1807_v41  ;;  %v1812_v54 = vadd.f32 %v8047_v43, %v1134_v42  ;;  %v1687_v56 = vpop.f32.mrf.mxu1  ;;  %v686_v9 = vld [vmem:[#allocation3 + $0x1a0] sm:$0xff]  ;;  %v3282_v18 = vld [vmem:[#allocation2 + $0x1c9] sm:$0xff]  ;;  %v3283_v19 = vld [vmem:[#allocation2 + $0x1d1] sm:$0xff] }
 0x15d   :  { %v7982_v11 = vpop.f32.mrf.mxu0  ;;  %v3960_v58 = vld [vmem:[#allocation2 + $0x1ca] sm:$0xff] }
 0x15e   :  { %v1135_v62 = vadd.f32 %v7982_v11, %v681_v44  ;;  %1876 = vst [vmem:[#allocation3 + $0x170] sm:$0xff] %v1812_v54  ;;  %v1810_v28 = vadd.f32 %v1687_v56, %v1132_v53  ;;  %v8048_v63 = vpop.f32.mrf.mxu1  ;;  %v689_v44 = vld [vmem:[#allocation3 + $0x1b8] sm:$0xff] }
 0x15f   :  { %v1012_v16 = vpop.f32.mrf.mxu0 }
 0x160   :  { %v1133_v7 = vadd.f32 %v1012_v16, %v679_v59  ;;  %1874 = vst [vmem:[#allocation3 + $0x160] sm:$0xff] %v1810_v28  ;;  %v1813_v8 = vadd.f32 %v8048_v63, %v1135_v62  ;;  %v1690_v10 = vpop.f32.mrf.mxu1  ;;  %v687_v59 = vld [vmem:[#allocation3 + $0x1a8] sm:$0xff] }
 0x161   :  { %v7985_v20 = vpop.f32.mrf.mxu0  ;;  %8216 = vmatmul.mubr.msk.bf16.gmra.mxu0 %vm292_vm1, %v3323_v60  ;;  %v3327_v60 = vpack.c.bf16 %v3277_v1, %v3276_v46  ;;  %v3284_v46 = vld [vmem:[#allocation2 + $0x1e1] sm:$0xff]  ;;  %v3285_v1 = vld [vmem:[#allocation2 + $0x1e9] sm:$0xff] }
 0x162   :  { %v1138_v6 = vadd.f32 %v7985_v20, %v684_v5  ;;  %1877 = vst [vmem:[#allocation3 + $0x178] sm:$0xff] %v1813_v8  ;;  %v1811_v14 = vadd.f32 %v1690_v10, %v1133_v7  ;;  %v8051_v15 = vpop.f32.mrf.mxu1  ;;  %8282 = vmatmul.mubr.msk.bf16.gmra.mxu1 %vm292_vm1, %v4001_v25  ;;  %8219 = vmatprep.mubr.msk.bf16.mxu0 %vm292_vm1, %v3324_v2  ;;  %v692_v5 = vld [vmem:[#allocation3 + $0x1d0] sm:$0xff] }
 0x163   :  { %v1025_v3 = vpop.f32.mrf.mxu0  ;;  %8285 = vmatprep.mubr.msk.bf16.mxu1 %vm292_vm1, %v4002_v49  ;;  %v4005_v25 = vpack.c.bf16 %v3955_v48, %v3954_v45  ;;  %v3328_v2 = vpack.c.bf16 %v3279_v51, %v3278_v50  ;;  %v4006_v49 = vpack.c.bf16 %v3957_v13, %v3956_v57  ;;  %v3962_v45 = vld [vmem:[#allocation2 + $0x1e2] sm:$0xff]  ;;  %v3963_v48 = vld [vmem:[#allocation2 + $0x1ea] sm:$0xff]  ;;  %v3286_v50 = vld [vmem:[#allocation2 + $0x1f9] sm:$0xff] }
 0x164   :  { %v1136_v55 = vadd.f32 %v1025_v3, %v682_v12  ;;  %1875 = vst [vmem:[#allocation3 + $0x168] sm:$0xff] %v1811_v14  ;;  %v1816_v21 = vadd.f32 %v8051_v15, %v1138_v6  ;;  %v1703_v4 = vpop.f32.mrf.mxu1  ;;  %v690_v12 = vld [vmem:[#allocation3 + $0x1c0] sm:$0xff] }
 0x165   :  { %v7986_v0 = vpop.f32.mrf.mxu0  ;;  %v3287_v51 = vld [vmem:[#allocation2 + $0x201] sm:$0xff] }
 0x166   :  { %v1139_v26 = vadd.f32 %v7986_v0, %v685_v32  ;;  %1880 = vst [vmem:[#allocation3 + $0x190] sm:$0xff] %v1816_v21  ;;  %v1814_v35 = vadd.f32 %v1703_v4, %v1136_v55  ;;  %v8052_v27 = vpop.f32.mrf.mxu1  ;;  %v693_v32 = vld [vmem:[#allocation3 + $0x1d8] sm:$0xff]  ;;  %v3965_v13 = vld [vmem:[#allocation2 + $0x202] sm:$0xff] }
 0x167   :  { %v1028_v39 = vpop.f32.mrf.mxu0  ;;  %v3964_v57 = vld [vmem:[#allocation2 + $0x1fa] sm:$0xff] }
 0x168   :  { %v1137_v36 = vadd.f32 %v1028_v39, %v683_v23  ;;  %1878 = vst [vmem:[#allocation3 + $0x180] sm:$0xff] %v1814_v35  ;;  %v1817_v52 = vadd.f32 %v8052_v27, %v1139_v26  ;;  %v1706_v38 = vpop.f32.mrf.mxu1  ;;  %v691_v23 = vld [vmem:[#allocation3 + $0x1c8] sm:$0xff] }
 0x169   :  { %v7989_v40 = vpop.f32.mrf.mxu0  ;;  %8220 = vmatmul.mubr.msk.bf16.gmra.mxu0 %vm292_vm1, %v3325_v24  ;;  %v3329_v24 = vpack.c.bf16 %v3281_v17, %v3280_v61  ;;  %v3966_v61 = vld [vmem:[#allocation2 + $0x212] sm:$0xff]  ;;  %v3967_v17 = vld [vmem:[#allocation2 + $0x21a] sm:$0xff] }
 0x16a   :  { %v1142_v42 = vadd.f32 %v7989_v40, %v688_v33  ;;  %1881 = vst [vmem:[#allocation3 + $0x198] sm:$0xff] %v1817_v52  ;;  %v1815_v41 = vadd.f32 %v1706_v38, %v1137_v36  ;;  %v8055_v43 = vpop.f32.mrf.mxu1  ;;  %8286 = vmatmul.mubr.msk.bf16.gmra.mxu1 %vm292_vm1, %v4003_v29  ;;  %8223 = vmatprep.mubr.msk.bf16.mxu0 %vm292_vm1, %v3326_v31  ;;  %v696_v33 = vld [vmem:[#allocation3 + $0x1f0] sm:$0xff] }
 0x16b   :  { %v1041_v47 = vpop.f32.mrf.mxu0  ;;  %8289 = vmatprep.mubr.msk.bf16.mxu1 %vm292_vm1, %v4004_v34  ;;  %v4007_v29 = vpack.c.bf16 %v3959_v30, %v3958_v37  ;;  %v3330_v31 = vpack.c.bf16 %v3283_v19, %v3282_v18  ;;  %v4008_v34 = vpack.c.bf16 %v3961_v22, %v3960_v58  ;;  %v1990_v37 = vld [vmem:[#allocation3] sm:$0xff]  ;;  %v3290_v30 = vld [vmem:[#allocation2 + $0x229] sm:$0xff]  ;;  %v3291_v18 = vld [vmem:[#allocation2 + $0x231] sm:$0xff] }
 0x16c   :  { %v1140_v53 = vadd.f32 %v1041_v47, %v686_v9  ;;  %1879 = vst [vmem:[#allocation3 + $0x188] sm:$0xff] %v1815_v41  ;;  %v1820_v54 = vadd.f32 %v8055_v43, %v1142_v42  ;;  %v1719_v56 = vpop.f32.mrf.mxu1  ;;  %v694_v9 = vld [vmem:[#allocation3 + $0x1e0] sm:$0xff]  ;;  %v3969_v58 = vld [vmem:[#allocation2 + $0x232] sm:$0xff] }
 0x16d   :  { %v7990_v11 = vpop.f32.mrf.mxu0  ;;  %v1993_v22 = vld [vmem:[#allocation3 + $0x18] sm:$0xff] }
 0x16e   :  { %v1143_v62 = vadd.f32 %v7990_v11, %v689_v44  ;;  %1884 = vst [vmem:[#allocation3 + $0x1b0] sm:$0xff] %v1820_v54  ;;  %v1818_v28 = vadd.f32 %v1719_v56, %v1140_v53  ;;  %v8056_v63 = vpop.f32.mrf.mxu1  ;;  %v697_v44 = vld [vmem:[#allocation3 + $0x1f8] sm:$0xff] }
 0x16f   :  { %v1044_v16 = vpop.f32.mrf.mxu0 }
 0x170   :  { %v1141_v7 = vadd.f32 %v1044_v16, %v687_v59  ;;  %1882 = vst [vmem:[#allocation3 + $0x1a0] sm:$0xff] %v1818_v28  ;;  %v1821_v8 = vadd.f32 %v8056_v63, %v1143_v62  ;;  %v1722_v10 = vpop.f32.mrf.mxu1  ;;  %v695_v59 = vld [vmem:[#allocation3 + $0x1e8] sm:$0xff] }
 0x171   :  { %v7993_v20 = vpop.f32.mrf.mxu0  ;;  %8224 = vmatmul.mubr.msk.bf16.gmra.mxu0 %vm292_vm1, %v3327_v60  ;;  %v3331_v60 = vpack.c.bf16 %v3285_v1, %v3284_v46  ;;  %v3970_v46 = vld [vmem:[#allocation2 + $0x242] sm:$0xff]  ;;  %v3971_v1 = vld [vmem:[#allocation2 + $0x24a] sm:$0xff] }
 0x172   :  { %v1146_v6 = vadd.f32 %v7993_v20, %v692_v5  ;;  %1885 = vst [vmem:[#allocation3 + $0x1b8] sm:$0xff] %v1821_v8  ;;  %v1819_v14 = vadd.f32 %v1722_v10, %v1141_v7  ;;  %v8059_v15 = vpop.f32.mrf.mxu1  ;;  %8290 = vmatmul.mubr.msk.bf16.gmra.mxu1 %vm292_vm1, %v4005_v25  ;;  %8227 = vmatprep.mubr.msk.bf16.mxu0 %vm292_vm1, %v3328_v2  ;;  %v1992_v10 = vld [vmem:[#allocation3 + $0x10] sm:$0xff] }
 0x173   :  { %v1057_v3 = vpop.f32.mrf.mxu0  ;;  %8293 = vmatprep.mubr.msk.bf16.mxu1 %vm292_vm1, %v4006_v49  ;;  %v4009_v25 = vpack.c.bf16 %v3963_v48, %v3962_v45  ;;  %v3332_v2 = vpack.c.bf16 %v3287_v51, %v3286_v50  ;;  %v4010_v5 = vpack.c.bf16 %v3965_v13, %v3964_v57  ;;  %v1994_v45 = vld [vmem:[#allocation3 + $0x20] sm:$0xff]  ;;  %v1997_v13 = vld [vmem:[#allocation3 + $0x38] sm:$0xff] }
 0x174   :  { %v1144_v55 = vadd.f32 %v1057_v3, %v690_v12  ;;  %1883 = vst [vmem:[#allocation3 + $0x1a8] sm:$0xff] %v1819_v14  ;;  %v1824_v21 = vadd.f32 %v8059_v15, %v1146_v6  ;;  %v1735_v4 = vpop.f32.mrf.mxu1  ;;  %v3288_v12 = vld [vmem:[#allocation2 + $0x211] sm:$0xff]  ;;  %v3289_v15 = vld [vmem:[#allocation2 + $0x219] sm:$0xff]  ;;  %v3295_v50 = vld [vmem:[#allocation2 + $0x261] sm:$0xff] }
 0x175   :  { %v7994_v0 = vpop.f32.mrf.mxu0  ;;  %v3294_v48 = vld [vmem:[#allocation2 + $0x259] sm:$0xff]  ;;  %v3973_v57 = vld [vmem:[#allocation2 + $0x262] sm:$0xff] }
 0x176   :  { %v1147_v26 = vadd.f32 %v7994_v0, %v693_v32  ;;  %1888 = vst [vmem:[#allocation3 + $0x1d0] sm:$0xff] %v1824_v21  ;;  %v1822_v35 = vadd.f32 %v1735_v4, %v1144_v55  ;;  %v8060_v27 = vpop.f32.mrf.mxu1  ;;  %v3968_v4 = vld [vmem:[#allocation2 + $0x22a] sm:$0xff] }
 0x177   :  { %v1060_v39 = vpop.f32.mrf.mxu0 }
 0x178   :  { %v1145_v36 = vadd.f32 %v1060_v39, %v691_v23  ;;  %1886 = vst [vmem:[#allocation3 + $0x1c0] sm:$0xff] %v1822_v35  ;;  %v1825_v52 = vadd.f32 %v8060_v27, %v1147_v26  ;;  %v1738_v38 = vpop.f32.mrf.mxu1  ;;  %v3333_v23 = vpack.c.bf16 %v3289_v15, %v3288_v12  ;;  %v4011_v27 = vpack.c.bf16 %v3967_v17, %v3966_v61  ;;  %v3296_v12 = vld [vmem:[#allocation2 + $0x271] sm:$0xff]  ;;  %v3297_v15 = vld [vmem:[#allocation2 + $0x279] sm:$0xff] }
 0x179   :  { %v7997_v40 = vpop.f32.mrf.mxu0  ;;  %8228 = vmatmul.mubr.msk.bf16.gmra.mxu0 %vm292_vm1, %v3329_v24  ;;  %v3974_v61 = vld [vmem:[#allocation2 + $0x272] sm:$0xff]  ;;  %v3975_v17 = vld [vmem:[#allocation2 + $0x27a] sm:$0xff] }
 0x17a   :  { %v1150_v42 = vadd.f32 %v7997_v40, %v696_v33  ;;  %1889 = vst [vmem:[#allocation3 + $0x1d8] sm:$0xff] %v1825_v52  ;;  %v1823_v41 = vadd.f32 %v1738_v38, %v1145_v36  ;;  %v8063_v43 = vpop.f32.mrf.mxu1  ;;  %8294 = vmatmul.mubr.msk.bf16.gmra.mxu1 %vm292_vm1, %v4007_v29  ;;  %8231 = vmatprep.mubr.msk.bf16.mxu0 %vm292_vm1, %v3330_v31  ;;  %v1991_v31 = vld [vmem:[#allocation3 + $0x8] sm:$0xff]  ;;  %v1996_v38 = vld [vmem:[#allocation3 + $0x30] sm:$0xff] }
 0x17b   :  { %v1073_v47 = vpop.f32.mrf.mxu0  ;;  %8297 = vmatprep.mubr.msk.bf16.mxu1 %vm292_vm1, %v4008_v34  ;;  %v3334_v29 = vpack.c.bf16 %v3291_v18, %v3290_v30  ;;  %v4012_v33 = vpack.c.bf16 %v3969_v58, %v3968_v4  ;;  %v3298_v30 = vld [vmem:[#allocation2 + $0x289] sm:$0xff]  ;;  %v3299_v18 = vld [vmem:[#allocation2 + $0x291] sm:$0xff] }
 0x17c   :  { %v1148_v53 = vadd.f32 %v1073_v47, %v694_v9  ;;  %1887 = vst [vmem:[#allocation3 + $0x1c8] sm:$0xff] %v1823_v41  ;;  %v1828_v54 = vadd.f32 %v8063_v43, %v1150_v42  ;;  %v1751_v56 = vpop.f32.mrf.mxu1  ;;  %v3292_v9 = vld [vmem:[#allocation2 + $0x241] sm:$0xff]  ;;  %v3293_v43 = vld [vmem:[#allocation2 + $0x249] sm:$0xff]  ;;  %v3977_v58 = vld [vmem:[#allocation2 + $0x292] sm:$0xff] }
 0x17d   :  { %v7998_v11 = vpop.f32.mrf.mxu0  ;;  %v3976_v4 = vld [vmem:[#allocation2 + $0x28a] sm:$0xff] }
 0x17e   :  { %v1151_v62 = vadd.f32 %v7998_v11, %v697_v44  ;;  %1892 = vst [vmem:[#allocation3 + $0x1f0] sm:$0xff] %v1828_v54  ;;  %v1826_v28 = vadd.f32 %v1751_v56, %v1148_v53  ;;  %v8064_v63 = vpop.f32.mrf.mxu1  ;;  %v3972_v56 = vld [vmem:[#allocation2 + $0x25a] sm:$0xff] }
 0x17f   :  { %v1076_v16 = vpop.f32.mrf.mxu0 }
 0x180   :  { %v1149_v49 = vadd.f32 %v1076_v16, %v695_v59  ;;  %1890 = vst [vmem:[#allocation3 + $0x1e0] sm:$0xff] %v1826_v28  ;;  %v1829_v7 = vadd.f32 %v8064_v63, %v1151_v62  ;;  %v1754_v8 = vpop.f32.mrf.mxu1  ;;  %v3335_v59 = vpack.c.bf16 %v3293_v43, %v3292_v9  ;;  %v4013_v63 = vpack.c.bf16 %v3971_v1, %v3970_v46  ;;  %v3300_v9 = vld [vmem:[#allocation2 + $0x2a1] sm:$0xff]  ;;  %v3301_v43 = vld [vmem:[#allocation2 + $0x2a9] sm:$0xff] }
 0x181   :  { %v8069_v20 = vpop.f32.mrf.mxu0  ;;  %8232 = vmatmul.mubr.msk.bf16.gmra.mxu0 %vm292_vm1, %v3331_v60  ;;  %v3978_v46 = vld [vmem:[#allocation2 + $0x2a2] sm:$0xff]  ;;  %v3979_v1 = vld [vmem:[#allocation2 + $0x2aa] sm:$0xff] }
 0x182   :  { %1893 = vst [vmem:[#allocation3 + $0x1f8] sm:$0xff] %v1829_v7  ;;  %v2446_v32 = vadd.f32 %v8069_v20, %v1992_v10  ;;  %v1827_v6 = vadd.f32 %v1754_v8, %v1149_v49  ;;  %v8135_v14 = vpop.f32.mrf.mxu1  ;;  %8298 = vmatmul.mubr.msk.bf16.gmra.mxu1 %vm292_vm1, %v4009_v25  ;;  %8235 = vmatprep.mubr.msk.bf16.mxu0 %vm292_vm1, %v3332_v2  ;;  %v1995_v2 = vld [vmem:[#allocation3 + $0x28] sm:$0xff]  ;;  %v2000_v10 = vld [vmem:[#allocation3 + $0x50] sm:$0xff] }
 0x183   :  { %v2189_v3 = vpop.f32.mrf.mxu0  ;;  %8301 = vmatprep.mubr.msk.bf16.mxu1 %vm292_vm1, %v4010_v5  ;;  %v3336_v25 = vpack.c.bf16 %v3295_v50, %v3294_v48  ;;  %v4014_v5 = vpack.c.bf16 %v3973_v57, %v3972_v56  ;;  %v3302_v48 = vld [vmem:[#allocation2 + $0x2b9] sm:$0xff]  ;;  %v3303_v50 = vld [vmem:[#allocation2 + $0x2c1] sm:$0xff] }
 0x184   :  { %1891 = vst [vmem:[#allocation3 + $0x1e8] sm:$0xff] %v1827_v6  ;;  %v2444_v19 = vadd.f32 %v2189_v3, %v1990_v37  ;;  %v3124_v55 = vadd.f32 %v8135_v14, %v2446_v32  ;;  %v2867_v21 = vpop.f32.mrf.mxu1  ;;  %v1998_v37 = vld [vmem:[#allocation3 + $0x40] sm:$0xff] }
 0x185   :  { %v8070_v0 = vpop.f32.mrf.mxu0  ;;  %v3980_v56 = vld [vmem:[#allocation2 + $0x2ba] sm:$0xff]  ;;  %v3981_v57 = vld [vmem:[#allocation2 + $0x2c2] sm:$0xff] }
 0x186   :  { %v2447_v24 = vadd.f32 %v8070_v0, %v1993_v22  ;;  %3188 = vst [vmem:[#allocation3 + $0x10] sm:$0xff] %v3124_v55  ;;  %v3122_v26 = vadd.f32 %v2867_v21, %v2444_v19  ;;  %v8136_v35 = vpop.f32.mrf.mxu1  ;;  %v2001_v22 = vld [vmem:[#allocation3 + $0x58] sm:$0xff] }
 0x187   :  { %v2192_v39 = vpop.f32.mrf.mxu0 }
 0x188   :  { %v2445_v34 = vadd.f32 %v2192_v39, %v1991_v31  ;;  %3186 = vst [vmem:[#allocation3] sm:$0xff] %v3122_v26  ;;  %v3125_v36 = vadd.f32 %v8136_v35, %v2447_v24  ;;  %v2870_v52 = vpop.f32.mrf.mxu1  ;;  %v1999_v31 = vld [vmem:[#allocation3 + $0x48] sm:$0xff] }
 0x189   :  { %v8073_v40 = vpop.f32.mrf.mxu0  ;;  %8236 = vmatmul.mubr.msk.bf16.gmra.mxu0 %vm292_vm1, %v3333_v23  ;;  %v3337_v23 = vpack.c.bf16 %v3297_v15, %v3296_v12  ;;  %v3304_v12 = vld [vmem:[#allocation2 + $0x2d1] sm:$0xff]  ;;  %v3305_v15 = vld [vmem:[#allocation2 + $0x2d9] sm:$0xff] }
 0x18a   :  { %v2450_v44 = vadd.f32 %v8073_v40, %v1996_v38  ;;  %3189 = vst [vmem:[#allocation3 + $0x18] sm:$0xff] %v3125_v36  ;;  %v3123_v42 = vadd.f32 %v2870_v52, %v2445_v34  ;;  %v8139_v41 = vpop.f32.mrf.mxu1  ;;  %8302 = vmatmul.mubr.msk.bf16.gmra.mxu1 %vm292_vm1, %v4011_v27  ;;  %8239 = vmatprep.mubr.msk.bf16.mxu0 %vm292_vm1, %v3334_v29  ;;  %v2004_v38 = vld [vmem:[#allocation3 + $0x70] sm:$0xff] }
 0x18b   :  { %v2205_v47 = vpop.f32.mrf.mxu0  ;;  %8305 = vmatprep.mubr.msk.bf16.mxu1 %vm292_vm1, %v4012_v33  ;;  %v4015_v27 = vpack.c.bf16 %v3975_v17, %v3974_v61  ;;  %v3338_v29 = vpack.c.bf16 %v3299_v18, %v3298_v30  ;;  %v4016_v33 = vpack.c.bf16 %v3977_v58, %v3976_v4  ;;  %v3982_v61 = vld [vmem:[#allocation2 + $0x2d2] sm:$0xff]  ;;  %v3983_v17 = vld [vmem:[#allocation2 + $0x2da] sm:$0xff]  ;;  %v3306_v30 = vld [vmem:[#allocation2 + $0x2e9] sm:$0xff] }
 0x18c   :  { %v2448_v51 = vadd.f32 %v2205_v47, %v1994_v45  ;;  %3187 = vst [vmem:[#allocation3 + $0x8] sm:$0xff] %v3123_v42  ;;  %v3128_v53 = vadd.f32 %v8139_v41, %v2450_v44  ;;  %v2883_v54 = vpop.f32.mrf.mxu1  ;;  %v2002_v45 = vld [vmem:[#allocation3 + $0x60] sm:$0xff]  ;;  %v3307_v18 = vld [vmem:[#allocation2 + $0x2f1] sm:$0xff] }
 0x18d   :  { %v8074_v11 = vpop.f32.mrf.mxu0  ;;  %v3984_v4 = vld [vmem:[#allocation2 + $0x2ea] sm:$0xff]  ;;  %v3985_v58 = vld [vmem:[#allocation2 + $0x2f2] sm:$0xff] }
 0x18e   :  { %v2451_v60 = vadd.f32 %v8074_v11, %v1997_v13  ;;  %3192 = vst [vmem:[#allocation3 + $0x30] sm:$0xff] %v3128_v53  ;;  %v3126_v62 = vadd.f32 %v2883_v54, %v2448_v51  ;;  %v8140_v28 = vpop.f32.mrf.mxu1  ;;  %v2005_v13 = vld [vmem:[#allocation3 + $0x78] sm:$0xff] }
 0x18f   :  { %v2208_v16 = vpop.f32.mrf.mxu0 }
 0x190   :  { %v2449_v49 = vadd.f32 %v2208_v16, %v1995_v2  ;;  %3190 = vst [vmem:[#allocation3 + $0x20] sm:$0xff] %v3126_v62  ;;  %v3129_v7 = vadd.f32 %v8140_v28, %v2451_v60  ;;  %v2886_v8 = vpop.f32.mrf.mxu1  ;;  %v2003_v2 = vld [vmem:[#allocation3 + $0x68] sm:$0xff] }
 0x191   :  { %v8077_v20 = vpop.f32.mrf.mxu0  ;;  %8240 = vmatmul.mubr.msk.bf16.gmra.mxu0 %vm292_vm1, %v3335_v59  ;;  %v3339_v59 = vpack.c.bf16 %v3301_v43, %v3300_v9  ;;  %v3308_v9 = vld [vmem:[#allocation2 + $0x301] sm:$0xff]  ;;  %v3309_v43 = vld [vmem:[#allocation2 + $0x309] sm:$0xff] }
 0x192   :  { %v2454_v32 = vadd.f32 %v8077_v20, %v2000_v10  ;;  %3193 = vst [vmem:[#allocation3 + $0x38] sm:$0xff] %v3129_v7  ;;  %v3127_v6 = vadd.f32 %v2886_v8, %v2449_v49  ;;  %v8143_v14 = vpop.f32.mrf.mxu1  ;;  %8306 = vmatmul.mubr.msk.bf16.gmra.mxu1 %vm292_vm1, %v4013_v63  ;;  %8243 = vmatprep.mubr.msk.bf16.mxu0 %vm292_vm1, %v3336_v25  ;;  %v2008_v10 = vld [vmem:[#allocation3 + $0x90] sm:$0xff] }
 0x193   :  { %v2221_v3 = vpop.f32.mrf.mxu0  ;;  %8309 = vmatprep.mubr.msk.bf16.mxu1 %vm292_vm1, %v4014_v5  ;;  %v4017_v63 = vpack.c.bf16 %v3979_v1, %v3978_v46  ;;  %v3340_v25 = vpack.c.bf16 %v3303_v50, %v3302_v48  ;;  %v4018_v5 = vpack.c.bf16 %v3981_v57, %v3980_v56  ;;  %v3986_v46 = vld [vmem:[#allocation2 + $0x302] sm:$0xff]  ;;  %v3987_v1 = vld [vmem:[#allocation2 + $0x30a] sm:$0xff]  ;;  %v3310_v48 = vld [vmem:[#allocation2 + $0x319] sm:$0xff] }
 0x194   :  { %v2452_v19 = vadd.f32 %v2221_v3, %v1998_v37  ;;  %3191 = vst [vmem:[#allocation3 + $0x28] sm:$0xff] %v3127_v6  ;;  %v3132_v55 = vadd.f32 %v8143_v14, %v2454_v32  ;;  %v2899_v21 = vpop.f32.mrf.mxu1  ;;  %v2006_v37 = vld [vmem:[#allocation3 + $0x80] sm:$0xff] }
 0x195   :  { %v8078_v0 = vpop.f32.mrf.mxu0  ;;  %v3311_v50 = vld [vmem:[#allocation2 + $0x321] sm:$0xff] }
 0x196   :  { %v2455_v24 = vadd.f32 %v8078_v0, %v2001_v22  ;;  %3196 = vst [vmem:[#allocation3 + $0x50] sm:$0xff] %v3132_v55  ;;  %v3130_v26 = vadd.f32 %v2899_v21, %v2452_v19  ;;  %v8144_v35 = vpop.f32.mrf.mxu1  ;;  %v2009_v22 = vld [vmem:[#allocation3 + $0x98] sm:$0xff]  ;;  %v3989_v57 = vld [vmem:[#allocation2 + $0x322] sm:$0xff] }
 0x197   :  { %v2224_v39 = vpop.f32.mrf.mxu0  ;;  %v3988_v56 = vld [vmem:[#allocation2 + $0x31a] sm:$0xff] }
 0x198   :  { %v2453_v34 = vadd.f32 %v2224_v39, %v1999_v31  ;;  %3194 = vst [vmem:[#allocation3 + $0x40] sm:$0xff] %v3130_v26  ;;  %v3133_v36 = vadd.f32 %v8144_v35, %v2455_v24  ;;  %v2902_v52 = vpop.f32.mrf.mxu1  ;;  %v2007_v31 = vld [vmem:[#allocation3 + $0x88] sm:$0xff] }
 0x199   :  { %v8081_v40 = vpop.f32.mrf.mxu0  ;;  %8244 = vmatmul.mubr.msk.bf16.gmra.mxu0 %vm292_vm1, %v3337_v23  ;;  %v3341_v23 = vpack.c.bf16 %v3305_v15, %v3304_v12  ;;  %v3312_v12 = vld [vmem:[#allocation2 + $0x331] sm:$0xff]  ;;  %v3313_v15 = vld [vmem:[#allocation2 + $0x339] sm:$0xff] }
 0x19a   :  { %v2458_v44 = vadd.f32 %v8081_v40, %v2004_v38  ;;  %3197 = vst [vmem:[#allocation3 + $0x58] sm:$0xff] %v3133_v36  ;;  %v3131_v42 = vadd.f32 %v2902_v52, %v2453_v34  ;;  %v8147_v41 = vpop.f32.mrf.mxu1  ;;  %8310 = vmatmul.mubr.msk.bf16.gmra.mxu1 %vm292_vm1, %v4015_v27  ;;  %8247 = vmatprep.mubr.msk.bf16.mxu0 %vm292_vm1, %v3338_v29  ;;  %v2012_v38 = vld [vmem:[#allocation3 + $0xb0] sm:$0xff] }
 0x19b   :  { %v2237_v47 = vpop.f32.mrf.mxu0  ;;  %8313 = vmatprep.mubr.msk.bf16.mxu1 %vm292_vm1, %v4016_v33  ;;  %v4019_v27 = vpack.c.bf16 %v3983_v17, %v3982_v61  ;;  %v3342_v29 = vpack.c.bf16 %v3307_v18, %v3306_v30  ;;  %v4020_v33 = vpack.c.bf16 %v3985_v58, %v3984_v4  ;;  %v3990_v61 = vld [vmem:[#allocation2 + $0x332] sm:$0xff]  ;;  %v3991_v17 = vld [vmem:[#allocation2 + $0x33a] sm:$0xff] }
 0x19c   :  { %v2456_v51 = vadd.f32 %v2237_v47, %v2002_v45  ;;  %3195 = vst [vmem:[#allocation3 + $0x48] sm:$0xff] %v3131_v42  ;;  %v3136_v53 = vadd.f32 %v8147_v41, %v2458_v44  ;;  %v2915_v54 = vpop.f32.mrf.mxu1  ;;  %v2010_v45 = vld [vmem:[#allocation3 + $0xa0] sm:$0xff]  ;;  %v4607_v30 = vld [vmem:[#allocation2 + $0x30] sm:$0xff]  ;;  %v4608_v18 = vld [vmem:[#allocation2 + $0x38] sm:$0xff] }
 0x19d   :  { %v8082_v11 = vpop.f32.mrf.mxu0  ;;  %v5285_v4 = vld [vmem:[#allocation2 + $0x31] sm:$0xff]  ;;  %v5286_v58 = vld [vmem:[#allocation2 + $0x39] sm:$0xff] }
 0x19e   :  { %v2459_v60 = vadd.f32 %v8082_v11, %v2005_v13  ;;  %3200 = vst [vmem:[#allocation3 + $0x70] sm:$0xff] %v3136_v53  ;;  %v3134_v62 = vadd.f32 %v2915_v54, %v2456_v51  ;;  %v8148_v28 = vpop.f32.mrf.mxu1  ;;  %v2013_v13 = vld [vmem:[#allocation3 + $0xb8] sm:$0xff] }
 0x19f   :  { %v2240_v16 = vpop.f32.mrf.mxu0 }
 0x1a0   :  { %v2457_v49 = vadd.f32 %v2240_v16, %v2003_v2  ;;  %3198 = vst [vmem:[#allocation3 + $0x60] sm:$0xff] %v3134_v62  ;;  %v3137_v7 = vadd.f32 %v8148_v28, %v2459_v60  ;;  %v2918_v8 = vpop.f32.mrf.mxu1  ;;  %v2011_v2 = vld [vmem:[#allocation3 + $0xa8] sm:$0xff] }
 0x1a1   :  { %v8085_v20 = vpop.f32.mrf.mxu0  ;;  %8248 = vmatmul.mubr.msk.bf16.gmra.mxu0 %vm292_vm1, %v3339_v59  ;;  %v3343_v59 = vpack.c.bf16 %v3309_v43, %v3308_v9  ;;  %v4610_v43 = vld [vmem:[#allocation2 + $0x50] sm:$0xff] }
 0x1a2   :  { %v2462_v32 = vadd.f32 %v8085_v20, %v2008_v10  ;;  %3201 = vst [vmem:[#allocation3 + $0x78] sm:$0xff] %v3137_v7  ;;  %v3135_v6 = vadd.f32 %v2918_v8, %v2457_v49  ;;  %v8151_v14 = vpop.f32.mrf.mxu1  ;;  %8314 = vmatmul.mubr.msk.bf16.gmra.mxu1 %vm292_vm1, %v4017_v63  ;;  %8251 = vmatprep.mubr.msk.bf16.mxu0 %vm292_vm1, %v3340_v25  ;;  %v2016_v10 = vld [vmem:[#allocation3 + $0xd0] sm:$0xff] }
 0x1a3   :  { %v2253_v3 = vpop.f32.mrf.mxu0  ;;  %8317 = vmatprep.mubr.msk.bf16.mxu1 %vm292_vm1, %v4018_v5  ;;  %v4021_v63 = vpack.c.bf16 %v3987_v1, %v3986_v46  ;;  %v3344_v25 = vpack.c.bf16 %v3311_v50, %v3310_v48  ;;  %v4022_v5 = vpack.c.bf16 %v3989_v57, %v3988_v56  ;;  %v2018_v46 = vld [vmem:[#allocation3 + $0xe0] sm:$0xff]  ;;  %v2021_v56 = vld [vmem:[#allocation3 + $0xf8] sm:$0xff] }
 0x1a4   :  { %v2460_v19 = vadd.f32 %v2253_v3, %v2006_v37  ;;  %3199 = vst [vmem:[#allocation3 + $0x68] sm:$0xff] %v3135_v6  ;;  %v3140_v55 = vadd.f32 %v8151_v14, %v2462_v32  ;;  %v2931_v21 = vpop.f32.mrf.mxu1  ;;  %v2014_v37 = vld [vmem:[#allocation3 + $0xc0] sm:$0xff] }
 0x1a5   :  { %v8086_v0 = vpop.f32.mrf.mxu0 }
 0x1a6   :  { %v2463_v24 = vadd.f32 %v8086_v0, %v2009_v22  ;;  %3204 = vst [vmem:[#allocation3 + $0x90] sm:$0xff] %v3140_v55  ;;  %v3138_v26 = vadd.f32 %v2931_v21, %v2460_v19  ;;  %v8152_v35 = vpop.f32.mrf.mxu1  ;;  %v2017_v22 = vld [vmem:[#allocation3 + $0xd8] sm:$0xff] }
 0x1a7   :  { %v2256_v39 = vpop.f32.mrf.mxu0 }
 0x1a8   :  { %v2461_v34 = vadd.f32 %v2256_v39, %v2007_v31  ;;  %3202 = vst [vmem:[#allocation3 + $0x80] sm:$0xff] %v3138_v26  ;;  %v3141_v36 = vadd.f32 %v8152_v35, %v2463_v24  ;;  %v2934_v52 = vpop.f32.mrf.mxu1  ;;  %v2015_v31 = vld [vmem:[#allocation3 + $0xc8] sm:$0xff] }
 0x1a9   :  { %v8089_v40 = vpop.f32.mrf.mxu0  ;;  %8252 = vmatmul.mubr.msk.bf16.gmra.mxu0 %vm292_vm1, %v3341_v23  ;;  %v3345_v23 = vpack.c.bf16 %v3313_v15, %v3312_v12  ;;  %v4613_v15 = vld [vmem:[#allocation2 + $0x78] sm:$0xff] }
 0x1aa   :  { %v2466_v44 = vadd.f32 %v8089_v40, %v2012_v38  ;;  %3205 = vst [vmem:[#allocation3 + $0x98] sm:$0xff] %v3141_v36  ;;  %v3139_v42 = vadd.f32 %v2934_v52, %v2461_v34  ;;  %v8155_v41 = vpop.f32.mrf.mxu1  ;;  %8318 = vmatmul.mubr.msk.bf16.gmra.mxu1 %vm292_vm1, %v4019_v27  ;;  %8255 = vmatprep.mubr.msk.bf16.mxu0 %vm292_vm1, %v3342_v29  ;;  %v2020_v38 = vld [vmem:[#allocation3 + $0xf0] sm:$0xff] }
 0x1ab   :  { %v2269_v47 = vpop.f32.mrf.mxu0  ;;  %8321 = vmatprep.mubr.msk.bf16.mxu1 %vm292_vm1, %v4020_v33  ;;  %v4023_v27 = vpack.c.bf16 %v3991_v17, %v3990_v61  ;;  %v4671_v29 = vpack.c.bf16 %v4608_v18, %v4607_v30  ;;  %v5349_v33 = vpack.c.bf16 %v5286_v58, %v5285_v4  ;;  %v5291_v30 = vld [vmem:[#allocation2 + $0x79] sm:$0xff]  ;;  %v5292_v18 = vld [vmem:[#allocation2 + $0x81] sm:$0xff] }
 0x1ac   :  { %v2464_v51 = vadd.f32 %v2269_v47, %v2010_v45  ;;  %3203 = vst [vmem:[#allocation3 + $0x88] sm:$0xff] %v3139_v42  ;;  %v3144_v53 = vadd.f32 %v8155_v41, %v2466_v44  ;;  %v2947_v54 = vpop.f32.mrf.mxu1  ;;  %v4609_v41 = vld [vmem:[#allocation2 + $0x48] sm:$0xff]  ;;  %v5288_v47 = vld [vmem:[#allocation2 + $0x51] sm:$0xff] }
 0x1ad   :  { %v8090_v11 = vpop.f32.mrf.mxu0  ;;  %v5287_v45 = vld [vmem:[#allocation2 + $0x49] sm:$0xff]  ;;  %v4616_v4 = vld [vmem:[#allocation2 + $0x98] sm:$0xff] }
 0x1ae   :  { %v2467_v60 = vadd.f32 %v8090_v11, %v2013_v13  ;;  %3208 = vst [vmem:[#allocation3 + $0xb0] sm:$0xff] %v3144_v53  ;;  %v3142_v62 = vadd.f32 %v2947_v54, %v2464_v51  ;;  %v8156_v28 = vpop.f32.mrf.mxu1  ;;  %v4611_v53 = vld [vmem:[#allocation2 + $0x60] sm:$0xff]  ;;  %v4612_v54 = vld [vmem:[#allocation2 + $0x68] sm:$0xff]  ;;  %v4672_v13 = vpack.c.bf16 %v4610_v43, %v4609_v41 }
 0x1af   :  { %v2272_v16 = vpop.f32.mrf.mxu0  ;;  %v5289_v11 = vld [vmem:[#allocation2 + $0x61] sm:$0xff] }
 0x1b0   :  { %v2465_v49 = vadd.f32 %v2272_v16, %v2011_v2  ;;  %3206 = vst [vmem:[#allocation3 + $0xa0] sm:$0xff] %v3142_v62  ;;  %v3145_v7 = vadd.f32 %v8156_v28, %v2467_v60  ;;  %v2950_v8 = vpop.f32.mrf.mxu1  ;;  %v8610_v16 = vld [vmem:[%s10225_s3 + $0x10] sm:$0x3]  ;;  %v4617_v43 = vld [vmem:[#allocation2 + $0xa8] sm:$0xff] }
 0x1b1   :  { %v8093_v20 = vpop.f32.mrf.mxu0  ;;  %8256 = vmatmul.mubr.msk.bf16.gmra.mxu0 %vm292_vm1, %v3343_v59  ;;  %v5290_v59 = vld [vmem:[#allocation2 + $0x69] sm:$0xff] }
 0x1b2   :  { %v2470_v32 = vadd.f32 %v8093_v20, %v2016_v10  ;;  %3209 = vst [vmem:[#allocation3 + $0xb8] sm:$0xff] %v3145_v7  ;;  %v3143_v6 = vadd.f32 %v2950_v8, %v2465_v49  ;;  %v8159_v14 = vpop.f32.mrf.mxu1  ;;  %8322 = vmatmul.mubr.msk.bf16.gmra.mxu1 %vm292_vm1, %v4021_v63  ;;  %8259 = vmatprep.mubr.msk.bf16.mxu0 %vm292_vm1, %v3344_v25  ;;  %v2019_v25 = vld [vmem:[#allocation3 + $0xe8] sm:$0xff]  ;;  %v8611_v20 = vld [vmem:[%s10225_s3 + $0x12] sm:$0x3] }
 0x1b3   :  { %v2285_v3 = vpop.f32.mrf.mxu0  ;;  %8325 = vmatprep.mubr.msk.bf16.mxu1 %vm292_vm1, %v4022_v5  ;;  %v5350_v63 = vpack.c.bf16 %v5288_v47, %v5287_v45  ;;  %v6222_v5 = vsel %vm795_vm0, %v8610_v16, 0  ;;  %v4673_v49 = vpack.c.bf16 %v4612_v54, %v4611_v53  ;;  %v6836_v12 = vsel %vm795_vm0, %v8611_v20, 0  ;;  %v4618_v47 = vld [vmem:[#allocation2 + $0xb0] sm:$0xff]  ;;  %v4619_v54 = vld [vmem:[#allocation2 + $0xc0] sm:$0xff] }
 0x1b4   :  { %v2468_v19 = vadd.f32 %v2285_v3, %v2014_v37  ;;  %3207 = vst [vmem:[#allocation3 + $0xa8] sm:$0xff] %v3143_v6  ;;  %v3148_v55 = vadd.f32 %v8159_v14, %v2470_v32  ;;  %v2963_v21 = vpop.f32.mrf.mxu1  ;;  %v5351_v32 = vpack.c.bf16 %v5290_v59, %v5289_v11  ;;  %v2024_v6 = vld [vmem:[#allocation3 + $0x110] sm:$0xff]  ;;  %v4614_v3 = vld [vmem:[#allocation2 + $0x80] sm:$0xff] }
 0x1b5   :  { %v8094_v0 = vpop.f32.mrf.mxu0  ;;  %v5297_v59 = vld [vmem:[#allocation2 + $0xc1] sm:$0xff] }
 0x1b6   :  { %v2471_v24 = vadd.f32 %v8094_v0, %v2017_v22  ;;  %3212 = vst [vmem:[#allocation3 + $0xd0] sm:$0xff] %v3148_v55  ;;  %v3146_v26 = vadd.f32 %v2963_v21, %v2468_v19  ;;  %v8160_v35 = vpop.f32.mrf.mxu1  ;;  %v2022_v19 = vld [vmem:[#allocation3 + $0x100] sm:$0xff]  ;;  %v4615_v21 = vld [vmem:[#allocation2 + $0x90] sm:$0xff] }
 0x1b7   :  { %v2288_v39 = vpop.f32.mrf.mxu0 }
 0x1b8   :  { %v2469_v34 = vadd.f32 %v2288_v39, %v2015_v31  ;;  %3210 = vst [vmem:[#allocation3 + $0xc0] sm:$0xff] %v3146_v26  ;;  %v3149_v36 = vadd.f32 %v8160_v35, %v2471_v24  ;;  %v2966_v52 = vpop.f32.mrf.mxu1  ;;  %v5294_v24 = vld [vmem:[#allocation2 + $0x99] sm:$0xff] }
 0x1b9   :  { %v8097_v40 = vpop.f32.mrf.mxu0  ;;  %8260 = vmatmul.mubr.msk.bf16.gmra.mxu0 %vm292_vm1, %v3345_v23  ;;  %v5293_v23 = vld [vmem:[#allocation2 + $0x91] sm:$0xff] }
 0x1ba   :  { %v2474_v9 = vadd.f32 %v8097_v40, %v2020_v38  ;;  %3213 = vst [vmem:[#allocation3 + $0xd8] sm:$0xff] %v3149_v36  ;;  %v3147_v44 = vadd.f32 %v2966_v52, %v2469_v34  ;;  %v8163_v42 = vpop.f32.mrf.mxu1  ;;  %8326 = vmatmul.mubr.msk.bf16.gmra.mxu1 %vm292_vm1, %v4023_v27  ;;  %8331 = vmatprep.mubr.msk.bf16.mxu0 %vm292_vm1, %v4671_v29  ;;  %v2025_v26 = vld [vmem:[#allocation3 + $0x118] sm:$0xff]  ;;  %v2023_v36 = vld [vmem:[#allocation3 + $0x108] sm:$0xff] }
 0x1bb   :  { %v2301_v1 = vpop.f32.mrf.mxu0  ;;  %8397 = vmatprep.mubr.msk.bf16.mxu1 %vm292_vm1, %v5349_v33  ;;  %v4674_v27 = vpack.c.bf16 %v4614_v3, %v4613_v15  ;;  %v5352_v33 = vpack.c.bf16 %v5292_v18, %v5291_v30  ;;  %v4675_v34 = vpack.c.bf16 %v4616_v4, %v4615_v21  ;;  %v5353_v38 = vpack.c.bf16 %v5294_v24, %v5293_v23  ;;  %v4621_v15 = vld [vmem:[#allocation2 + $0xd8] sm:$0xff]  ;;  %v4622_v3 = vld [vmem:[#allocation2 + $0xe0] sm:$0xff]  ;;  %v4623_v21 = vld [vmem:[#allocation2 + $0xf0] sm:$0xff] }
 0x1bc   :  { %v2472_v48 = vadd.f32 %v2301_v1, %v2018_v46  ;;  %3211 = vst [vmem:[#allocation3 + $0xc8] sm:$0xff] %v3147_v44  ;;  %v3152_v50 = vadd.f32 %v8163_v42, %v2474_v9  ;;  %v2979_v51 = vpop.f32.mrf.mxu1  ;;  %v2028_v42 = vld [vmem:[#allocation3 + $0x130] sm:$0xff]  ;;  %v5299_v30 = vld [vmem:[#allocation2 + $0xd9] sm:$0xff]  ;;  %v5300_v18 = vld [vmem:[#allocation2 + $0xe1] sm:$0xff] }
 0x1bd   :  { %v8098_v57 = vpop.f32.mrf.mxu0  ;;  %v4624_v4 = vld [vmem:[#allocation2 + $0xf8] sm:$0xff] }
 0x1be   :  { %v2475_v60 = vadd.f32 %v8098_v57, %v2021_v56  ;;  %3216 = vst [vmem:[#allocation3 + $0xf0] sm:$0xff] %v3152_v50  ;;  %v3150_v62 = vadd.f32 %v2979_v51, %v2472_v48  ;;  %v8164_v28 = vpop.f32.mrf.mxu1  ;;  %v5295_v48 = vld [vmem:[#allocation2 + $0xa9] sm:$0xff]  ;;  %v5296_v50 = vld [vmem:[#allocation2 + $0xb1] sm:$0xff]  ;;  %v2026_v51 = vld [vmem:[#allocation3 + $0x120] sm:$0xff] }
 0x1bf   :  { %v2304_v2 = vpop.f32.mrf.mxu0  ;;  %v4620_v56 = vld [vmem:[#allocation2 + $0xc8] sm:$0xff]  ;;  %v5301_v23 = vld [vmem:[#allocation2 + $0xf1] sm:$0xff]  ;;  %v5302_v24 = vld [vmem:[#allocation2 + $0xf9] sm:$0xff] }
 0x1c0   :  { %v2473_v7 = vadd.f32 %v2304_v2, %v2019_v25  ;;  %3214 = vst [vmem:[#allocation3 + $0xe0] sm:$0xff] %v3150_v62  ;;  %v3153_v8 = vadd.f32 %v8164_v28, %v2475_v60  ;;  %v2982_v10 = vpop.f32.mrf.mxu1  ;;  %v5298_v60 = vld [vmem:[#allocation2 + $0xc9] sm:$0xff]  ;;  %v2029_v62 = vld [vmem:[#allocation3 + $0x138] sm:$0xff] }
 0x1c1   :  { %v8101_v14 = vpop.f32.mrf.mxu0  ;;  %8332 = vmatmul.mubr.msk.bf16.vlgmr.msra.gmra.mxu0 %vm292_vm1, %v4672_v13 }
 0x1c2   :  { %v2478_v61 = vadd.f32 %v8101_v14, %v2024_v6  ;;  %3217 = vst [vmem:[#allocation3 + $0xf8] sm:$0xff] %v3153_v8  ;;  %8462 = vmatpush3.bf16.msra.mxu0 %v6222_v5  ;;  %v3151_v17 = vadd.f32 %v2982_v10, %v2473_v7  ;;  %v8167_v37 = vpop.f32.mrf.mxu1  ;;  %8398 = vmatmul.mubr.msk.bf16.vlgmr.msra.gmra.mxu1 %vm292_vm1, %v5350_v63  ;;  %v2027_v7 = vld [vmem:[#allocation3 + $0x128] sm:$0xff]  ;;  %v2032_v6 = vld [vmem:[#allocation3 + $0x150] sm:$0xff] }
 0x1c3   :  { %v2317_v55 = vpop.f32.mrf.mxu0  ;;  %8335 = vmatprep.mubr.msk.bf16.mxu0 %vm292_vm1, %v4673_v49  ;;  %8528 = vmatpush3.bf16.msra.mxu1 %v6836_v12  ;;  %v4676_v63 = vpack.c.bf16 %v4618_v47, %v4617_v43  ;;  %v5354_v5 = vpack.c.bf16 %v5296_v50, %v5295_v48  ;;  %v4677_v49 = vpack.c.bf16 %v4620_v56, %v4619_v54  ;;  %v4625_v43 = vld [vmem:[#allocation2 + $0x108] sm:$0xff]  ;;  %v4626_v47 = vld [vmem:[#allocation2 + $0x110] sm:$0xff]  ;;  %v4627_v54 = vld [vmem:[#allocation2 + $0x120] sm:$0xff] }
 0x1c4   :  { %v2476_v58 = vadd.f32 %v2317_v55, %v2022_v19  ;;  %3215 = vst [vmem:[#allocation3 + $0xe8] sm:$0xff] %v3151_v17  ;;  %v3156_v22 = vadd.f32 %v8167_v37, %v2478_v61  ;;  %v2995_v0 = vpop.f32.mrf.mxu1  ;;  %8401 = vmatprep.mubr.msk.bf16.mxu1 %vm292_vm1, %v5351_v32  ;;  %v5355_v10 = vpack.c.bf16 %v5298_v60, %v5297_v59  ;;  %v2030_v19 = vld [vmem:[#allocation3 + $0x140] sm:$0xff]  ;;  %v5303_v48 = vld [vmem:[#allocation2 + $0x109] sm:$0xff]  ;;  %v5304_v50 = vld [vmem:[#allocation2 + $0x111] sm:$0xff] }
 0x1c5   :  { %v8102_v35 = vpop.f32.mrf.mxu0  ;;  %v4628_v56 = vld [vmem:[#allocation2 + $0x128] sm:$0xff] }
 0x1c6   :  { %v2479_v29 = vadd.f32 %v8102_v35, %v2025_v26  ;;  %3220 = vst [vmem:[#allocation3 + $0x110] sm:$0xff] %v3156_v22  ;;  %v3154_v31 = vadd.f32 %v2995_v0, %v2476_v58  ;;  %v8168_v39 = vpop.f32.mrf.mxu1  ;;  %v2033_v26 = vld [vmem:[#allocation3 + $0x158] sm:$0xff]  ;;  %v5305_v59 = vld [vmem:[#allocation2 + $0x121] sm:$0xff]  ;;  %v5306_v60 = vld [vmem:[#allocation2 + $0x129] sm:$0xff] }
 0x1c7   :  { %v2320_v52 = vpop.f32.mrf.mxu0 }
 0x1c8   :  { %v2477_v40 = vadd.f32 %v2320_v52, %v2023_v36  ;;  %3218 = vst [vmem:[#allocation3 + $0x100] sm:$0xff] %v3154_v31  ;;  %v3157_v9 = vadd.f32 %v8168_v39, %v2479_v29  ;;  %v2998_v44 = vpop.f32.mrf.mxu1  ;;  %v2031_v36 = vld [vmem:[#allocation3 + $0x148] sm:$0xff] }
 0x1c9   :  { %v8105_v41 = vpop.f32.mrf.mxu0  ;;  %8336 = vmatmul.mubr.msk.bf16.gmra.mxu0 %vm292_vm1, %v4674_v27  ;;  %v4678_v27 = vpack.c.bf16 %v4622_v3, %v4621_v15  ;;  %v4629_v15 = vld [vmem:[#allocation2 + $0x138] sm:$0xff]  ;;  %v4630_v3 = vld [vmem:[#allocation2 + $0x140] sm:$0xff] }
 0x1ca   :  { %v2482_v46 = vadd.f32 %v8105_v41, %v2028_v42  ;;  %3221 = vst [vmem:[#allocation3 + $0x118] sm:$0xff] %v3157_v9  ;;  %v3155_v1 = vadd.f32 %v2998_v44, %v2477_v40  ;;  %v8171_v45 = vpop.f32.mrf.mxu1  ;;  %8402 = vmatmul.mubr.msk.bf16.gmra.mxu1 %vm292_vm1, %v5352_v33  ;;  %8339 = vmatprep.mubr.msk.bf16.mxu0 %vm292_vm1, %v4675_v34  ;;  %v2036_v42 = vld [vmem:[#allocation3 + $0x170] sm:$0xff] }
 0x1cb   :  { %v2333_v53 = vpop.f32.mrf.mxu0  ;;  %8405 = vmatprep.mubr.msk.bf16.mxu1 %vm292_vm1, %v5353_v38  ;;  %v5356_v33 = vpack.c.bf16 %v5300_v18, %v5299_v30  ;;  %v4679_v34 = vpack.c.bf16 %v4624_v4, %v4623_v21  ;;  %v5357_v38 = vpack.c.bf16 %v5302_v24, %v5301_v23  ;;  %v5307_v30 = vld [vmem:[#allocation2 + $0x139] sm:$0xff]  ;;  %v5308_v18 = vld [vmem:[#allocation2 + $0x141] sm:$0xff]  ;;  %v4631_v21 = vld [vmem:[#allocation2 + $0x150] sm:$0xff] }
 0x1cc   :  { %v2480_v57 = vadd.f32 %v2333_v53, %v2026_v51  ;;  %3219 = vst [vmem:[#allocation3 + $0x108] sm:$0xff] %v3155_v1  ;;  %v3160_v13 = vadd.f32 %v8171_v45, %v2482_v46  ;;  %v3011_v11 = vpop.f32.mrf.mxu1  ;;  %v2034_v51 = vld [vmem:[#allocation3 + $0x160] sm:$0xff]  ;;  %v4632_v4 = vld [vmem:[#allocation2 + $0x158] sm:$0xff] }
 0x1cd   :  { %v8106_v28 = vpop.f32.mrf.mxu0  ;;  %v5309_v23 = vld [vmem:[#allocation2 + $0x151] sm:$0xff]  ;;  %v5310_v24 = vld [vmem:[#allocation2 + $0x159] sm:$0xff] }
 0x1ce   :  { %v2483_v25 = vadd.f32 %v8106_v28, %v2029_v62  ;;  %3224 = vst [vmem:[#allocation3 + $0x130] sm:$0xff] %v3160_v13  ;;  %v3158_v2 = vadd.f32 %v3011_v11, %v2480_v57  ;;  %v8172_v16 = vpop.f32.mrf.mxu1  ;;  %v2037_v62 = vld [vmem:[#allocation3 + $0x178] sm:$0xff] }
 0x1cf   :  { %v2336_v8 = vpop.f32.mrf.mxu0 }
 0x1d0   :  { %v2481_v20 = vadd.f32 %v2336_v8, %v2027_v7  ;;  %3222 = vst [vmem:[#allocation3 + $0x120] sm:$0xff] %v3158_v2  ;;  %v3161_v12 = vadd.f32 %v8172_v16, %v2483_v25  ;;  %v3014_v32 = vpop.f32.mrf.mxu1  ;;  %v2035_v7 = vld [vmem:[#allocation3 + $0x168] sm:$0xff] }
 0x1d1   :  { %v8109_v14 = vpop.f32.mrf.mxu0  ;;  %8340 = vmatmul.mubr.msk.bf16.gmra.mxu0 %vm292_vm1, %v4676_v63  ;;  %v4680_v63 = vpack.c.bf16 %v4626_v47, %v4625_v43  ;;  %v4633_v43 = vld [vmem:[#allocation2 + $0x168] sm:$0xff]  ;;  %v4634_v47 = vld [vmem:[#allocation2 + $0x170] sm:$0xff] }
 0x1d2   :  { %v2486_v61 = vadd.f32 %v8109_v14, %v2032_v6  ;;  %3225 = vst [vmem:[#allocation3 + $0x138] sm:$0xff] %v3161_v12  ;;  %v3159_v17 = vadd.f32 %v3014_v32, %v2481_v20  ;;  %v8175_v37 = vpop.f32.mrf.mxu1  ;;  %8406 = vmatmul.mubr.msk.bf16.gmra.mxu1 %vm292_vm1, %v5354_v5  ;;  %8343 = vmatprep.mubr.msk.bf16.mxu0 %vm292_vm1, %v4677_v49  ;;  %v2040_v6 = vld [vmem:[#allocation3 + $0x190] sm:$0xff] }
 0x1d3   :  { %v2349_v55 = vpop.f32.mrf.mxu0  ;;  %8409 = vmatprep.mubr.msk.bf16.mxu1 %vm292_vm1, %v5355_v10  ;;  %v5358_v5 = vpack.c.bf16 %v5304_v50, %v5303_v48  ;;  %v4681_v49 = vpack.c.bf16 %v4628_v56, %v4627_v54  ;;  %v5359_v10 = vpack.c.bf16 %v5306_v60, %v5305_v59  ;;  %v5311_v48 = vld [vmem:[#allocation2 + $0x169] sm:$0xff]  ;;  %v5312_v50 = vld [vmem:[#allocation2 + $0x171] sm:$0xff]  ;;  %v4635_v54 = vld [vmem:[#allocation2 + $0x180] sm:$0xff] }
 0x1d4   :  { %v2484_v58 = vadd.f32 %v2349_v55, %v2030_v19  ;;  %3223 = vst [vmem:[#allocation3 + $0x128] sm:$0xff] %v3159_v17  ;;  %v3164_v22 = vadd.f32 %v8175_v37, %v2486_v61  ;;  %v3027_v0 = vpop.f32.mrf.mxu1  ;;  %v2038_v19 = vld [vmem:[#allocation3 + $0x180] sm:$0xff]  ;;  %v4636_v56 = vld [vmem:[#allocation2 + $0x188] sm:$0xff] }
 0x1d5   :  { %v8110_v35 = vpop.f32.mrf.mxu0  ;;  %v5313_v59 = vld [vmem:[#allocation2 + $0x181] sm:$0xff]  ;;  %v5314_v60 = vld [vmem:[#allocation2 + $0x189] sm:$0xff] }
 0x1d6   :  { %v2487_v29 = vadd.f32 %v8110_v35, %v2033_v26  ;;  %3228 = vst [vmem:[#allocation3 + $0x150] sm:$0xff] %v3164_v22  ;;  %v3162_v31 = vadd.f32 %v3027_v0, %v2484_v58  ;;  %v8176_v39 = vpop.f32.mrf.mxu1  ;;  %v2041_v26 = vld [vmem:[#allocation3 + $0x198] sm:$0xff] }
 0x1d7   :  { %v2352_v52 = vpop.f32.mrf.mxu0 }
 0x1d8   :  { %v2485_v40 = vadd.f32 %v2352_v52, %v2031_v36  ;;  %3226 = vst [vmem:[#allocation3 + $0x140] sm:$0xff] %v3162_v31  ;;  %v3165_v9 = vadd.f32 %v8176_v39, %v2487_v29  ;;  %v3030_v44 = vpop.f32.mrf.mxu1  ;;  %v2039_v36 = vld [vmem:[#allocation3 + $0x188] sm:$0xff] }
 0x1d9   :  { %v8113_v41 = vpop.f32.mrf.mxu0  ;;  %8344 = vmatmul.mubr.msk.bf16.gmra.mxu0 %vm292_vm1, %v4678_v27  ;;  %v4682_v27 = vpack.c.bf16 %v4630_v3, %v4629_v15  ;;  %v4637_v15 = vld [vmem:[#allocation2 + $0x198] sm:$0xff]  ;;  %v4638_v3 = vld [vmem:[#allocation2 + $0x1a0] sm:$0xff] }
 0x1da   :  { %v2490_v46 = vadd.f32 %v8113_v41, %v2036_v42  ;;  %3229 = vst [vmem:[#allocation3 + $0x158] sm:$0xff] %v3165_v9  ;;  %v3163_v1 = vadd.f32 %v3030_v44, %v2485_v40  ;;  %v8179_v45 = vpop.f32.mrf.mxu1  ;;  %8410 = vmatmul.mubr.msk.bf16.gmra.mxu1 %vm292_vm1, %v5356_v33  ;;  %8347 = vmatprep.mubr.msk.bf16.mxu0 %vm292_vm1, %v4679_v34  ;;  %v2044_v42 = vld [vmem:[#allocation3 + $0x1b0] sm:$0xff] }
 0x1db   :  { %v2365_v53 = vpop.f32.mrf.mxu0  ;;  %8413 = vmatprep.mubr.msk.bf16.mxu1 %vm292_vm1, %v5357_v38  ;;  %v5360_v33 = vpack.c.bf16 %v5308_v18, %v5307_v30  ;;  %v4683_v34 = vpack.c.bf16 %v4632_v4, %v4631_v21  ;;  %v5361_v38 = vpack.c.bf16 %v5310_v24, %v5309_v23  ;;  %v5315_v30 = vld [vmem:[#allocation2 + $0x199] sm:$0xff]  ;;  %v5316_v18 = vld [vmem:[#allocation2 + $0x1a1] sm:$0xff]  ;;  %v5318_v24 = vld [vmem:[#allocation2 + $0x1e9] sm:$0xff] }
 0x1dc   :  { %v2488_v57 = vadd.f32 %v2365_v53, %v2034_v51  ;;  %3227 = vst [vmem:[#allocation3 + $0x148] sm:$0xff] %v3163_v1  ;;  %v3168_v13 = vadd.f32 %v8179_v45, %v2490_v46  ;;  %v3043_v11 = vpop.f32.mrf.mxu1  ;;  %v2042_v51 = vld [vmem:[#allocation3 + $0x1a0] sm:$0xff]  ;;  %v4640_v4 = vld [vmem:[#allocation2 + $0x1e8] sm:$0xff] }
 0x1dd   :  { %v8114_v28 = vpop.f32.mrf.mxu0  ;;  %v4639_v21 = vld [vmem:[#allocation2 + $0x1e0] sm:$0xff] }
 0x1de   :  { %v2491_v25 = vadd.f32 %v8114_v28, %v2037_v62  ;;  %3232 = vst [vmem:[#allocation3 + $0x170] sm:$0xff] %v3168_v13  ;;  %v3166_v2 = vadd.f32 %v3043_v11, %v2488_v57  ;;  %v8180_v16 = vpop.f32.mrf.mxu1  ;;  %v2045_v62 = vld [vmem:[#allocation3 + $0x1b8] sm:$0xff]  ;;  %v5317_v23 = vld [vmem:[#allocation2 + $0x1e1] sm:$0xff] }
 0x1df   :  { %v2368_v8 = vpop.f32.mrf.mxu0 }
 0x1e0   :  { %v2489_v20 = vadd.f32 %v2368_v8, %v2035_v7  ;;  %3230 = vst [vmem:[#allocation3 + $0x160] sm:$0xff] %v3166_v2  ;;  %v3169_v12 = vadd.f32 %v8180_v16, %v2491_v25  ;;  %v3046_v32 = vpop.f32.mrf.mxu1  ;;  %v2043_v7 = vld [vmem:[#allocation3 + $0x1a8] sm:$0xff] }
 0x1e1   :  { %v8117_v14 = vpop.f32.mrf.mxu0  ;;  %8348 = vmatmul.mubr.msk.bf16.gmra.mxu0 %vm292_vm1, %v4680_v63  ;;  %v4684_v63 = vpack.c.bf16 %v4634_v47, %v4633_v43  ;;  %v4641_v43 = vld [vmem:[#allocation2 + $0x1f8] sm:$0xff]  ;;  %v4642_v47 = vld [vmem:[#allocation2 + $0x200] sm:$0xff] }
 0x1e2   :  { %v2494_v61 = vadd.f32 %v8117_v14, %v2040_v6  ;;  %3233 = vst [vmem:[#allocation3 + $0x178] sm:$0xff] %v3169_v12  ;;  %v3167_v17 = vadd.f32 %v3046_v32, %v2489_v20  ;;  %v8183_v37 = vpop.f32.mrf.mxu1  ;;  %8414 = vmatmul.mubr.msk.bf16.gmra.mxu1 %vm292_vm1, %v5358_v5  ;;  %8351 = vmatprep.mubr.msk.bf16.mxu0 %vm292_vm1, %v4681_v49  ;;  %v2048_v6 = vld [vmem:[#allocation3 + $0x1d0] sm:$0xff] }
 0x1e3   :  { %v2381_v55 = vpop.f32.mrf.mxu0  ;;  %8417 = vmatprep.mubr.msk.bf16.mxu1 %vm292_vm1, %v5359_v10  ;;  %v5362_v5 = vpack.c.bf16 %v5312_v50, %v5311_v48  ;;  %v4685_v49 = vpack.c.bf16 %v4636_v56, %v4635_v54  ;;  %v5363_v10 = vpack.c.bf16 %v5314_v60, %v5313_v59  ;;  %v5319_v48 = vld [vmem:[#allocation2 + $0x1f9] sm:$0xff]  ;;  %v5320_v50 = vld [vmem:[#allocation2 + $0x201] sm:$0xff]  ;;  %v4643_v54 = vld [vmem:[#allocation2 + $0x210] sm:$0xff] }
 0x1e4   :  { %v2492_v58 = vadd.f32 %v2381_v55, %v2038_v19  ;;  %3231 = vst [vmem:[#allocation3 + $0x168] sm:$0xff] %v3167_v17  ;;  %v3172_v22 = vadd.f32 %v8183_v37, %v2494_v61  ;;  %v3059_v0 = vpop.f32.mrf.mxu1  ;;  %v2046_v19 = vld [vmem:[#allocation3 + $0x1c0] sm:$0xff]  ;;  %v4644_v56 = vld [vmem:[#allocation2 + $0x218] sm:$0xff] }
 0x1e5   :  { %v8118_v35 = vpop.f32.mrf.mxu0  ;;  %v5321_v59 = vld [vmem:[#allocation2 + $0x211] sm:$0xff]  ;;  %v5322_v60 = vld [vmem:[#allocation2 + $0x219] sm:$0xff] }
 0x1e6   :  { %v2495_v29 = vadd.f32 %v8118_v35, %v2041_v26  ;;  %3236 = vst [vmem:[#allocation3 + $0x190] sm:$0xff] %v3172_v22  ;;  %v3170_v31 = vadd.f32 %v3059_v0, %v2492_v58  ;;  %v8184_v39 = vpop.f32.mrf.mxu1  ;;  %v2049_v26 = vld [vmem:[#allocation3 + $0x1d8] sm:$0xff] }
 0x1e7   :  { %v2384_v52 = vpop.f32.mrf.mxu0 }
 0x1e8   :  { %v2493_v40 = vadd.f32 %v2384_v52, %v2039_v36  ;;  %3234 = vst [vmem:[#allocation3 + $0x180] sm:$0xff] %v3170_v31  ;;  %v3173_v9 = vadd.f32 %v8184_v39, %v2495_v29  ;;  %v3062_v44 = vpop.f32.mrf.mxu1  ;;  %v2047_v36 = vld [vmem:[#allocation3 + $0x1c8] sm:$0xff] }
 0x1e9   :  { %v8121_v41 = vpop.f32.mrf.mxu0  ;;  %8352 = vmatmul.mubr.msk.bf16.gmra.mxu0 %vm292_vm1, %v4682_v27  ;;  %v4686_v27 = vpack.c.bf16 %v4638_v3, %v4637_v15  ;;  %v4645_v15 = vld [vmem:[#allocation2 + $0x228] sm:$0xff]  ;;  %v4646_v3 = vld [vmem:[#allocation2 + $0x230] sm:$0xff] }
 0x1ea   :  { %v2498_v46 = vadd.f32 %v8121_v41, %v2044_v42  ;;  %3237 = vst [vmem:[#allocation3 + $0x198] sm:$0xff] %v3173_v9  ;;  %v3171_v1 = vadd.f32 %v3062_v44, %v2493_v40  ;;  %v8187_v45 = vpop.f32.mrf.mxu1  ;;  %8418 = vmatmul.mubr.msk.bf16.gmra.mxu1 %vm292_vm1, %v5360_v33  ;;  %8355 = vmatprep.mubr.msk.bf16.mxu0 %vm292_vm1, %v4683_v34  ;;  %v2052_v42 = vld [vmem:[#allocation3 + $0x1f0] sm:$0xff] }
 0x1eb   :  { %v2397_v53 = vpop.f32.mrf.mxu0  ;;  %8421 = vmatprep.mubr.msk.bf16.mxu1 %vm292_vm1, %v5361_v38  ;;  %v5364_v33 = vpack.c.bf16 %v5316_v18, %v5315_v30  ;;  %v4687_v34 = vpack.c.bf16 %v4640_v4, %v4639_v21  ;;  %v5365_v38 = vpack.c.bf16 %v5318_v24, %v5317_v23  ;;  %v5323_v30 = vld [vmem:[#allocation2 + $0x229] sm:$0xff]  ;;  %v5324_v18 = vld [vmem:[#allocation2 + $0x231] sm:$0xff]  ;;  %v4647_v21 = vld [vmem:[#allocation2 + $0x240] sm:$0xff] }
 0x1ec   :  { %v2496_v57 = vadd.f32 %v2397_v53, %v2042_v51  ;;  %3235 = vst [vmem:[#allocation3 + $0x188] sm:$0xff] %v3171_v1  ;;  %v3176_v13 = vadd.f32 %v8187_v45, %v2498_v46  ;;  %v3075_v11 = vpop.f32.mrf.mxu1  ;;  %v2050_v51 = vld [vmem:[#allocation3 + $0x1e0] sm:$0xff]  ;;  %v4648_v4 = vld [vmem:[#allocation2 + $0x248] sm:$0xff] }
 0x1ed   :  { %v8122_v28 = vpop.f32.mrf.mxu0  ;;  %v5325_v23 = vld [vmem:[#allocation2 + $0x241] sm:$0xff]  ;;  %v5326_v24 = vld [vmem:[#allocation2 + $0x249] sm:$0xff] }
 0x1ee   :  { %v2499_v25 = vadd.f32 %v8122_v28, %v2045_v62  ;;  %3240 = vst [vmem:[#allocation3 + $0x1b0] sm:$0xff] %v3176_v13  ;;  %v3174_v2 = vadd.f32 %v3075_v11, %v2496_v57  ;;  %v8188_v16 = vpop.f32.mrf.mxu1  ;;  %v2053_v62 = vld [vmem:[#allocation3 + $0x1f8] sm:$0xff] }
 0x1ef   :  { %v2400_v8 = vpop.f32.mrf.mxu0 }
 0x1f0   :  { %v2497_v20 = vadd.f32 %v2400_v8, %v2043_v7  ;;  %3238 = vst [vmem:[#allocation3 + $0x1a0] sm:$0xff] %v3174_v2  ;;  %v3177_v12 = vadd.f32 %v8188_v16, %v2499_v25  ;;  %v3078_v32 = vpop.f32.mrf.mxu1  ;;  %v2051_v7 = vld [vmem:[#allocation3 + $0x1e8] sm:$0xff] }
 0x1f1   :  { %v8125_v14 = vpop.f32.mrf.mxu0  ;;  %8356 = vmatmul.mubr.msk.bf16.gmra.mxu0 %vm292_vm1, %v4684_v63  ;;  %v4688_v63 = vpack.c.bf16 %v4642_v47, %v4641_v43  ;;  %v4649_v43 = vld [vmem:[#allocation2 + $0x258] sm:$0xff]  ;;  %v4650_v47 = vld [vmem:[#allocation2 + $0x260] sm:$0xff] }
 0x1f2   :  { %v2502_v61 = vadd.f32 %v8125_v14, %v2048_v6  ;;  %3241 = vst [vmem:[#allocation3 + $0x1b8] sm:$0xff] %v3177_v12  ;;  %v3175_v17 = vadd.f32 %v3078_v32, %v2497_v20  ;;  %v8191_v37 = vpop.f32.mrf.mxu1  ;;  %8422 = vmatmul.mubr.msk.bf16.gmra.mxu1 %vm292_vm1, %v5362_v5  ;;  %8359 = vmatprep.mubr.msk.bf16.mxu0 %vm292_vm1, %v4685_v49  ;;  %v3348_v6 = vld [vmem:[#allocation3 + $0x10] sm:$0xff] }
 0x1f3   :  { %v2413_v55 = vpop.f32.mrf.mxu0  ;;  %8425 = vmatprep.mubr.msk.bf16.mxu1 %vm292_vm1, %v5363_v10  ;;  %v5366_v5 = vpack.c.bf16 %v5320_v50, %v5319_v48  ;;  %v4689_v49 = vpack.c.bf16 %v4644_v56, %v4643_v54  ;;  %v5367_v10 = vpack.c.bf16 %v5322_v60, %v5321_v59  ;;  %v5327_v48 = vld [vmem:[#allocation2 + $0x259] sm:$0xff]  ;;  %v5328_v50 = vld [vmem:[#allocation2 + $0x261] sm:$0xff]  ;;  %v4651_v54 = vld [vmem:[#allocation2 + $0x270] sm:$0xff] }
 0x1f4   :  { %v2500_v58 = vadd.f32 %v2413_v55, %v2046_v19  ;;  %3239 = vst [vmem:[#allocation3 + $0x1a8] sm:$0xff] %v3175_v17  ;;  %v3180_v22 = vadd.f32 %v8191_v37, %v2502_v61  ;;  %v3091_v0 = vpop.f32.mrf.mxu1  ;;  %v3346_v19 = vld [vmem:[#allocation3] sm:$0xff]  ;;  %v4652_v56 = vld [vmem:[#allocation2 + $0x278] sm:$0xff] }
 0x1f5   :  { %v8126_v35 = vpop.f32.mrf.mxu0  ;;  %v5329_v59 = vld [vmem:[#allocation2 + $0x271] sm:$0xff]  ;;  %v5330_v60 = vld [vmem:[#allocation2 + $0x279] sm:$0xff] }
 0x1f6   :  { %v2503_v29 = vadd.f32 %v8126_v35, %v2049_v26  ;;  %3244 = vst [vmem:[#allocation3 + $0x1d0] sm:$0xff] %v3180_v22  ;;  %v3178_v31 = vadd.f32 %v3091_v0, %v2500_v58  ;;  %v8192_v39 = vpop.f32.mrf.mxu1  ;;  %v3349_v26 = vld [vmem:[#allocation3 + $0x18] sm:$0xff] }
 0x1f7   :  { %v2416_v52 = vpop.f32.mrf.mxu0 }
 0x1f8   :  { %v2501_v40 = vadd.f32 %v2416_v52, %v2047_v36  ;;  %3242 = vst [vmem:[#allocation3 + $0x1c0] sm:$0xff] %v3178_v31  ;;  %v3181_v9 = vadd.f32 %v8192_v39, %v2503_v29  ;;  %v3094_v44 = vpop.f32.mrf.mxu1  ;;  %v3347_v36 = vld [vmem:[#allocation3 + $0x8] sm:$0xff] }
 0x1f9   :  { %v8129_v41 = vpop.f32.mrf.mxu0  ;;  %8360 = vmatmul.mubr.msk.bf16.gmra.mxu0 %vm292_vm1, %v4686_v27  ;;  %v4690_v27 = vpack.c.bf16 %v4646_v3, %v4645_v15  ;;  %v4653_v15 = vld [vmem:[#allocation2 + $0x288] sm:$0xff]  ;;  %v4654_v3 = vld [vmem:[#allocation2 + $0x290] sm:$0xff] }
 0x1fa   :  { %v2506_v46 = vadd.f32 %v8129_v41, %v2052_v42  ;;  %3245 = vst [vmem:[#allocation3 + $0x1d8] sm:$0xff] %v3181_v9  ;;  %v3179_v1 = vadd.f32 %v3094_v44, %v2501_v40  ;;  %v8195_v45 = vpop.f32.mrf.mxu1  ;;  %8426 = vmatmul.mubr.msk.bf16.gmra.mxu1 %vm292_vm1, %v5364_v33  ;;  %8363 = vmatprep.mubr.msk.bf16.mxu0 %vm292_vm1, %v4687_v34  ;;  %v3352_v42 = vld [vmem:[#allocation3 + $0x30] sm:$0xff] }
 0x1fb   :  { %v2429_v53 = vpop.f32.mrf.mxu0  ;;  %8429 = vmatprep.mubr.msk.bf16.mxu1 %vm292_vm1, %v5365_v38  ;;  %v5368_v33 = vpack.c.bf16 %v5324_v18, %v5323_v30  ;;  %v4691_v34 = vpack.c.bf16 %v4648_v4, %v4647_v21  ;;  %v5369_v38 = vpack.c.bf16 %v5326_v24, %v5325_v23  ;;  %v5331_v30 = vld [vmem:[#allocation2 + $0x289] sm:$0xff]  ;;  %v5332_v18 = vld [vmem:[#allocation2 + $0x291] sm:$0xff]  ;;  %v4655_v21 = vld [vmem:[#allocation2 + $0x2a0] sm:$0xff] }
 0x1fc   :  { %v2504_v57 = vadd.f32 %v2429_v53, %v2050_v51  ;;  %3243 = vst [vmem:[#allocation3 + $0x1c8] sm:$0xff] %v3179_v1  ;;  %v3184_v13 = vadd.f32 %v8195_v45, %v2506_v46  ;;  %v3107_v11 = vpop.f32.mrf.mxu1  ;;  %v3350_v51 = vld [vmem:[#allocation3 + $0x20] sm:$0xff]  ;;  %v4656_v4 = vld [vmem:[#allocation2 + $0x2a8] sm:$0xff] }
 0x1fd   :  { %v8130_v28 = vpop.f32.mrf.mxu0  ;;  %v5333_v23 = vld [vmem:[#allocation2 + $0x2a1] sm:$0xff]  ;;  %v5334_v24 = vld [vmem:[#allocation2 + $0x2a9] sm:$0xff] }
 0x1fe   :  { %v2507_v25 = vadd.f32 %v8130_v28, %v2053_v62  ;;  %3248 = vst [vmem:[#allocation3 + $0x1f0] sm:$0xff] %v3184_v13  ;;  %v3182_v2 = vadd.f32 %v3107_v11, %v2504_v57  ;;  %v8196_v16 = vpop.f32.mrf.mxu1  ;;  %v3353_v62 = vld [vmem:[#allocation3 + $0x38] sm:$0xff] }
 0x1ff   :  { %v2432_v8 = vpop.f32.mrf.mxu0 }
 0x200   :  { %v2505_v20 = vadd.f32 %v2432_v8, %v2051_v7  ;;  %3246 = vst [vmem:[#allocation3 + $0x1e0] sm:$0xff] %v3182_v2  ;;  %v3185_v12 = vadd.f32 %v8196_v16, %v2507_v25  ;;  %v3110_v32 = vpop.f32.mrf.mxu1  ;;  %v3351_v7 = vld [vmem:[#allocation3 + $0x28] sm:$0xff] }
 0x201   :  { %v8201_v14 = vpop.f32.mrf.mxu0  ;;  %8364 = vmatmul.mubr.msk.bf16.gmra.mxu0 %vm292_vm1, %v4688_v63  ;;  %v4692_v63 = vpack.c.bf16 %v4650_v47, %v4649_v43  ;;  %v4657_v43 = vld [vmem:[#allocation2 + $0x2b8] sm:$0xff]  ;;  %v4658_v47 = vld [vmem:[#allocation2 + $0x2c0] sm:$0xff] }
 0x202   :  { %3249 = vst [vmem:[#allocation3 + $0x1f8] sm:$0xff] %v3185_v12  ;;  %v3802_v61 = vadd.f32 %v8201_v14, %v3348_v6  ;;  %v3183_v17 = vadd.f32 %v3110_v32, %v2505_v20  ;;  %v8267_v37 = vpop.f32.mrf.mxu1  ;;  %8430 = vmatmul.mubr.msk.bf16.gmra.mxu1 %vm292_vm1, %v5366_v5  ;;  %8367 = vmatprep.mubr.msk.bf16.mxu0 %vm292_vm1, %v4689_v49  ;;  %v3356_v6 = vld [vmem:[#allocation3 + $0x50] sm:$0xff] }
 0x203   :  { %v3545_v55 = vpop.f32.mrf.mxu0  ;;  %8433 = vmatprep.mubr.msk.bf16.mxu1 %vm292_vm1, %v5367_v10  ;;  %v5370_v5 = vpack.c.bf16 %v5328_v50, %v5327_v48  ;;  %v4693_v49 = vpack.c.bf16 %v4652_v56, %v4651_v54  ;;  %v5371_v10 = vpack.c.bf16 %v5330_v60, %v5329_v59  ;;  %v5335_v48 = vld [vmem:[#allocation2 + $0x2b9] sm:$0xff]  ;;  %v5336_v50 = vld [vmem:[#allocation2 + $0x2c1] sm:$0xff]  ;;  %v4659_v54 = vld [vmem:[#allocation2 + $0x2d0] sm:$0xff] }
 0x204   :  { %3247 = vst [vmem:[#allocation3 + $0x1e8] sm:$0xff] %v3183_v17  ;;  %v3800_v58 = vadd.f32 %v3545_v55, %v3346_v19  ;;  %v4480_v22 = vadd.f32 %v8267_v37, %v3802_v61  ;;  %v4223_v0 = vpop.f32.mrf.mxu1  ;;  %v3354_v19 = vld [vmem:[#allocation3 + $0x40] sm:$0xff]  ;;  %v4660_v56 = vld [vmem:[#allocation2 + $0x2d8] sm:$0xff] }
 0x205   :  { %v8202_v35 = vpop.f32.mrf.mxu0  ;;  %v5337_v59 = vld [vmem:[#allocation2 + $0x2d1] sm:$0xff]  ;;  %v5338_v60 = vld [vmem:[#allocation2 + $0x2d9] sm:$0xff] }
 0x206   :  { %v3803_v29 = vadd.f32 %v8202_v35, %v3349_v26  ;;  %4544 = vst [vmem:[#allocation3 + $0x10] sm:$0xff] %v4480_v22  ;;  %v4478_v31 = vadd.f32 %v4223_v0, %v3800_v58  ;;  %v8268_v39 = vpop.f32.mrf.mxu1  ;;  %v3357_v26 = vld [vmem:[#allocation3 + $0x58] sm:$0xff] }
 0x207   :  { %v3548_v52 = vpop.f32.mrf.mxu0 }
 0x208   :  { %v3801_v40 = vadd.f32 %v3548_v52, %v3347_v36  ;;  %4542 = vst [vmem:[#allocation3] sm:$0xff] %v4478_v31  ;;  %v4481_v9 = vadd.f32 %v8268_v39, %v3803_v29  ;;  %v4226_v44 = vpop.f32.mrf.mxu1  ;;  %v3355_v36 = vld [vmem:[#allocation3 + $0x48] sm:$0xff] }
 0x209   :  { %v8205_v41 = vpop.f32.mrf.mxu0  ;;  %8368 = vmatmul.mubr.msk.bf16.gmra.mxu0 %vm292_vm1, %v4690_v27  ;;  %v4694_v27 = vpack.c.bf16 %v4654_v3, %v4653_v15  ;;  %v4661_v15 = vld [vmem:[#allocation2 + $0x2e8] sm:$0xff]  ;;  %v4662_v3 = vld [vmem:[#allocation2 + $0x2f0] sm:$0xff] }
 0x20a   :  { %v3806_v46 = vadd.f32 %v8205_v41, %v3352_v42  ;;  %4545 = vst [vmem:[#allocation3 + $0x18] sm:$0xff] %v4481_v9  ;;  %v4479_v1 = vadd.f32 %v4226_v44, %v3801_v40  ;;  %v8271_v45 = vpop.f32.mrf.mxu1  ;;  %8434 = vmatmul.mubr.msk.bf16.gmra.mxu1 %vm292_vm1, %v5368_v33  ;;  %8371 = vmatprep.mubr.msk.bf16.mxu0 %vm292_vm1, %v4691_v34  ;;  %v3360_v42 = vld [vmem:[#allocation3 + $0x70] sm:$0xff] }
 0x20b   :  { %v3561_v53 = vpop.f32.mrf.mxu0  ;;  %8437 = vmatprep.mubr.msk.bf16.mxu1 %vm292_vm1, %v5369_v38  ;;  %v5372_v33 = vpack.c.bf16 %v5332_v18, %v5331_v30  ;;  %v4695_v34 = vpack.c.bf16 %v4656_v4, %v4655_v21  ;;  %v5373_v38 = vpack.c.bf16 %v5334_v24, %v5333_v23  ;;  %v5339_v30 = vld [vmem:[#allocation2 + $0x2e9] sm:$0xff]  ;;  %v5340_v18 = vld [vmem:[#allocation2 + $0x2f1] sm:$0xff]  ;;  %v4663_v21 = vld [vmem:[#allocation2 + $0x300] sm:$0xff] }
 0x20c   :  { %v3804_v57 = vadd.f32 %v3561_v53, %v3350_v51  ;;  %4543 = vst [vmem:[#allocation3 + $0x8] sm:$0xff] %v4479_v1  ;;  %v4484_v13 = vadd.f32 %v8271_v45, %v3806_v46  ;;  %v4239_v11 = vpop.f32.mrf.mxu1  ;;  %v3358_v51 = vld [vmem:[#allocation3 + $0x60] sm:$0xff]  ;;  %v4664_v4 = vld [vmem:[#allocation2 + $0x308] sm:$0xff] }
 0x20d   :  { %v8206_v28 = vpop.f32.mrf.mxu0  ;;  %v5341_v23 = vld [vmem:[#allocation2 + $0x301] sm:$0xff]  ;;  %v5342_v24 = vld [vmem:[#allocation2 + $0x309] sm:$0xff] }
 0x20e   :  { %v3807_v25 = vadd.f32 %v8206_v28, %v3353_v62  ;;  %4548 = vst [vmem:[#allocation3 + $0x30] sm:$0xff] %v4484_v13  ;;  %v4482_v2 = vadd.f32 %v4239_v11, %v3804_v57  ;;  %v8272_v16 = vpop.f32.mrf.mxu1  ;;  %v3361_v62 = vld [vmem:[#allocation3 + $0x78] sm:$0xff] }
 0x20f   :  { %v3564_v8 = vpop.f32.mrf.mxu0 }
 0x210   :  { %v3805_v20 = vadd.f32 %v3564_v8, %v3351_v7  ;;  %4546 = vst [vmem:[#allocation3 + $0x20] sm:$0xff] %v4482_v2  ;;  %v4485_v12 = vadd.f32 %v8272_v16, %v3807_v25  ;;  %v4242_v32 = vpop.f32.mrf.mxu1  ;;  %v3359_v7 = vld [vmem:[#allocation3 + $0x68] sm:$0xff] }
 0x211   :  { %v8209_v14 = vpop.f32.mrf.mxu0  ;;  %8372 = vmatmul.mubr.msk.bf16.gmra.mxu0 %vm292_vm1, %v4692_v63  ;;  %v4696_v63 = vpack.c.bf16 %v4658_v47, %v4657_v43  ;;  %v4665_v43 = vld [vmem:[#allocation2 + $0x318] sm:$0xff]  ;;  %v4666_v47 = vld [vmem:[#allocation2 + $0x320] sm:$0xff] }
 0x212   :  { %v3810_v61 = vadd.f32 %v8209_v14, %v3356_v6  ;;  %4549 = vst [vmem:[#allocation3 + $0x38] sm:$0xff] %v4485_v12  ;;  %v4483_v17 = vadd.f32 %v4242_v32, %v3805_v20  ;;  %v8275_v37 = vpop.f32.mrf.mxu1  ;;  %8438 = vmatmul.mubr.msk.bf16.gmra.mxu1 %vm292_vm1, %v5370_v5  ;;  %8375 = vmatprep.mubr.msk.bf16.mxu0 %vm292_vm1, %v4693_v49  ;;  %v3364_v6 = vld [vmem:[#allocation3 + $0x90] sm:$0xff] }
 0x213   :  { %v3577_v55 = vpop.f32.mrf.mxu0  ;;  %8441 = vmatprep.mubr.msk.bf16.mxu1 %vm292_vm1, %v5371_v10  ;;  %v5374_v5 = vpack.c.bf16 %v5336_v50, %v5335_v48  ;;  %v4697_v49 = vpack.c.bf16 %v4660_v56, %v4659_v54  ;;  %v5375_v10 = vpack.c.bf16 %v5338_v60, %v5337_v59  ;;  %v5343_v48 = vld [vmem:[#allocation2 + $0x319] sm:$0xff]  ;;  %v5344_v50 = vld [vmem:[#allocation2 + $0x321] sm:$0xff]  ;;  %v4667_v54 = vld [vmem:[#allocation2 + $0x330] sm:$0xff] }
 0x214   :  { %v3808_v58 = vadd.f32 %v3577_v55, %v3354_v19  ;;  %4547 = vst [vmem:[#allocation3 + $0x28] sm:$0xff] %v4483_v17  ;;  %v4488_v22 = vadd.f32 %v8275_v37, %v3810_v61  ;;  %v4255_v0 = vpop.f32.mrf.mxu1  ;;  %v3362_v19 = vld [vmem:[#allocation3 + $0x80] sm:$0xff]  ;;  %v4668_v56 = vld [vmem:[#allocation2 + $0x338] sm:$0xff] }
 0x215   :  { %v8210_v35 = vpop.f32.mrf.mxu0  ;;  %v5345_v59 = vld [vmem:[#allocation2 + $0x331] sm:$0xff]  ;;  %v5346_v60 = vld [vmem:[#allocation2 + $0x339] sm:$0xff] }
 0x216   :  { %v3811_v29 = vadd.f32 %v8210_v35, %v3357_v26  ;;  %4552 = vst [vmem:[#allocation3 + $0x50] sm:$0xff] %v4488_v22  ;;  %v4486_v31 = vadd.f32 %v4255_v0, %v3808_v58  ;;  %v8276_v39 = vpop.f32.mrf.mxu1  ;;  %v3365_v26 = vld [vmem:[#allocation3 + $0x98] sm:$0xff] }
 0x217   :  { %v3580_v52 = vpop.f32.mrf.mxu0 }
 0x218   :  { %v3809_v40 = vadd.f32 %v3580_v52, %v3355_v36  ;;  %4550 = vst [vmem:[#allocation3 + $0x40] sm:$0xff] %v4486_v31  ;;  %v4489_v9 = vadd.f32 %v8276_v39, %v3811_v29  ;;  %v4258_v44 = vpop.f32.mrf.mxu1  ;;  %v3363_v36 = vld [vmem:[#allocation3 + $0x88] sm:$0xff] }
 0x219   :  { %v8213_v41 = vpop.f32.mrf.mxu0  ;;  %8376 = vmatmul.mubr.msk.bf16.gmra.mxu0 %vm292_vm1, %v4694_v27  ;;  %v4698_v27 = vpack.c.bf16 %v4662_v3, %v4661_v15  ;;  %v4669_v15 = vld [vmem:[#allocation2 + $0x348] sm:$0xff]  ;;  %v4670_v3 = vld [vmem:[#allocation2 + $0x350] sm:$0xff] }
 0x21a   :  { %v3814_v46 = vadd.f32 %v8213_v41, %v3360_v42  ;;  %4553 = vst [vmem:[#allocation3 + $0x58] sm:$0xff] %v4489_v9  ;;  %v4487_v1 = vadd.f32 %v4258_v44, %v3809_v40  ;;  %v8279_v45 = vpop.f32.mrf.mxu1  ;;  %8442 = vmatmul.mubr.msk.bf16.gmra.mxu1 %vm292_vm1, %v5372_v33  ;;  %8379 = vmatprep.mubr.msk.bf16.mxu0 %vm292_vm1, %v4695_v34  ;;  %v3368_v42 = vld [vmem:[#allocation3 + $0xb0] sm:$0xff] }
 0x21b   :  { %v3593_v53 = vpop.f32.mrf.mxu0  ;;  %8445 = vmatprep.mubr.msk.bf16.mxu1 %vm292_vm1, %v5373_v38  ;;  %v5376_v33 = vpack.c.bf16 %v5340_v18, %v5339_v30  ;;  %v4699_v34 = vpack.c.bf16 %v4664_v4, %v4663_v21  ;;  %v5377_v38 = vpack.c.bf16 %v5342_v24, %v5341_v23  ;;  %v5347_v30 = vld [vmem:[#allocation2 + $0x349] sm:$0xff]  ;;  %v5348_v18 = vld [vmem:[#allocation2 + $0x351] sm:$0xff]  ;;  %v5964_v4 = vld [vmem:[#allocation2 + $0x3a] sm:$0xff] }
 0x21c   :  { %v3812_v57 = vadd.f32 %v3593_v53, %v3358_v51  ;;  %4551 = vst [vmem:[#allocation3 + $0x48] sm:$0xff] %v4487_v1  ;;  %v4492_v13 = vadd.f32 %v8279_v45, %v3814_v46  ;;  %v4271_v11 = vpop.f32.mrf.mxu1  ;;  %v3366_v51 = vld [vmem:[#allocation3 + $0xa0] sm:$0xff]  ;;  %v5963_v21 = vld [vmem:[#allocation2 + $0x32] sm:$0xff] }
 0x21d   :  { %v8214_v28 = vpop.f32.mrf.mxu0  ;;  %v3373_v23 = vld [vmem:[#allocation3 + $0xd8] sm:$0xff] }
 0x21e   :  { %v3815_v25 = vadd.f32 %v8214_v28, %v3361_v62  ;;  %4556 = vst [vmem:[#allocation3 + $0x70] sm:$0xff] %v4492_v13  ;;  %v4490_v2 = vadd.f32 %v4271_v11, %v3812_v57  ;;  %v8280_v16 = vpop.f32.mrf.mxu1  ;;  %v3369_v62 = vld [vmem:[#allocation3 + $0xb8] sm:$0xff] }
 0x21f   :  { %v3596_v8 = vpop.f32.mrf.mxu0 }
 0x220   :  { %v3813_v20 = vadd.f32 %v3596_v8, %v3359_v7  ;;  %4554 = vst [vmem:[#allocation3 + $0x60] sm:$0xff] %v4490_v2  ;;  %v4493_v12 = vadd.f32 %v8280_v16, %v3815_v25  ;;  %v4274_v32 = vpop.f32.mrf.mxu1  ;;  %v3367_v7 = vld [vmem:[#allocation3 + $0xa8] sm:$0xff] }
 0x221   :  { %v8217_v14 = vpop.f32.mrf.mxu0  ;;  %8380 = vmatmul.mubr.msk.bf16.gmra.mxu0 %vm292_vm1, %v4696_v63  ;;  %v4700_v63 = vpack.c.bf16 %v4666_v47, %v4665_v43  ;;  %v5966_v47 = vld [vmem:[#allocation2 + $0x52] sm:$0xff] }
 0x222   :  { %v3818_v61 = vadd.f32 %v8217_v14, %v3364_v6  ;;  %4557 = vst [vmem:[#allocation3 + $0x78] sm:$0xff] %v4493_v12  ;;  %v4491_v17 = vadd.f32 %v4274_v32, %v3813_v20  ;;  %v8283_v37 = vpop.f32.mrf.mxu1  ;;  %8446 = vmatmul.mubr.msk.bf16.gmra.mxu1 %vm292_vm1, %v5374_v5  ;;  %8383 = vmatprep.mubr.msk.bf16.mxu0 %vm292_vm1, %v4697_v49  ;;  %v3372_v6 = vld [vmem:[#allocation3 + $0xd0] sm:$0xff] }
 0x223   :  { %v3609_v55 = vpop.f32.mrf.mxu0  ;;  %8449 = vmatprep.mubr.msk.bf16.mxu1 %vm292_vm1, %v5375_v10  ;;  %v5378_v5 = vpack.c.bf16 %v5344_v50, %v5343_v48  ;;  %v4701_v49 = vpack.c.bf16 %v4668_v56, %v4667_v54  ;;  %v5379_v10 = vpack.c.bf16 %v5346_v60, %v5345_v59  ;;  %v3374_v48 = vld [vmem:[#allocation3 + $0xe0] sm:$0xff] }
 0x224   :  { %v3816_v58 = vadd.f32 %v3609_v55, %v3362_v19  ;;  %4555 = vst [vmem:[#allocation3 + $0x68] sm:$0xff] %v4491_v17  ;;  %v4496_v22 = vadd.f32 %v8283_v37, %v3818_v61  ;;  %v4287_v0 = vpop.f32.mrf.mxu1  ;;  %v3370_v19 = vld [vmem:[#allocation3 + $0xc0] sm:$0xff] }
 0x225   :  { %v8218_v35 = vpop.f32.mrf.mxu0 }
 0x226   :  { %v3819_v29 = vadd.f32 %v8218_v35, %v3365_v26  ;;  %4560 = vst [vmem:[#allocation3 + $0x90] sm:$0xff] %v4496_v22  ;;  %v4494_v31 = vadd.f32 %v4287_v0, %v3816_v58  ;;  %v8284_v39 = vpop.f32.mrf.mxu1  ;;  %v4702_v26 = vpack.c.bf16 %v4670_v3, %v4669_v15  ;;  %v5970_v3 = vld [vmem:[#allocation2 + $0x82] sm:$0xff] }
 0x227   :  { %v3612_v52 = vpop.f32.mrf.mxu0 }
 0x228   :  { %v3817_v40 = vadd.f32 %v3612_v52, %v3363_v36  ;;  %4558 = vst [vmem:[#allocation3 + $0x80] sm:$0xff] %v4494_v31  ;;  %v4497_v9 = vadd.f32 %v8284_v39, %v3819_v29  ;;  %v4290_v44 = vpop.f32.mrf.mxu1  ;;  %v5380_v31 = vpack.c.bf16 %v5348_v18, %v5347_v30  ;;  %v6027_v39 = vpack.c.bf16 %v5964_v4, %v5963_v21  ;;  %v8612_v36 = vld [vmem:[%s10222_s0] sm:$0xff]  ;;  %v8613_v52 = vld [vmem:[%s10222_s0 + $0x8] sm:$0xff] }
 0x229   :  { %v8221_v41 = vpop.f32.mrf.mxu0  ;;  %8384 = vmatmul.mubr.msk.bf16.gmra.mxu0 %vm292_vm1, %v4698_v27  ;;  %v3378_v30 = vld [vmem:[#allocation3 + $0x100] sm:$0xff] }
 0x22a   :  { %v3822_v46 = vadd.f32 %v8221_v41, %v3368_v42  ;;  %4561 = vst [vmem:[#allocation3 + $0x98] sm:$0xff] %v4497_v9  ;;  %v4495_v1 = vadd.f32 %v4290_v44, %v3817_v40  ;;  %v8287_v45 = vpop.f32.mrf.mxu1  ;;  %8450 = vmatmul.mubr.msk.bf16.gmra.mxu1 %vm292_vm1, %v5376_v33  ;;  %8387 = vmatprep.mubr.msk.bf16.mxu0 %vm292_vm1, %v4699_v34  ;;  %v3371_v33 = vld [vmem:[#allocation3 + $0xc8] sm:$0xff]  ;;  %v3376_v42 = vld [vmem:[#allocation3 + $0xf0] sm:$0xff] }
 0x22b   :  { %v3625_v53 = vpop.f32.mrf.mxu0  ;;  %8453 = vmatprep.mubr.msk.bf16.mxu1 %vm292_vm1, %v5377_v38  ;;  %v6705_v38 = vpack.c.bf16 %v8613_v52, %v8612_v36  ;;  %v8620_v36 = vld [vmem:[%s10222_s0 + $0x40] sm:$0xff]  ;;  %v8621_v52 = vld [vmem:[%s10222_s0 + $0x48] sm:$0xff] }
 0x22c   :  { %v3820_v57 = vadd.f32 %v3625_v53, %v3366_v51  ;;  %4559 = vst [vmem:[#allocation3 + $0x88] sm:$0xff] %v4495_v1  ;;  %v4500_v13 = vadd.f32 %v8287_v45, %v3822_v46  ;;  %v4303_v11 = vpop.f32.mrf.mxu1  ;;  %v5965_v45 = vld [vmem:[#allocation2 + $0x4a] sm:$0xff]  ;;  %v5967_v51 = vld [vmem:[#allocation2 + $0x62] sm:$0xff] }
 0x22d   :  { %v8222_v28 = vpop.f32.mrf.mxu0  ;;  %v5968_v53 = vld [vmem:[#allocation2 + $0x6a] sm:$0xff]  ;;  %v6028_v59 = vpack.c.bf16 %v5966_v47, %v5965_v45  ;;  %v5974_v47 = vld [vmem:[#allocation2 + $0xb2] sm:$0xff] }
 0x22e   :  { %v3823_v25 = vadd.f32 %v8222_v28, %v3369_v62  ;;  %4564 = vst [vmem:[#allocation3 + $0xb0] sm:$0xff] %v4500_v13  ;;  %v4498_v2 = vadd.f32 %v4303_v11, %v3820_v57  ;;  %v8288_v16 = vpop.f32.mrf.mxu1  ;;  %v3377_v13 = vld [vmem:[#allocation3 + $0xf8] sm:$0xff]  ;;  %v5973_v45 = vld [vmem:[#allocation2 + $0xaa] sm:$0xff] }
 0x22f   :  { %v3628_v8 = vpop.f32.mrf.mxu0 }
 0x230   :  { %v3821_v20 = vadd.f32 %v3628_v8, %v3367_v7  ;;  %4562 = vst [vmem:[#allocation3 + $0xa0] sm:$0xff] %v4498_v2  ;;  %v4501_v12 = vadd.f32 %v8288_v16, %v3823_v25  ;;  %v4306_v32 = vpop.f32.mrf.mxu1  ;;  %v8615_v25 = vld [vmem:[%s10222_s0 + $0x18] sm:$0xff]  ;;  %v6029_v16 = vpack.c.bf16 %v5968_v53, %v5967_v51  ;;  %v8616_v7 = vld [vmem:[%s10222_s0 + $0x20] sm:$0xff]  ;;  %v8617_v8 = vld [vmem:[%s10222_s0 + $0x28] sm:$0xff] }
 0x231   :  { %v8225_v14 = vpop.f32.mrf.mxu0  ;;  %8388 = vmatmul.mubr.msk.bf16.gmra.mxu0 %vm292_vm1, %v4700_v63  ;;  %v8614_v63 = vld [vmem:[%s10222_s0 + $0x10] sm:$0xff]  ;;  %v5975_v51 = vld [vmem:[#allocation2 + $0xc2] sm:$0xff] }
 0x232   :  { %v3826_v61 = vadd.f32 %v8225_v14, %v3372_v6  ;;  %4565 = vst [vmem:[#allocation3 + $0xb8] sm:$0xff] %v4501_v12  ;;  %v4499_v17 = vadd.f32 %v4306_v32, %v3821_v20  ;;  %v8291_v37 = vpop.f32.mrf.mxu1  ;;  %8454 = vmatmul.mubr.msk.bf16.gmra.mxu1 %vm292_vm1, %v5378_v5  ;;  %8391 = vmatprep.mubr.msk.bf16.mxu0 %vm292_vm1, %v4701_v49  ;;  %v3375_v5 = vld [vmem:[#allocation3 + $0xe8] sm:$0xff]  ;;  %v3380_v6 = vld [vmem:[#allocation3 + $0x110] sm:$0xff] }
 0x233   :  { %v3641_v55 = vpop.f32.mrf.mxu0  ;;  %8457 = vmatprep.mubr.msk.bf16.mxu1 %vm292_vm1, %v5379_v10  ;;  %v6706_v2 = vpack.c.bf16 %v8615_v25, %v8614_v63  ;;  %v6707_v10 = vpack.c.bf16 %v8617_v8, %v8616_v7  ;;  %v5976_v53 = vld [vmem:[#allocation2 + $0xca] sm:$0xff]  ;;  %v8623_v25 = vld [vmem:[%s10222_s0 + $0x58] sm:$0xff]  ;;  %v8624_v7 = vld [vmem:[%s10222_s0 + $0x60] sm:$0xff] }
 0x234   :  { %v3824_v58 = vadd.f32 %v3641_v55, %v3370_v19  ;;  %4563 = vst [vmem:[#allocation3 + $0xa8] sm:$0xff] %v4499_v17  ;;  %v4504_v22 = vadd.f32 %v8291_v37, %v3826_v61  ;;  %v4319_v0 = vpop.f32.mrf.mxu1  ;;  %v5969_v37 = vld [vmem:[#allocation2 + $0x7a] sm:$0xff]  ;;  %v5971_v19 = vld [vmem:[#allocation2 + $0x92] sm:$0xff]  ;;  %v8625_v8 = vld [vmem:[%s10222_s0 + $0x68] sm:$0xff] }
 0x235   :  { %v8226_v24 = vpop.f32.mrf.mxu0  ;;  %v5972_v55 = vld [vmem:[#allocation2 + $0x9a] sm:$0xff]  ;;  %v8622_v63 = vld [vmem:[%s10222_s0 + $0x50] sm:$0xff] }
 0x236   :  { %v3827_v35 = vadd.f32 %v8226_v24, %v3373_v23  ;;  %4568 = vst [vmem:[#allocation3 + $0xd0] sm:$0xff] %v4504_v22  ;;  %v4502_v27 = vadd.f32 %v4319_v0, %v3824_v58  ;;  %v8292_v29 = vpop.f32.mrf.mxu1  ;;  %v3381_v22 = vld [vmem:[#allocation3 + $0x118] sm:$0xff]  ;;  %v6030_v23 = vpack.c.bf16 %v5970_v3, %v5969_v37  ;;  %v5978_v3 = vld [vmem:[#allocation2 + $0xe2] sm:$0xff] }
 0x237   :  { %v3644_v34 = vpop.f32.mrf.mxu0  ;;  %v5977_v37 = vld [vmem:[#allocation2 + $0xda] sm:$0xff] }
 0x238   :  { %v3825_v40 = vadd.f32 %v3644_v34, %v3371_v33  ;;  %4566 = vst [vmem:[#allocation3 + $0xc0] sm:$0xff] %v4502_v27  ;;  %v4505_v9 = vadd.f32 %v8292_v29, %v3827_v35  ;;  %v4322_v44 = vpop.f32.mrf.mxu1  ;;  %v8618_v27 = vld [vmem:[%s10222_s0 + $0x30] sm:$0xff]  ;;  %v8619_v29 = vld [vmem:[%s10222_s0 + $0x38] sm:$0xff]  ;;  %v3379_v33 = vld [vmem:[#allocation3 + $0x108] sm:$0xff] }
 0x239   :  { %v8229_v41 = vpop.f32.mrf.mxu0  ;;  %8392 = vmatmul.mubr.msk.bf16.gmra.mxu0 %vm292_vm1, %v4702_v26 }
 0x23a   :  { %v3830_v43 = vadd.f32 %v8229_v41, %v3376_v42  ;;  %4569 = vst [vmem:[#allocation3 + $0xd8] sm:$0xff] %v4505_v9  ;;  %v4503_v46 = vadd.f32 %v4322_v44, %v3825_v40  ;;  %v8295_v1 = vpop.f32.mrf.mxu1  ;;  %8458 = vmatmul.mubr.msk.bf16.gmra.mxu1 %vm292_vm1, %v5380_v31  ;;  %8463 = vmatprep.mubr.msk.bf16.mxu0 %vm292_vm1, %v6027_v39  ;;  %v3384_v42 = vld [vmem:[#allocation3 + $0x130] sm:$0xff] }
 0x23b   :  { %v3657_v50 = vpop.f32.mrf.mxu0  ;;  %8529 = vmatprep.mubr.msk.bf16.mxu1 %vm292_vm1, %v6705_v38  ;;  %v6708_v31 = vpack.c.bf16 %v8619_v29, %v8618_v27  ;;  %v6031_v39 = vpack.c.bf16 %v5972_v55, %v5971_v19  ;;  %v6709_v38 = vpack.c.bf16 %v8621_v52, %v8620_v36  ;;  %v5979_v19 = vld [vmem:[#allocation2 + $0xf2] sm:$0xff]  ;;  %v5980_v55 = vld [vmem:[#allocation2 + $0xfa] sm:$0xff]  ;;  %v8629_v52 = vld [vmem:[%s10222_s0 + $0x88] sm:$0xff] }
 0x23c   :  { %v3828_v54 = vadd.f32 %v3657_v50, %v3374_v48  ;;  %4567 = vst [vmem:[#allocation3 + $0xc8] sm:$0xff] %v4503_v46  ;;  %v4508_v56 = vadd.f32 %v8295_v1, %v3830_v43  ;;  %v4335_v57 = vpop.f32.mrf.mxu1  ;;  %v3382_v48 = vld [vmem:[#allocation3 + $0x120] sm:$0xff]  ;;  %v8626_v27 = vld [vmem:[%s10222_s0 + $0x70] sm:$0xff]  ;;  %v8627_v29 = vld [vmem:[%s10222_s0 + $0x78] sm:$0xff] }
 0x23d   :  { %v8230_v11 = vpop.f32.mrf.mxu0  ;;  %v8628_v36 = vld [vmem:[%s10222_s0 + $0x80] sm:$0xff] }
 0x23e   :  { %v3831_v60 = vadd.f32 %v8230_v11, %v3377_v13  ;;  %4572 = vst [vmem:[#allocation3 + $0xf0] sm:$0xff] %v4508_v56  ;;  %v4506_v62 = vadd.f32 %v4335_v57, %v3828_v54  ;;  %v8296_v28 = vpop.f32.mrf.mxu1  ;;  %v3385_v13 = vld [vmem:[#allocation3 + $0x138] sm:$0xff] }
 0x23f   :  { %v3660_v49 = vpop.f32.mrf.mxu0 }
 0x240   :  { %v3829_v20 = vadd.f32 %v3660_v49, %v3375_v5  ;;  %4570 = vst [vmem:[#allocation3 + $0xe0] sm:$0xff] %v4506_v62  ;;  %v4509_v12 = vadd.f32 %v8296_v28, %v3831_v60  ;;  %v4338_v32 = vpop.f32.mrf.mxu1  ;;  %v3383_v5 = vld [vmem:[#allocation3 + $0x128] sm:$0xff] }
 0x241   :  { %v8233_v14 = vpop.f32.mrf.mxu0  ;;  %8464 = vmatmul.mubr.msk.bf16.vlgmr.msra.gmra.mxu0 %vm292_vm1, %v6028_v59  ;;  %v6032_v59 = vpack.c.bf16 %v5974_v47, %v5973_v45  ;;  %v5981_v45 = vld [vmem:[#allocation2 + $0x10a] sm:$0xff]  ;;  %v5982_v47 = vld [vmem:[#allocation2 + $0x112] sm:$0xff] }
 0x242   :  { %v3834_v15 = vadd.f32 %v8233_v14, %v3380_v6  ;;  %4573 = vst [vmem:[#allocation3 + $0xf8] sm:$0xff] %v4509_v12  ;;  %v4507_v61 = vadd.f32 %v4338_v32, %v3829_v20  ;;  %v8299_v17 = vpop.f32.mrf.mxu1  ;;  %8530 = vmatmul.mubr.msk.bf16.vlgmr.msra.gmra.mxu1 %vm292_vm1, %v6706_v2  ;;  %8467 = vmatprep.mubr.msk.bf16.mxu0 %vm292_vm1, %v6029_v16  ;;  %v3388_v6 = vld [vmem:[#allocation3 + $0x150] sm:$0xff] }
 0x243   :  { %v3673_v18 = vpop.f32.mrf.mxu0  ;;  %8533 = vmatprep.mubr.msk.bf16.mxu1 %vm292_vm1, %v6707_v10  ;;  %v6710_v2 = vpack.c.bf16 %v8623_v25, %v8622_v63  ;;  %v6033_v16 = vpack.c.bf16 %v5976_v53, %v5975_v51  ;;  %v6711_v10 = vpack.c.bf16 %v8625_v8, %v8624_v7  ;;  %v5983_v51 = vld [vmem:[#allocation2 + $0x122] sm:$0xff]  ;;  %v5984_v53 = vld [vmem:[#allocation2 + $0x12a] sm:$0xff]  ;;  %v8631_v25 = vld [vmem:[%s10222_s0 + $0x98] sm:$0xff] }
 0x244   :  { %v3832_v21 = vadd.f32 %v3673_v18, %v3378_v30  ;;  %4571 = vst [vmem:[#allocation3 + $0xe8] sm:$0xff] %v4507_v61  ;;  %v4512_v4 = vadd.f32 %v8299_v17, %v3834_v15  ;;  %v4351_v58 = vpop.f32.mrf.mxu1  ;;  %v3386_v30 = vld [vmem:[#allocation3 + $0x140] sm:$0xff]  ;;  %v8630_v63 = vld [vmem:[%s10222_s0 + $0x90] sm:$0xff]  ;;  %v8633_v8 = vld [vmem:[%s10222_s0 + $0xa8] sm:$0xff] }
 0x245   :  { %v8234_v0 = vpop.f32.mrf.mxu0  ;;  %v8632_v7 = vld [vmem:[%s10222_s0 + $0xa0] sm:$0xff] }
 0x246   :  { %v3835_v24 = vadd.f32 %v8234_v0, %v3381_v22  ;;  %4576 = vst [vmem:[#allocation3 + $0x110] sm:$0xff] %v4512_v4  ;;  %v4510_v26 = vadd.f32 %v4351_v58, %v3832_v21  ;;  %v8300_v35 = vpop.f32.mrf.mxu1  ;;  %v3389_v22 = vld [vmem:[#allocation3 + $0x158] sm:$0xff] }
 0x247   :  { %v3676_v34 = vpop.f32.mrf.mxu0 }
 0x248   :  { %v3833_v40 = vadd.f32 %v3676_v34, %v3379_v33  ;;  %4574 = vst [vmem:[#allocation3 + $0x100] sm:$0xff] %v4510_v26  ;;  %v4513_v9 = vadd.f32 %v8300_v35, %v3835_v24  ;;  %v4354_v44 = vpop.f32.mrf.mxu1  ;;  %v3387_v33 = vld [vmem:[#allocation3 + $0x148] sm:$0xff] }
 0x249   :  { %v8237_v41 = vpop.f32.mrf.mxu0  ;;  %8468 = vmatmul.mubr.msk.bf16.gmra.mxu0 %vm292_vm1, %v6030_v23  ;;  %v6034_v23 = vpack.c.bf16 %v5978_v3, %v5977_v37  ;;  %v5985_v37 = vld [vmem:[#allocation2 + $0x13a] sm:$0xff]  ;;  %v5986_v3 = vld [vmem:[#allocation2 + $0x142] sm:$0xff] }
 0x24a   :  { %v3838_v43 = vadd.f32 %v8237_v41, %v3384_v42  ;;  %4577 = vst [vmem:[#allocation3 + $0x118] sm:$0xff] %v4513_v9  ;;  %v4511_v46 = vadd.f32 %v4354_v44, %v3833_v40  ;;  %v8303_v1 = vpop.f32.mrf.mxu1  ;;  %8534 = vmatmul.mubr.msk.bf16.gmra.mxu1 %vm292_vm1, %v6708_v31  ;;  %8471 = vmatprep.mubr.msk.bf16.mxu0 %vm292_vm1, %v6031_v39  ;;  %v3392_v42 = vld [vmem:[#allocation3 + $0x170] sm:$0xff] }
 0x24b   :  { %v3689_v50 = vpop.f32.mrf.mxu0  ;;  %8537 = vmatprep.mubr.msk.bf16.mxu1 %vm292_vm1, %v6709_v38  ;;  %v6712_v31 = vpack.c.bf16 %v8627_v29, %v8626_v27  ;;  %v6035_v39 = vpack.c.bf16 %v5980_v55, %v5979_v19  ;;  %v6713_v38 = vpack.c.bf16 %v8629_v52, %v8628_v36  ;;  %v5987_v19 = vld [vmem:[#allocation2 + $0x152] sm:$0xff]  ;;  %v5988_v55 = vld [vmem:[#allocation2 + $0x15a] sm:$0xff]  ;;  %v8637_v52 = vld [vmem:[%s10222_s0 + $0xc8] sm:$0xff] }
 0x24c   :  { %v3836_v54 = vadd.f32 %v3689_v50, %v3382_v48  ;;  %4575 = vst [vmem:[#allocation3 + $0x108] sm:$0xff] %v4511_v46  ;;  %v4516_v56 = vadd.f32 %v8303_v1, %v3838_v43  ;;  %v4367_v57 = vpop.f32.mrf.mxu1  ;;  %v3390_v48 = vld [vmem:[#allocation3 + $0x160] sm:$0xff]  ;;  %v8634_v27 = vld [vmem:[%s10222_s0 + $0xb0] sm:$0xff]  ;;  %v8635_v29 = vld [vmem:[%s10222_s0 + $0xb8] sm:$0xff] }
 0x24d   :  { %v8238_v11 = vpop.f32.mrf.mxu0  ;;  %v8636_v36 = vld [vmem:[%s10222_s0 + $0xc0] sm:$0xff] }
 0x24e   :  { %v3839_v60 = vadd.f32 %v8238_v11, %v3385_v13  ;;  %4580 = vst [vmem:[#allocation3 + $0x130] sm:$0xff] %v4516_v56  ;;  %v4514_v62 = vadd.f32 %v4367_v57, %v3836_v54  ;;  %v8304_v28 = vpop.f32.mrf.mxu1  ;;  %v3393_v13 = vld [vmem:[#allocation3 + $0x178] sm:$0xff] }
 0x24f   :  { %v3692_v49 = vpop.f32.mrf.mxu0 }
 0x250   :  { %v3837_v20 = vadd.f32 %v3692_v49, %v3383_v5  ;;  %4578 = vst [vmem:[#allocation3 + $0x120] sm:$0xff] %v4514_v62  ;;  %v4517_v12 = vadd.f32 %v8304_v28, %v3839_v60  ;;  %v4370_v32 = vpop.f32.mrf.mxu1  ;;  %v3391_v5 = vld [vmem:[#allocation3 + $0x168] sm:$0xff] }
 0x251   :  { %v8241_v14 = vpop.f32.mrf.mxu0  ;;  %8472 = vmatmul.mubr.msk.bf16.gmra.mxu0 %vm292_vm1, %v6032_v59  ;;  %v6036_v59 = vpack.c.bf16 %v5982_v47, %v5981_v45  ;;  %v5989_v45 = vld [vmem:[#allocation2 + $0x16a] sm:$0xff]  ;;  %v5990_v47 = vld [vmem:[#allocation2 + $0x172] sm:$0xff] }
 0x252   :  { %v3842_v15 = vadd.f32 %v8241_v14, %v3388_v6  ;;  %4581 = vst [vmem:[#allocation3 + $0x138] sm:$0xff] %v4517_v12  ;;  %v4515_v61 = vadd.f32 %v4370_v32, %v3837_v20  ;;  %v8307_v17 = vpop.f32.mrf.mxu1  ;;  %8538 = vmatmul.mubr.msk.bf16.gmra.mxu1 %vm292_vm1, %v6710_v2  ;;  %8475 = vmatprep.mubr.msk.bf16.mxu0 %vm292_vm1, %v6033_v16  ;;  %v3396_v6 = vld [vmem:[#allocation3 + $0x190] sm:$0xff] }
 0x253   :  { %v3705_v18 = vpop.f32.mrf.mxu0  ;;  %8541 = vmatprep.mubr.msk.bf16.mxu1 %vm292_vm1, %v6711_v10  ;;  %v6714_v2 = vpack.c.bf16 %v8631_v25, %v8630_v63  ;;  %v6037_v16 = vpack.c.bf16 %v5984_v53, %v5983_v51  ;;  %v6715_v10 = vpack.c.bf16 %v8633_v8, %v8632_v7  ;;  %v5991_v51 = vld [vmem:[#allocation2 + $0x182] sm:$0xff]  ;;  %v5992_v53 = vld [vmem:[#allocation2 + $0x18a] sm:$0xff]  ;;  %v8639_v25 = vld [vmem:[%s10222_s0 + $0xd8] sm:$0xff] }
 0x254   :  { %v3840_v21 = vadd.f32 %v3705_v18, %v3386_v30  ;;  %4579 = vst [vmem:[#allocation3 + $0x128] sm:$0xff] %v4515_v61  ;;  %v4520_v4 = vadd.f32 %v8307_v17, %v3842_v15  ;;  %v4383_v58 = vpop.f32.mrf.mxu1  ;;  %v3394_v30 = vld [vmem:[#allocation3 + $0x180] sm:$0xff]  ;;  %v8638_v63 = vld [vmem:[%s10222_s0 + $0xd0] sm:$0xff]  ;;  %v8641_v8 = vld [vmem:[%s10222_s0 + $0xe8] sm:$0xff] }
 0x255   :  { %v8242_v0 = vpop.f32.mrf.mxu0  ;;  %v8640_v7 = vld [vmem:[%s10222_s0 + $0xe0] sm:$0xff] }
 0x256   :  { %v3843_v24 = vadd.f32 %v8242_v0, %v3389_v22  ;;  %4584 = vst [vmem:[#allocation3 + $0x150] sm:$0xff] %v4520_v4  ;;  %v4518_v26 = vadd.f32 %v4383_v58, %v3840_v21  ;;  %v8308_v35 = vpop.f32.mrf.mxu1  ;;  %v3397_v22 = vld [vmem:[#allocation3 + $0x198] sm:$0xff] }
 0x257   :  { %v3708_v34 = vpop.f32.mrf.mxu0 }
 0x258   :  { %v3841_v40 = vadd.f32 %v3708_v34, %v3387_v33  ;;  %4582 = vst [vmem:[#allocation3 + $0x140] sm:$0xff] %v4518_v26  ;;  %v4521_v9 = vadd.f32 %v8308_v35, %v3843_v24  ;;  %v4386_v44 = vpop.f32.mrf.mxu1  ;;  %v3395_v33 = vld [vmem:[#allocation3 + $0x188] sm:$0xff] }
 0x259   :  { %v8245_v41 = vpop.f32.mrf.mxu0  ;;  %8476 = vmatmul.mubr.msk.bf16.gmra.mxu0 %vm292_vm1, %v6034_v23  ;;  %v6038_v23 = vpack.c.bf16 %v5986_v3, %v5985_v37  ;;  %v5993_v37 = vld [vmem:[#allocation2 + $0x19a] sm:$0xff]  ;;  %v5994_v3 = vld [vmem:[#allocation2 + $0x1a2] sm:$0xff] }
 0x25a   :  { %v3846_v43 = vadd.f32 %v8245_v41, %v3392_v42  ;;  %4585 = vst [vmem:[#allocation3 + $0x158] sm:$0xff] %v4521_v9  ;;  %v4519_v46 = vadd.f32 %v4386_v44, %v3841_v40  ;;  %v8311_v1 = vpop.f32.mrf.mxu1  ;;  %8542 = vmatmul.mubr.msk.bf16.gmra.mxu1 %vm292_vm1, %v6712_v31  ;;  %8479 = vmatprep.mubr.msk.bf16.mxu0 %vm292_vm1, %v6035_v39  ;;  %v3400_v42 = vld [vmem:[#allocation3 + $0x1b0] sm:$0xff] }
 0x25b   :  { %v3721_v50 = vpop.f32.mrf.mxu0  ;;  %8545 = vmatprep.mubr.msk.bf16.mxu1 %vm292_vm1, %v6713_v38  ;;  %v6716_v31 = vpack.c.bf16 %v8635_v29, %v8634_v27  ;;  %v6039_v39 = vpack.c.bf16 %v5988_v55, %v5987_v19  ;;  %v6717_v38 = vpack.c.bf16 %v8637_v52, %v8636_v36  ;;  %v5995_v19 = vld [vmem:[#allocation2 + $0x1e2] sm:$0xff]  ;;  %v5996_v55 = vld [vmem:[#allocation2 + $0x1ea] sm:$0xff]  ;;  %v8643_v29 = vld [vmem:[%s10222_s0 + $0xf8] sm:$0xff] }
 0x25c   :  { %v3844_v54 = vadd.f32 %v3721_v50, %v3390_v48  ;;  %4583 = vst [vmem:[#allocation3 + $0x148] sm:$0xff] %v4519_v46  ;;  %v4524_v56 = vadd.f32 %v8311_v1, %v3846_v43  ;;  %v4399_v57 = vpop.f32.mrf.mxu1  ;;  %v3398_v48 = vld [vmem:[#allocation3 + $0x1a0] sm:$0xff]  ;;  %v8642_v27 = vld [vmem:[%s10222_s0 + $0xf0] sm:$0xff]  ;;  %v8645_v52 = vld [vmem:[%s10222_s0 + $0x108] sm:$0xff] }
 0x25d   :  { %v8246_v11 = vpop.f32.mrf.mxu0  ;;  %v8644_v36 = vld [vmem:[%s10222_s0 + $0x100] sm:$0xff] }
 0x25e   :  { %v3847_v60 = vadd.f32 %v8246_v11, %v3393_v13  ;;  %4588 = vst [vmem:[#allocation3 + $0x170] sm:$0xff] %v4524_v56  ;;  %v4522_v62 = vadd.f32 %v4399_v57, %v3844_v54  ;;  %v8312_v28 = vpop.f32.mrf.mxu1  ;;  %v3401_v13 = vld [vmem:[#allocation3 + $0x1b8] sm:$0xff] }
 0x25f   :  { %v3724_v49 = vpop.f32.mrf.mxu0 }
 0x260   :  { %v3845_v20 = vadd.f32 %v3724_v49, %v3391_v5  ;;  %4586 = vst [vmem:[#allocation3 + $0x160] sm:$0xff] %v4522_v62  ;;  %v4525_v12 = vadd.f32 %v8312_v28, %v3847_v60  ;;  %v4402_v32 = vpop.f32.mrf.mxu1  ;;  %v3399_v5 = vld [vmem:[#allocation3 + $0x1a8] sm:$0xff] }
 0x261   :  { %v8249_v14 = vpop.f32.mrf.mxu0  ;;  %8480 = vmatmul.mubr.msk.bf16.gmra.mxu0 %vm292_vm1, %v6036_v59  ;;  %v6040_v59 = vpack.c.bf16 %v5990_v47, %v5989_v45  ;;  %v5997_v45 = vld [vmem:[#allocation2 + $0x1fa] sm:$0xff]  ;;  %v5998_v47 = vld [vmem:[#allocation2 + $0x202] sm:$0xff] }
 0x262   :  { %v3850_v15 = vadd.f32 %v8249_v14, %v3396_v6  ;;  %4589 = vst [vmem:[#allocation3 + $0x178] sm:$0xff] %v4525_v12  ;;  %v4523_v61 = vadd.f32 %v4402_v32, %v3845_v20  ;;  %v8315_v17 = vpop.f32.mrf.mxu1  ;;  %8546 = vmatmul.mubr.msk.bf16.gmra.mxu1 %vm292_vm1, %v6714_v2  ;;  %8483 = vmatprep.mubr.msk.bf16.mxu0 %vm292_vm1, %v6037_v16  ;;  %v3404_v6 = vld [vmem:[#allocation3 + $0x1d0] sm:$0xff] }
 0x263   :  { %v3737_v18 = vpop.f32.mrf.mxu0  ;;  %8549 = vmatprep.mubr.msk.bf16.mxu1 %vm292_vm1, %v6715_v10  ;;  %v6718_v2 = vpack.c.bf16 %v8639_v25, %v8638_v63  ;;  %v6041_v16 = vpack.c.bf16 %v5992_v53, %v5991_v51  ;;  %v6719_v10 = vpack.c.bf16 %v8641_v8, %v8640_v7  ;;  %v5999_v51 = vld [vmem:[#allocation2 + $0x212] sm:$0xff]  ;;  %v6000_v53 = vld [vmem:[#allocation2 + $0x21a] sm:$0xff]  ;;  %v8649_v8 = vld [vmem:[%s10222_s0 + $0x128] sm:$0xff] }
 0x264   :  { %v3848_v21 = vadd.f32 %v3737_v18, %v3394_v30  ;;  %4587 = vst [vmem:[#allocation3 + $0x168] sm:$0xff] %v4523_v61  ;;  %v4528_v4 = vadd.f32 %v8315_v17, %v3850_v15  ;;  %v4415_v58 = vpop.f32.mrf.mxu1  ;;  %v3402_v30 = vld [vmem:[#allocation3 + $0x1c0] sm:$0xff]  ;;  %v8646_v63 = vld [vmem:[%s10222_s0 + $0x110] sm:$0xff]  ;;  %v8647_v25 = vld [vmem:[%s10222_s0 + $0x118] sm:$0xff] }
 0x265   :  { %v8250_v0 = vpop.f32.mrf.mxu0  ;;  %v8648_v7 = vld [vmem:[%s10222_s0 + $0x120] sm:$0xff] }
 0x266   :  { %v3851_v24 = vadd.f32 %v8250_v0, %v3397_v22  ;;  %4592 = vst [vmem:[#allocation3 + $0x190] sm:$0xff] %v4528_v4  ;;  %v4526_v26 = vadd.f32 %v4415_v58, %v3848_v21  ;;  %v8316_v35 = vpop.f32.mrf.mxu1  ;;  %v3405_v22 = vld [vmem:[#allocation3 + $0x1d8] sm:$0xff] }
 0x267   :  { %v3740_v34 = vpop.f32.mrf.mxu0 }
 0x268   :  { %v3849_v40 = vadd.f32 %v3740_v34, %v3395_v33  ;;  %4590 = vst [vmem:[#allocation3 + $0x180] sm:$0xff] %v4526_v26  ;;  %v4529_v9 = vadd.f32 %v8316_v35, %v3851_v24  ;;  %v4418_v44 = vpop.f32.mrf.mxu1  ;;  %v3403_v33 = vld [vmem:[#allocation3 + $0x1c8] sm:$0xff] }
 0x269   :  { %v8253_v41 = vpop.f32.mrf.mxu0  ;;  %8484 = vmatmul.mubr.msk.bf16.gmra.mxu0 %vm292_vm1, %v6038_v23  ;;  %v6042_v23 = vpack.c.bf16 %v5994_v3, %v5993_v37  ;;  %v6001_v37 = vld [vmem:[#allocation2 + $0x22a] sm:$0xff]  ;;  %v6002_v3 = vld [vmem:[#allocation2 + $0x232] sm:$0xff] }
 0x26a   :  { %v3854_v43 = vadd.f32 %v8253_v41, %v3400_v42  ;;  %4593 = vst [vmem:[#allocation3 + $0x198] sm:$0xff] %v4529_v9  ;;  %v4527_v46 = vadd.f32 %v4418_v44, %v3849_v40  ;;  %v8319_v1 = vpop.f32.mrf.mxu1  ;;  %8550 = vmatmul.mubr.msk.bf16.gmra.mxu1 %vm292_vm1, %v6716_v31  ;;  %8487 = vmatprep.mubr.msk.bf16.mxu0 %vm292_vm1, %v6039_v39  ;;  %v3408_v42 = vld [vmem:[#allocation3 + $0x1f0] sm:$0xff] }
 0x26b   :  { %v3753_v50 = vpop.f32.mrf.mxu0  ;;  %8553 = vmatprep.mubr.msk.bf16.mxu1 %vm292_vm1, %v6717_v38  ;;  %v6720_v31 = vpack.c.bf16 %v8643_v29, %v8642_v27  ;;  %v6043_v39 = vpack.c.bf16 %v5996_v55, %v5995_v19  ;;  %v6721_v38 = vpack.c.bf16 %v8645_v52, %v8644_v36  ;;  %v6003_v19 = vld [vmem:[#allocation2 + $0x242] sm:$0xff]  ;;  %v6004_v55 = vld [vmem:[#allocation2 + $0x24a] sm:$0xff]  ;;  %v8651_v29 = vld [vmem:[%s10222_s0 + $0x138] sm:$0xff] }
 0x26c   :  { %v3852_v54 = vadd.f32 %v3753_v50, %v3398_v48  ;;  %4591 = vst [vmem:[#allocation3 + $0x188] sm:$0xff] %v4527_v46  ;;  %v4532_v56 = vadd.f32 %v8319_v1, %v3854_v43  ;;  %v4431_v57 = vpop.f32.mrf.mxu1  ;;  %v3406_v48 = vld [vmem:[#allocation3 + $0x1e0] sm:$0xff]  ;;  %v8650_v27 = vld [vmem:[%s10222_s0 + $0x130] sm:$0xff]  ;;  %v8653_v52 = vld [vmem:[%s10222_s0 + $0x148] sm:$0xff] }
 0x26d   :  { %v8254_v11 = vpop.f32.mrf.mxu0  ;;  %v8652_v36 = vld [vmem:[%s10222_s0 + $0x140] sm:$0xff] }
 0x26e   :  { %v3855_v60 = vadd.f32 %v8254_v11, %v3401_v13  ;;  %4596 = vst [vmem:[#allocation3 + $0x1b0] sm:$0xff] %v4532_v56  ;;  %v4530_v62 = vadd.f32 %v4431_v57, %v3852_v54  ;;  %v8320_v28 = vpop.f32.mrf.mxu1  ;;  %v3409_v13 = vld [vmem:[#allocation3 + $0x1f8] sm:$0xff] }
 0x26f   :  { %v3756_v49 = vpop.f32.mrf.mxu0 }
 0x270   :  { %v3853_v20 = vadd.f32 %v3756_v49, %v3399_v5  ;;  %4594 = vst [vmem:[#allocation3 + $0x1a0] sm:$0xff] %v4530_v62  ;;  %v4533_v12 = vadd.f32 %v8320_v28, %v3855_v60  ;;  %v4434_v32 = vpop.f32.mrf.mxu1  ;;  %v3407_v5 = vld [vmem:[#allocation3 + $0x1e8] sm:$0xff] }
 0x271   :  { %v8257_v14 = vpop.f32.mrf.mxu0  ;;  %8488 = vmatmul.mubr.msk.bf16.gmra.mxu0 %vm292_vm1, %v6040_v59  ;;  %v6044_v59 = vpack.c.bf16 %v5998_v47, %v5997_v45  ;;  %v6005_v45 = vld [vmem:[#allocation2 + $0x25a] sm:$0xff]  ;;  %v6006_v47 = vld [vmem:[#allocation2 + $0x262] sm:$0xff] }
 0x272   :  { %v3858_v15 = vadd.f32 %v8257_v14, %v3404_v6  ;;  %4597 = vst [vmem:[#allocation3 + $0x1b8] sm:$0xff] %v4533_v12  ;;  %v4531_v61 = vadd.f32 %v4434_v32, %v3853_v20  ;;  %v8323_v17 = vpop.f32.mrf.mxu1  ;;  %8554 = vmatmul.mubr.msk.bf16.gmra.mxu1 %vm292_vm1, %v6718_v2  ;;  %8491 = vmatprep.mubr.msk.bf16.mxu0 %vm292_vm1, %v6041_v16  ;;  %v4705_v6 = vld [vmem:[#allocation3 + $0x10] sm:$0xff] }
 0x273   :  { %v3769_v18 = vpop.f32.mrf.mxu0  ;;  %8557 = vmatprep.mubr.msk.bf16.mxu1 %vm292_vm1, %v6719_v10  ;;  %v6722_v2 = vpack.c.bf16 %v8647_v25, %v8646_v63  ;;  %v6045_v16 = vpack.c.bf16 %v6000_v53, %v5999_v51  ;;  %v6723_v10 = vpack.c.bf16 %v8649_v8, %v8648_v7  ;;  %v6007_v51 = vld [vmem:[#allocation2 + $0x272] sm:$0xff]  ;;  %v6008_v53 = vld [vmem:[#allocation2 + $0x27a] sm:$0xff]  ;;  %v8657_v8 = vld [vmem:[%s10222_s0 + $0x168] sm:$0xff] }
 0x274   :  { %v3856_v21 = vadd.f32 %v3769_v18, %v3402_v30  ;;  %4595 = vst [vmem:[#allocation3 + $0x1a8] sm:$0xff] %v4531_v61  ;;  %v4536_v4 = vadd.f32 %v8323_v17, %v3858_v15  ;;  %v4447_v58 = vpop.f32.mrf.mxu1  ;;  %v4703_v30 = vld [vmem:[#allocation3] sm:$0xff]  ;;  %v8654_v63 = vld [vmem:[%s10222_s0 + $0x150] sm:$0xff]  ;;  %v8655_v25 = vld [vmem:[%s10222_s0 + $0x158] sm:$0xff] }
 0x275   :  { %v8258_v0 = vpop.f32.mrf.mxu0  ;;  %v8656_v7 = vld [vmem:[%s10222_s0 + $0x160] sm:$0xff] }
 0x276   :  { %v3859_v24 = vadd.f32 %v8258_v0, %v3405_v22  ;;  %4600 = vst [vmem:[#allocation3 + $0x1d0] sm:$0xff] %v4536_v4  ;;  %v4534_v26 = vadd.f32 %v4447_v58, %v3856_v21  ;;  %v8324_v35 = vpop.f32.mrf.mxu1  ;;  %v4706_v22 = vld [vmem:[#allocation3 + $0x18] sm:$0xff] }
 0x277   :  { %v3772_v34 = vpop.f32.mrf.mxu0 }
 0x278   :  { %v3857_v40 = vadd.f32 %v3772_v34, %v3403_v33  ;;  %4598 = vst [vmem:[#allocation3 + $0x1c0] sm:$0xff] %v4534_v26  ;;  %v4537_v9 = vadd.f32 %v8324_v35, %v3859_v24  ;;  %v4450_v44 = vpop.f32.mrf.mxu1  ;;  %v4704_v33 = vld [vmem:[#allocation3 + $0x8] sm:$0xff] }
 0x279   :  { %v8261_v41 = vpop.f32.mrf.mxu0  ;;  %8492 = vmatmul.mubr.msk.bf16.gmra.mxu0 %vm292_vm1, %v6042_v23  ;;  %v6046_v23 = vpack.c.bf16 %v6002_v3, %v6001_v37  ;;  %v6009_v37 = vld [vmem:[#allocation2 + $0x28a] sm:$0xff]  ;;  %v6010_v3 = vld [vmem:[#allocation2 + $0x292] sm:$0xff] }
 0x27a   :  { %v3862_v43 = vadd.f32 %v8261_v41, %v3408_v42  ;;  %4601 = vst [vmem:[#allocation3 + $0x1d8] sm:$0xff] %v4537_v9  ;;  %v4535_v46 = vadd.f32 %v4450_v44, %v3857_v40  ;;  %v8327_v1 = vpop.f32.mrf.mxu1  ;;  %8558 = vmatmul.mubr.msk.bf16.gmra.mxu1 %vm292_vm1, %v6720_v31  ;;  %8495 = vmatprep.mubr.msk.bf16.mxu0 %vm292_vm1, %v6043_v39  ;;  %v4709_v42 = vld [vmem:[#allocation3 + $0x30] sm:$0xff] }
 0x27b   :  { %v3785_v50 = vpop.f32.mrf.mxu0  ;;  %8561 = vmatprep.mubr.msk.bf16.mxu1 %vm292_vm1, %v6721_v38  ;;  %v6724_v31 = vpack.c.bf16 %v8651_v29, %v8650_v27  ;;  %v6047_v39 = vpack.c.bf16 %v6004_v55, %v6003_v19  ;;  %v6725_v38 = vpack.c.bf16 %v8653_v52, %v8652_v36  ;;  %v6011_v19 = vld [vmem:[#allocation2 + $0x2a2] sm:$0xff]  ;;  %v6012_v55 = vld [vmem:[#allocation2 + $0x2aa] sm:$0xff]  ;;  %v8659_v29 = vld [vmem:[%s10222_s0 + $0x178] sm:$0xff] }
 0x27c   :  { %v3860_v54 = vadd.f32 %v3785_v50, %v3406_v48  ;;  %4599 = vst [vmem:[#allocation3 + $0x1c8] sm:$0xff] %v4535_v46  ;;  %v4540_v56 = vadd.f32 %v8327_v1, %v3862_v43  ;;  %v4463_v57 = vpop.f32.mrf.mxu1  ;;  %v4707_v48 = vld [vmem:[#allocation3 + $0x20] sm:$0xff]  ;;  %v8658_v27 = vld [vmem:[%s10222_s0 + $0x170] sm:$0xff]  ;;  %v8661_v52 = vld [vmem:[%s10222_s0 + $0x188] sm:$0xff] }
 0x27d   :  { %v8262_v11 = vpop.f32.mrf.mxu0  ;;  %v8660_v36 = vld [vmem:[%s10222_s0 + $0x180] sm:$0xff] }
 0x27e   :  { %v3863_v60 = vadd.f32 %v8262_v11, %v3409_v13  ;;  %4604 = vst [vmem:[#allocation3 + $0x1f0] sm:$0xff] %v4540_v56  ;;  %v4538_v62 = vadd.f32 %v4463_v57, %v3860_v54  ;;  %v8328_v28 = vpop.f32.mrf.mxu1  ;;  %v4710_v13 = vld [vmem:[#allocation3 + $0x38] sm:$0xff] }
 0x27f   :  { %v3788_v49 = vpop.f32.mrf.mxu0 }
 0x280   :  { %v3861_v20 = vadd.f32 %v3788_v49, %v3407_v5  ;;  %4602 = vst [vmem:[#allocation3 + $0x1e0] sm:$0xff] %v4538_v62  ;;  %v4541_v12 = vadd.f32 %v8328_v28, %v3863_v60  ;;  %v4466_v32 = vpop.f32.mrf.mxu1  ;;  %v4708_v5 = vld [vmem:[#allocation3 + $0x28] sm:$0xff] }
 0x281   :  { %v8333_v14 = vpop.f32.mrf.mxu0  ;;  %8496 = vmatmul.mubr.msk.bf16.gmra.mxu0 %vm292_vm1, %v6044_v59  ;;  %v6048_v59 = vpack.c.bf16 %v6006_v47, %v6005_v45  ;;  %v6013_v45 = vld [vmem:[#allocation2 + $0x2ba] sm:$0xff]  ;;  %v6014_v47 = vld [vmem:[#allocation2 + $0x2c2] sm:$0xff] }
 0x282   :  { %4605 = vst [vmem:[#allocation3 + $0x1f8] sm:$0xff] %v4541_v12  ;;  %v5159_v15 = vadd.f32 %v8333_v14, %v4705_v6  ;;  %v4539_v61 = vadd.f32 %v4466_v32, %v3861_v20  ;;  %v8399_v17 = vpop.f32.mrf.mxu1  ;;  %8562 = vmatmul.mubr.msk.bf16.gmra.mxu1 %vm292_vm1, %v6722_v2  ;;  %8499 = vmatprep.mubr.msk.bf16.mxu0 %vm292_vm1, %v6045_v16  ;;  %v4713_v6 = vld [vmem:[#allocation3 + $0x50] sm:$0xff] }
 0x283   :  { %v4902_v18 = vpop.f32.mrf.mxu0  ;;  %8565 = vmatprep.mubr.msk.bf16.mxu1 %vm292_vm1, %v6723_v10  ;;  %v6726_v2 = vpack.c.bf16 %v8655_v25, %v8654_v63  ;;  %v6049_v16 = vpack.c.bf16 %v6008_v53, %v6007_v51  ;;  %v6727_v10 = vpack.c.bf16 %v8657_v8, %v8656_v7  ;;  %v6015_v51 = vld [vmem:[#allocation2 + $0x2d2] sm:$0xff]  ;;  %v6016_v53 = vld [vmem:[#allocation2 + $0x2da] sm:$0xff]  ;;  %v8665_v8 = vld [vmem:[%s10222_s0 + $0x1a8] sm:$0xff] }
 0x284   :  { %4603 = vst [vmem:[#allocation3 + $0x1e8] sm:$0xff] %v4539_v61  ;;  %v5157_v21 = vadd.f32 %v4902_v18, %v4703_v30  ;;  %v5837_v4 = vadd.f32 %v8399_v17, %v5159_v15  ;;  %v5580_v58 = vpop.f32.mrf.mxu1  ;;  %v4711_v30 = vld [vmem:[#allocation3 + $0x40] sm:$0xff]  ;;  %v8662_v63 = vld [vmem:[%s10222_s0 + $0x190] sm:$0xff]  ;;  %v8663_v25 = vld [vmem:[%s10222_s0 + $0x198] sm:$0xff] }
 0x285   :  { %v8334_v0 = vpop.f32.mrf.mxu0  ;;  %v8664_v7 = vld [vmem:[%s10222_s0 + $0x1a0] sm:$0xff] }
 0x286   :  { %v5160_v24 = vadd.f32 %v8334_v0, %v4706_v22  ;;  %5901 = vst [vmem:[#allocation3 + $0x10] sm:$0xff] %v5837_v4  ;;  %v5835_v26 = vadd.f32 %v5580_v58, %v5157_v21  ;;  %v8400_v35 = vpop.f32.mrf.mxu1  ;;  %v4714_v22 = vld [vmem:[#allocation3 + $0x58] sm:$0xff] }
 0x287   :  { %v4905_v34 = vpop.f32.mrf.mxu0 }
 0x288   :  { %v5158_v40 = vadd.f32 %v4905_v34, %v4704_v33  ;;  %5899 = vst [vmem:[#allocation3] sm:$0xff] %v5835_v26  ;;  %v5838_v9 = vadd.f32 %v8400_v35, %v5160_v24  ;;  %v5583_v44 = vpop.f32.mrf.mxu1  ;;  %v4712_v33 = vld [vmem:[#allocation3 + $0x48] sm:$0xff] }
 0x289   :  { %v8337_v41 = vpop.f32.mrf.mxu0  ;;  %8500 = vmatmul.mubr.msk.bf16.gmra.mxu0 %vm292_vm1, %v6046_v23  ;;  %v6050_v23 = vpack.c.bf16 %v6010_v3, %v6009_v37  ;;  %v6017_v37 = vld [vmem:[#allocation2 + $0x2ea] sm:$0xff]  ;;  %v6018_v3 = vld [vmem:[#allocation2 + $0x2f2] sm:$0xff] }
 0x28a   :  { %v5163_v43 = vadd.f32 %v8337_v41, %v4709_v42  ;;  %5902 = vst [vmem:[#allocation3 + $0x18] sm:$0xff] %v5838_v9  ;;  %v5836_v46 = vadd.f32 %v5583_v44, %v5158_v40  ;;  %v8403_v1 = vpop.f32.mrf.mxu1  ;;  %8566 = vmatmul.mubr.msk.bf16.gmra.mxu1 %vm292_vm1, %v6724_v31  ;;  %8503 = vmatprep.mubr.msk.bf16.mxu0 %vm292_vm1, %v6047_v39  ;;  %v4717_v42 = vld [vmem:[#allocation3 + $0x70] sm:$0xff] }
 0x28b   :  { %v4918_v50 = vpop.f32.mrf.mxu0  ;;  %8569 = vmatprep.mubr.msk.bf16.mxu1 %vm292_vm1, %v6725_v38  ;;  %v6728_v31 = vpack.c.bf16 %v8659_v29, %v8658_v27  ;;  %v6051_v39 = vpack.c.bf16 %v6012_v55, %v6011_v19  ;;  %v6729_v38 = vpack.c.bf16 %v8661_v52, %v8660_v36  ;;  %v6019_v19 = vld [vmem:[#allocation2 + $0x302] sm:$0xff]  ;;  %v6020_v55 = vld [vmem:[#allocation2 + $0x30a] sm:$0xff]  ;;  %v8667_v29 = vld [vmem:[%s10222_s0 + $0x1b8] sm:$0xff] }
 0x28c   :  { %v5161_v54 = vadd.f32 %v4918_v50, %v4707_v48  ;;  %5900 = vst [vmem:[#allocation3 + $0x8] sm:$0xff] %v5836_v46  ;;  %v5841_v56 = vadd.f32 %v8403_v1, %v5163_v43  ;;  %v5596_v57 = vpop.f32.mrf.mxu1  ;;  %v4715_v48 = vld [vmem:[#allocation3 + $0x60] sm:$0xff]  ;;  %v8666_v27 = vld [vmem:[%s10222_s0 + $0x1b0] sm:$0xff]  ;;  %v8669_v52 = vld [vmem:[%s10222_s0 + $0x1c8] sm:$0xff] }
 0x28d   :  { %v8338_v11 = vpop.f32.mrf.mxu0  ;;  %v8668_v36 = vld [vmem:[%s10222_s0 + $0x1c0] sm:$0xff] }
 0x28e   :  { %v5164_v60 = vadd.f32 %v8338_v11, %v4710_v13  ;;  %5905 = vst [vmem:[#allocation3 + $0x30] sm:$0xff] %v5841_v56  ;;  %v5839_v62 = vadd.f32 %v5596_v57, %v5161_v54  ;;  %v8404_v28 = vpop.f32.mrf.mxu1  ;;  %v4718_v13 = vld [vmem:[#allocation3 + $0x78] sm:$0xff] }
 0x28f   :  { %v4921_v49 = vpop.f32.mrf.mxu0 }
 0x290   :  { %v5162_v20 = vadd.f32 %v4921_v49, %v4708_v5  ;;  %5903 = vst [vmem:[#allocation3 + $0x20] sm:$0xff] %v5839_v62  ;;  %v5842_v12 = vadd.f32 %v8404_v28, %v5164_v60  ;;  %v5599_v32 = vpop.f32.mrf.mxu1  ;;  %v4716_v5 = vld [vmem:[#allocation3 + $0x68] sm:$0xff] }
 0x291   :  { %v8341_v14 = vpop.f32.mrf.mxu0  ;;  %8504 = vmatmul.mubr.msk.bf16.gmra.mxu0 %vm292_vm1, %v6048_v59  ;;  %v6052_v59 = vpack.c.bf16 %v6014_v47, %v6013_v45  ;;  %v6021_v45 = vld [vmem:[#allocation2 + $0x31a] sm:$0xff]  ;;  %v6022_v47 = vld [vmem:[#allocation2 + $0x322] sm:$0xff] }
 0x292   :  { %v5167_v15 = vadd.f32 %v8341_v14, %v4713_v6  ;;  %5906 = vst [vmem:[#allocation3 + $0x38] sm:$0xff] %v5842_v12  ;;  %v5840_v61 = vadd.f32 %v5599_v32, %v5162_v20  ;;  %v8407_v17 = vpop.f32.mrf.mxu1  ;;  %8570 = vmatmul.mubr.msk.bf16.gmra.mxu1 %vm292_vm1, %v6726_v2  ;;  %8507 = vmatprep.mubr.msk.bf16.mxu0 %vm292_vm1, %v6049_v16  ;;  %v4721_v6 = vld [vmem:[#allocation3 + $0x90] sm:$0xff] }
 0x293   :  { %v4934_v18 = vpop.f32.mrf.mxu0  ;;  %8573 = vmatprep.mubr.msk.bf16.mxu1 %vm292_vm1, %v6727_v10  ;;  %v6730_v2 = vpack.c.bf16 %v8663_v25, %v8662_v63  ;;  %v6053_v16 = vpack.c.bf16 %v6016_v53, %v6015_v51  ;;  %v6731_v10 = vpack.c.bf16 %v8665_v8, %v8664_v7  ;;  %v6023_v51 = vld [vmem:[#allocation2 + $0x332] sm:$0xff]  ;;  %v6024_v53 = vld [vmem:[#allocation2 + $0x33a] sm:$0xff]  ;;  %v8673_v8 = vld [vmem:[%s10222_s0 + $0x1e8] sm:$0xff] }
 0x294   :  { %v5165_v21 = vadd.f32 %v4934_v18, %v4711_v30  ;;  %5904 = vst [vmem:[#allocation3 + $0x28] sm:$0xff] %v5840_v61  ;;  %v5845_v4 = vadd.f32 %v8407_v17, %v5167_v15  ;;  %v5612_v58 = vpop.f32.mrf.mxu1  ;;  %v4719_v30 = vld [vmem:[#allocation3 + $0x80] sm:$0xff]  ;;  %v8670_v63 = vld [vmem:[%s10222_s0 + $0x1d0] sm:$0xff]  ;;  %v8671_v25 = vld [vmem:[%s10222_s0 + $0x1d8] sm:$0xff] }
 0x295   :  { %v8342_v0 = vpop.f32.mrf.mxu0  ;;  %v8672_v7 = vld [vmem:[%s10222_s0 + $0x1e0] sm:$0xff] }
 0x296   :  { %v5168_v24 = vadd.f32 %v8342_v0, %v4714_v22  ;;  %5909 = vst [vmem:[#allocation3 + $0x50] sm:$0xff] %v5845_v4  ;;  %v5843_v26 = vadd.f32 %v5612_v58, %v5165_v21  ;;  %v8408_v35 = vpop.f32.mrf.mxu1  ;;  %v4722_v22 = vld [vmem:[#allocation3 + $0x98] sm:$0xff] }
 0x297   :  { %v4937_v34 = vpop.f32.mrf.mxu0 }
 0x298   :  { %v5166_v40 = vadd.f32 %v4937_v34, %v4712_v33  ;;  %5907 = vst [vmem:[#allocation3 + $0x40] sm:$0xff] %v5843_v26  ;;  %v5846_v9 = vadd.f32 %v8408_v35, %v5168_v24  ;;  %v5615_v44 = vpop.f32.mrf.mxu1  ;;  %v4720_v33 = vld [vmem:[#allocation3 + $0x88] sm:$0xff] }
 0x299   :  { %v8345_v41 = vpop.f32.mrf.mxu0  ;;  %8508 = vmatmul.mubr.msk.bf16.gmra.mxu0 %vm292_vm1, %v6050_v23  ;;  %v6054_v23 = vpack.c.bf16 %v6018_v3, %v6017_v37  ;;  %v6025_v37 = vld [vmem:[#allocation2 + $0x34a] sm:$0xff]  ;;  %v6026_v3 = vld [vmem:[#allocation2 + $0x352] sm:$0xff] }
 0x29a   :  { %v5171_v43 = vadd.f32 %v8345_v41, %v4717_v42  ;;  %5910 = vst [vmem:[#allocation3 + $0x58] sm:$0xff] %v5846_v9  ;;  %v5844_v46 = vadd.f32 %v5615_v44, %v5166_v40  ;;  %v8411_v1 = vpop.f32.mrf.mxu1  ;;  %8574 = vmatmul.mubr.msk.bf16.gmra.mxu1 %vm292_vm1, %v6728_v31  ;;  %8511 = vmatprep.mubr.msk.bf16.mxu0 %vm292_vm1, %v6051_v39  ;;  %v4725_v42 = vld [vmem:[#allocation3 + $0xb0] sm:$0xff] }
 0x29b   :  { %v4950_v50 = vpop.f32.mrf.mxu0  ;;  %8577 = vmatprep.mubr.msk.bf16.mxu1 %vm292_vm1, %v6729_v38  ;;  %v6732_v31 = vpack.c.bf16 %v8667_v29, %v8666_v27  ;;  %v6055_v39 = vpack.c.bf16 %v6020_v55, %v6019_v19  ;;  %v6733_v38 = vpack.c.bf16 %v8669_v52, %v8668_v36  ;;  %v4728_v29 = vld [vmem:[#allocation3 + $0xc8] sm:$0xff]  ;;  %v4733_v36 = vld [vmem:[#allocation3 + $0xf0] sm:$0xff] }
 0x29c   :  { %v5169_v54 = vadd.f32 %v4950_v50, %v4715_v48  ;;  %5908 = vst [vmem:[#allocation3 + $0x48] sm:$0xff] %v5844_v46  ;;  %v5849_v56 = vadd.f32 %v8411_v1, %v5171_v43  ;;  %v5628_v57 = vpop.f32.mrf.mxu1  ;;  %v4723_v48 = vld [vmem:[#allocation3 + $0xa0] sm:$0xff] }
 0x29d   :  { %v8346_v11 = vpop.f32.mrf.mxu0 }
 0x29e   :  { %v5172_v60 = vadd.f32 %v8346_v11, %v4718_v13  ;;  %5913 = vst [vmem:[#allocation3 + $0x70] sm:$0xff] %v5849_v56  ;;  %v5847_v62 = vadd.f32 %v5628_v57, %v5169_v54  ;;  %v8412_v28 = vpop.f32.mrf.mxu1  ;;  %v4726_v13 = vld [vmem:[#allocation3 + $0xb8] sm:$0xff] }
 0x29f   :  { %v4953_v49 = vpop.f32.mrf.mxu0 }
 0x2a0   :  { %v5170_v20 = vadd.f32 %v4953_v49, %v4716_v5  ;;  %5911 = vst [vmem:[#allocation3 + $0x60] sm:$0xff] %v5847_v62  ;;  %v5850_v12 = vadd.f32 %v8412_v28, %v5172_v60  ;;  %v5631_v32 = vpop.f32.mrf.mxu1  ;;  %v4724_v5 = vld [vmem:[#allocation3 + $0xa8] sm:$0xff] }
 0x2a1   :  { %v8349_v14 = vpop.f32.mrf.mxu0  ;;  %8512 = vmatmul.mubr.msk.bf16.gmra.mxu0 %vm292_vm1, %v6052_v59  ;;  %v6056_v59 = vpack.c.bf16 %v6022_v47, %v6021_v45 }
 0x2a2   :  { %v5175_v15 = vadd.f32 %v8349_v14, %v4721_v6  ;;  %5914 = vst [vmem:[#allocation3 + $0x78] sm:$0xff] %v5850_v12  ;;  %v5848_v61 = vadd.f32 %v5631_v32, %v5170_v20  ;;  %v8415_v17 = vpop.f32.mrf.mxu1  ;;  %8578 = vmatmul.mubr.msk.bf16.gmra.mxu1 %vm292_vm1, %v6730_v2  ;;  %8515 = vmatprep.mubr.msk.bf16.mxu0 %vm292_vm1, %v6053_v16  ;;  %v4729_v6 = vld [vmem:[#allocation3 + $0xd0] sm:$0xff] }
 0x2a3   :  { %v4966_v18 = vpop.f32.mrf.mxu0  ;;  %8581 = vmatprep.mubr.msk.bf16.mxu1 %vm292_vm1, %v6731_v10  ;;  %v6734_v2 = vpack.c.bf16 %v8671_v25, %v8670_v63  ;;  %v6057_v16 = vpack.c.bf16 %v6024_v53, %v6023_v51  ;;  %v6735_v10 = vpack.c.bf16 %v8673_v8, %v8672_v7  ;;  %v4732_v51 = vld [vmem:[#allocation3 + $0xe8] sm:$0xff] }
 0x2a4   :  { %v5173_v21 = vadd.f32 %v4966_v18, %v4719_v30  ;;  %5912 = vst [vmem:[#allocation3 + $0x68] sm:$0xff] %v5848_v61  ;;  %v5853_v4 = vadd.f32 %v8415_v17, %v5175_v15  ;;  %v5644_v58 = vpop.f32.mrf.mxu1  ;;  %v4727_v30 = vld [vmem:[#allocation3 + $0xc0] sm:$0xff] }
 0x2a5   :  { %v8350_v0 = vpop.f32.mrf.mxu0 }
 0x2a6   :  { %v5176_v24 = vadd.f32 %v8350_v0, %v4722_v22  ;;  %5917 = vst [vmem:[#allocation3 + $0x90] sm:$0xff] %v5853_v4  ;;  %v5851_v26 = vadd.f32 %v5644_v58, %v5173_v21  ;;  %v8416_v35 = vpop.f32.mrf.mxu1  ;;  %v4730_v4 = vld [vmem:[#allocation3 + $0xd8] sm:$0xff]  ;;  %v6058_v22 = vpack.c.bf16 %v6026_v3, %v6025_v37 }
 0x2a7   :  { %v4969_v34 = vpop.f32.mrf.mxu0 }
 0x2a8   :  { %v5174_v40 = vadd.f32 %v4969_v34, %v4720_v33  ;;  %5915 = vst [vmem:[#allocation3 + $0x80] sm:$0xff] %v5851_v26  ;;  %v5854_v9 = vadd.f32 %v8416_v35, %v5176_v24  ;;  %v5647_v44 = vpop.f32.mrf.mxu1  ;;  %v8674_v26 = vld [vmem:[%s10222_s0 + $0x1f0] sm:$0xff]  ;;  %v8675_v35 = vld [vmem:[%s10222_s0 + $0x1f8] sm:$0xff]  ;;  %s8699_s0 = smov [#allocation3]  }
 0x2a9   :  { %v8353_v41 = vpop.f32.mrf.mxu0  ;;  %8516 = vmatmul.mubr.msk.bf16.gmra.mxu0 %vm292_vm1, %v6054_v23  ;;  %v6736_v27 = vpack.c.bf16 %v8675_v35, %v8674_v26  ;;  %s7260_s11 = sshll.u32 %s8699_s0, 4  ;;  %s7261_s11 = int_to_ptr.vmem [resolvable:$true] %s7260_s11 }
 0x2aa   :  { %v5179_v43 = vadd.f32 %v8353_v41, %v4725_v42  ;;  %5918 = vst [vmem:[#allocation3 + $0x98] sm:$0xff] %v5854_v9  ;;  %v5852_v46 = vadd.f32 %v5647_v44, %v5174_v40  ;;  %v8419_v1 = vpop.f32.mrf.mxu1  ;;  %8582 = vmatmul.mubr.msk.bf16.gmra.mxu1 %vm292_vm1, %v6732_v31  ;;  %8519 = vmatprep.mubr.msk.bf16.mxu0 %vm292_vm1, %v6055_v39  ;;  %v4731_v44 = vld [vmem:[#allocation3 + $0xe0] sm:$0xff]  ;;  %s8676_s12 = scalar_lea.vmem %s7261_s11, 8192  ;;  %p8681_p1 = scmp.lt.s32.totalorder %s7261_s11, %s7261_s11 }
 0x2ab   :  { %v4982_v50 = vpop.f32.mrf.mxu0  ;;  %8585 = vmatprep.mubr.msk.bf16.mxu1 %vm292_vm1, %v6733_v38  ;;  %p8677_p0 = scmp.ne.s32.totalorder %s7261_s11, %s8676_s12  ;;  %p8682_p2 = scmp.lt.s32.totalorder %s8676_s12, %s8676_s12 }
 0x2ac   :  { %v5177_v54 = vadd.f32 %v4982_v50, %v4723_v48  ;;  %5916 = vst [vmem:[#allocation3 + $0x88] sm:$0xff] %v5852_v46  ;;  %v5857_v56 = vadd.f32 %v8419_v1, %v5179_v43  ;;  %v5660_v57 = vpop.f32.mrf.mxu1  ;;  %v4734_v1 = vld [vmem:[#allocation3 + $0xf8] sm:$0xff] }
 0x2ad   :  { %v8354_v11 = vpop.f32.mrf.mxu0  ;;  %p8683_p3 = por %p8682_p2, %p8681_p1 }
 0x2ae   :  { %v5180_v60 = vadd.f32 %v8354_v11, %v4726_v13  ;;  %5921 = vst [vmem:[#allocation3 + $0xb0] sm:$0xff] %v5857_v56  ;;  %v5855_v62 = vadd.f32 %v5660_v57, %v5177_v54  ;;  %v8420_v28 = vpop.f32.mrf.mxu1  ;;  %v4737_v13 = vld [vmem:[#allocation3 + $0x110] sm:$0xff] }
 0x2af   :  { %v4985_v49 = vpop.f32.mrf.mxu0  ;;  %p8684_p4 = pnand %p8683_p3, %p8677_p0 }
 0x2b0   :  { %v5178_v20 = vadd.f32 %v4985_v49, %v4724_v5  ;;  %5919 = vst [vmem:[#allocation3 + $0xa0] sm:$0xff] %v5855_v62  ;;  %v10081_v12 = vadd.f32 %v8420_v28, %v5180_v60  ;;  %v5663_v32 = vpop.f32.mrf.mxu1  ;;  %v4735_v28 = vld [vmem:[#allocation3 + $0x100] sm:$0xff]  ;;  %v4738_v5 = vld [vmem:[#allocation3 + $0x118] sm:$0xff] }
 0x2b1   :  { %v8357_v14 = vpop.f32.mrf.mxu0  ;;  %8520 = vmatmul.mubr.msk.bf16.gmra.mxu0 %vm292_vm1, %v6056_v59 }
 0x2b2   :  { %v5183_v15 = vadd.f32 %v8357_v14, %v4729_v6  ;;  %v10084_v61 = vadd.f32 %v5663_v32, %v5178_v20  ;;  %v8423_v17 = vpop.f32.mrf.mxu1  ;;  %8586 = vmatmul.mubr.msk.bf16.gmra.mxu1 %vm292_vm1, %v6734_v2  ;;  %8523 = vmatprep.mubr.msk.bf16.mxu0 %vm292_vm1, %v6057_v16  ;;  %v4736_v20 = vld [vmem:[#allocation3 + $0x108] sm:$0xff] }
 0x2b3   :  { %v4998_v18 = vpop.f32.mrf.mxu0  ;;  %8589 = vmatprep.mubr.msk.bf16.mxu1 %vm292_vm1, %v6735_v10 }
 0x2b4   :  { %v5181_v19 = vadd.f32 %v4998_v18, %v4727_v30  ;;  %v10089_v55 = vadd.f32 %v8423_v17, %v5183_v15  ;;  %v5676_v21 = vpop.f32.mrf.mxu1  ;;  %v4741_v17 = vld [vmem:[#allocation3 + $0x130] sm:$0xff] }
 0x2b5   :  { %v8358_v58 = vpop.f32.mrf.mxu0 }
 0x2b6   :  { %v5184_v0 = vadd.f32 %v8358_v58, %v4730_v4  ;;  %v10091_v23 = vadd.f32 %v5676_v21, %v5181_v19  ;;  %v8424_v24 = vpop.f32.mrf.mxu1  ;;  %v4739_v19 = vld [vmem:[#allocation3 + $0x120] sm:$0xff] }
 0x2b7   :  { %v5001_v31 = vpop.f32.mrf.mxu0 }
 0x2b8   :  { %v5182_v39 = vadd.f32 %v5001_v31, %v4728_v29  ;;  %v10099_v33 = vadd.f32 %v8424_v24, %v5184_v0  ;;  %v5679_v34 = vpop.f32.mrf.mxu1  ;;  %v4742_v0 = vld [vmem:[#allocation3 + $0x138] sm:$0xff]  ;;  %v4740_v29 = vld [vmem:[#allocation3 + $0x128] sm:$0xff] }
 0x2b9   :  { %v8361_v52 = vpop.f32.mrf.mxu0  ;;  %8524 = vmatmul.mubr.msk.bf16.gmra.mxu0 %vm292_vm1, %v6058_v22 }
 0x2ba   :  { %v5187_v38 = vadd.f32 %v8361_v52, %v4733_v36  ;;  %v10102_v40 = vadd.f32 %v5679_v34, %v5182_v39  ;;  %v8427_v9 = vpop.f32.mrf.mxu1  ;;  %8590 = vmatmul.mubr.msk.bf16.gmra.mxu1 %vm292_vm1, %v6736_v27  ;;  %v4745_v52 = vld [vmem:[#allocation3 + $0x150] sm:$0xff] }
 0x2bb   :  { %v5014_v42 = vpop.f32.mrf.mxu0 }
 0x2bc   :  { %v5185_v41 = vadd.f32 %v5014_v42, %v4731_v44  ;;  %v10105_v43 = vadd.f32 %v8427_v9, %v5187_v38  ;;  %v5692_v46 = vpop.f32.mrf.mxu1 }
 0x2bd   :  { %v8362_v45 = vpop.f32.mrf.mxu0 }
 0x2be   :  { %v5188_v47 = vadd.f32 %v8362_v45, %v4734_v1  ;;  %v10107_v48 = vadd.f32 %v5692_v46, %v5185_v41  ;;  %v8428_v50 = vpop.f32.mrf.mxu1  ;;  %v4743_v41 = vld [vmem:[#allocation3 + $0x140] sm:$0xff] }
 0x2bf   :  { %v5017_v53 = vpop.f32.mrf.mxu0 }
 0x2c0   :  { %v5186_v54 = vadd.f32 %v5017_v53, %v4732_v51  ;;  %v10109_v56 = vadd.f32 %v8428_v50, %v5188_v47  ;;  %v5695_v57 = vpop.f32.mrf.mxu1  ;;  %v4746_v50 = vld [vmem:[#allocation3 + $0x158] sm:$0xff] }
 0x2c1   :  { %v8365_v11 = vpop.f32.mrf.mxu0 }
 0x2c2   :  { %v5191_v59 = vadd.f32 %v8365_v11, %v4737_v13  ;;  %v10111_v60 = vadd.f32 %v5695_v57, %v5186_v54  ;;  %v8431_v62 = vpop.f32.mrf.mxu1  ;;  %v4744_v13 = vld [vmem:[#allocation3 + $0x148] sm:$0xff] }
 0x2c3   :  { %v5030_v63 = vpop.f32.mrf.mxu0 }
 0x2c4   :  { %v5189_v25 = vadd.f32 %v5030_v63, %v4735_v28  ;;  %v10113_v2 = vadd.f32 %v8431_v62, %v5191_v59  ;;  %v5708_v16 = vpop.f32.mrf.mxu1  ;;  %v4749_v63 = vld [vmem:[#allocation3 + $0x170] sm:$0xff] }
 0x2c5   :  { %v8366_v49 = vpop.f32.mrf.mxu0 }
 0x2c6   :  { %v5192_v7 = vadd.f32 %v8366_v49, %v4738_v5  ;;  %v10115_v8 = vadd.f32 %v5708_v16, %v5189_v25  ;;  %v8432_v10 = vpop.f32.mrf.mxu1 }
 0x2c7   :  { %v5033_v32 = vpop.f32.mrf.mxu0 }
 0x2c8   :  { %v5190_v6 = vadd.f32 %v5033_v32, %v4736_v20  ;;  %v10117_v14 = vadd.f32 %v8432_v10, %v5192_v7  ;;  %v5711_v15 = vpop.f32.mrf.mxu1  ;;  %v4747_v7 = vld [vmem:[#allocation3 + $0x160] sm:$0xff] }
 0x2c9   :  { %v8369_v37 = vpop.f32.mrf.mxu0 }
 0x2ca   :  { %v5195_v3 = vadd.f32 %v8369_v37, %v4741_v17  ;;  %v10119_v30 = vadd.f32 %v5711_v15, %v5190_v6  ;;  %v8435_v18 = vpop.f32.mrf.mxu1  ;;  %v4750_v15 = vld [vmem:[#allocation3 + $0x178] sm:$0xff] }
 0x2cb   :  { %v5046_v21 = vpop.f32.mrf.mxu0 }
 0x2cc   :  { %v5193_v4 = vadd.f32 %v5046_v21, %v4739_v19  ;;  %v10121_v58 = vadd.f32 %v8435_v18, %v5195_v3  ;;  %v5724_v22 = vpop.f32.mrf.mxu1  ;;  %v4748_v19 = vld [vmem:[#allocation3 + $0x168] sm:$0xff] }
 0x2cd   :  { %v8370_v24 = vpop.f32.mrf.mxu0 }
 0x2ce   :  { %v5196_v26 = vadd.f32 %v8370_v24, %v4742_v0  ;;  %v10123_v35 = vadd.f32 %v5724_v22, %v5193_v4  ;;  %v8436_v27 = vpop.f32.mrf.mxu1  ;;  %v4753_v24 = vld [vmem:[#allocation3 + $0x190] sm:$0xff] }
 0x2cf   :  { %v5049_v31 = vpop.f32.mrf.mxu0 }
 0x2d0   :  { %v5194_v39 = vadd.f32 %v5049_v31, %v4740_v29  ;;  %v10125_v34 = vadd.f32 %v8436_v27, %v5196_v26  ;;  %v5727_v36 = vpop.f32.mrf.mxu1 }
 0x2d1   :  { %v8373_v38 = vpop.f32.mrf.mxu0 }
 0x2d2   :  { %v5199_v9 = vadd.f32 %v8373_v38, %v4745_v52  ;;  %v10127_v44 = vadd.f32 %v5727_v36, %v5194_v39  ;;  %v8439_v42 = vpop.f32.mrf.mxu1  ;;  %v4751_v39 = vld [vmem:[#allocation3 + $0x180] sm:$0xff] }
 0x2d3   :  { %v5062_v46 = vpop.f32.mrf.mxu0 }
 0x2d4   :  { %v5197_v1 = vadd.f32 %v5062_v46, %v4743_v41  ;;  %v10129_v45 = vadd.f32 %v8439_v42, %v5199_v9  ;;  %v5740_v47 = vpop.f32.mrf.mxu1  ;;  %v4754_v42 = vld [vmem:[#allocation3 + $0x198] sm:$0xff] }
 0x2d5   :  { %v8374_v51 = vpop.f32.mrf.mxu0 }
 0x2d6   :  { %v5200_v53 = vadd.f32 %v8374_v51, %v4746_v50  ;;  %v10131_v54 = vadd.f32 %v5740_v47, %v5197_v1  ;;  %v8440_v57 = vpop.f32.mrf.mxu1  ;;  %v4752_v50 = vld [vmem:[#allocation3 + $0x188] sm:$0xff] }
 0x2d7   :  { %v5065_v11 = vpop.f32.mrf.mxu0 }
 0x2d8   :  { %v5198_v59 = vadd.f32 %v5065_v11, %v4744_v13  ;;  %v10133_v62 = vadd.f32 %v8440_v57, %v5200_v53  ;;  %v5743_v28 = vpop.f32.mrf.mxu1  ;;  %v4757_v11 = vld [vmem:[#allocation3 + $0x1b0] sm:$0xff] }
 0x2d9   :  { %v8377_v25 = vpop.f32.mrf.mxu0 }
 0x2da   :  { %v5203_v16 = vadd.f32 %v8377_v25, %v4749_v63  ;;  %v10135_v5 = vadd.f32 %v5743_v28, %v5198_v59  ;;  %v8443_v49 = vpop.f32.mrf.mxu1 }
 0x2db   :  { %v5078_v10 = vpop.f32.mrf.mxu0 }
 0x2dc   :  { %v5201_v20 = vadd.f32 %v5078_v10, %v4747_v7  ;;  %v10137_v32 = vadd.f32 %v8443_v49, %v5203_v16  ;;  %v5756_v6 = vpop.f32.mrf.mxu1  ;;  %v4755_v16 = vld [vmem:[#allocation3 + $0x1a0] sm:$0xff] }
 0x2dd   :  { %v8378_v17 = vpop.f32.mrf.mxu0 }
 0x2de   :  { %v5204_v37 = vadd.f32 %v8378_v17, %v4750_v15  ;;  %v10139_v3 = vadd.f32 %v5756_v6, %v5201_v20  ;;  %v8444_v18 = vpop.f32.mrf.mxu1  ;;  %v4758_v6 = vld [vmem:[#allocation3 + $0x1b8] sm:$0xff] }
 0x2df   :  { %v5081_v21 = vpop.f32.mrf.mxu0 }
 0x2e0   :  { %v5202_v4 = vadd.f32 %v5081_v21, %v4748_v19  ;;  %v10141_v22 = vadd.f32 %v8444_v18, %v5204_v37  ;;  %v5759_v0 = vpop.f32.mrf.mxu1  ;;  %v4756_v19 = vld [vmem:[#allocation3 + $0x1a8] sm:$0xff] }
 0x2e1   :  { %v8381_v26 = vpop.f32.mrf.mxu0 }
 0x2e2   :  { %v5207_v27 = vadd.f32 %v8381_v26, %v4753_v24  ;;  %v10143_v29 = vadd.f32 %v5759_v0, %v5202_v4  ;;  %v8447_v31 = vpop.f32.mrf.mxu1  ;;  %v4761_v26 = vld [vmem:[#allocation3 + $0x1d0] sm:$0xff] }
 0x2e3   :  { %v5094_v36 = vpop.f32.mrf.mxu0 }
 0x2e4   :  { %v5205_v52 = vadd.f32 %v5094_v36, %v4751_v39  ;;  %v10145_v38 = vadd.f32 %v8447_v31, %v5207_v27  ;;  %v5772_v9 = vpop.f32.mrf.mxu1 }
 0x2e5   :  { %v8382_v41 = vpop.f32.mrf.mxu0 }
 0x2e6   :  { %v5208_v46 = vadd.f32 %v8382_v41, %v4754_v42  ;;  %v10147_v1 = vadd.f32 %v5772_v9, %v5205_v52  ;;  %v8448_v47 = vpop.f32.mrf.mxu1  ;;  %v4759_v52 = vld [vmem:[#allocation3 + $0x1c0] sm:$0xff] }
 0x2e7   :  { %v5097_v51 = vpop.f32.mrf.mxu0 }
 0x2e8   :  { %v5206_v53 = vadd.f32 %v5097_v51, %v4752_v50  ;;  %v10149_v57 = vadd.f32 %v8448_v47, %v5208_v46  ;;  %v5775_v13 = vpop.f32.mrf.mxu1  ;;  %v4762_v47 = vld [vmem:[#allocation3 + $0x1d8] sm:$0xff] }
 0x2e9   :  { %v8385_v59 = vpop.f32.mrf.mxu0 }
 0x2ea   :  { %v5211_v28 = vadd.f32 %v8385_v59, %v4757_v11  ;;  %v10151_v63 = vadd.f32 %v5775_v13, %v5206_v53  ;;  %v8451_v25 = vpop.f32.mrf.mxu1  ;;  %v4760_v11 = vld [vmem:[#allocation3 + $0x1c8] sm:$0xff] }
 0x2eb   :  { %v5110_v49 = vpop.f32.mrf.mxu0 }
 0x2ec   :  { %v5209_v7 = vadd.f32 %v5110_v49, %v4755_v16  ;;  %v10153_v10 = vadd.f32 %v8451_v25, %v5211_v28  ;;  %v5788_v20 = vpop.f32.mrf.mxu1  ;;  %v4765_v49 = vld [vmem:[#allocation3 + $0x1f0] sm:$0xff] }
 0x2ed   :  { %v8386_v15 = vpop.f32.mrf.mxu0 }
 0x2ee   :  { %v5212_v17 = vadd.f32 %v8386_v15, %v4758_v6  ;;  %v10155_v37 = vadd.f32 %v5788_v20, %v5209_v7  ;;  %v8452_v18 = vpop.f32.mrf.mxu1 }
 0x2ef   :  { %v5113_v21 = vpop.f32.mrf.mxu0 }
 0x2f0   :  { %v5210_v4 = vadd.f32 %v5113_v21, %v4756_v19  ;;  %v10157_v0 = vadd.f32 %v8452_v18, %v5212_v17  ;;  %v5791_v24 = vpop.f32.mrf.mxu1  ;;  %v4763_v17 = vld [vmem:[#allocation3 + $0x1e0] sm:$0xff] }
 0x2f1   :  { %v8389_v27 = vpop.f32.mrf.mxu0 }
 0x2f2   :  { %v5215_v31 = vadd.f32 %v8389_v27, %v4761_v26  ;;  %v10159_v39 = vadd.f32 %v5791_v24, %v5210_v4  ;;  %v8455_v36 = vpop.f32.mrf.mxu1  ;;  %v4766_v24 = vld [vmem:[#allocation3 + $0x1f8] sm:$0xff] }
 0x2f3   :  { %v5126_v9 = vpop.f32.mrf.mxu0 }
 0x2f4   :  { %v5213_v42 = vadd.f32 %v5126_v9, %v4759_v52  ;;  %v10161_v41 = vadd.f32 %v8455_v36, %v5215_v31  ;;  %v5804_v46 = vpop.f32.mrf.mxu1  ;;  %v4764_v52 = vld [vmem:[#allocation3 + $0x1e8] sm:$0xff] }
 0x2f5   :  { %v8390_v50 = vpop.f32.mrf.mxu0 }
 0x2f6   :  { %v5216_v51 = vadd.f32 %v8390_v50, %v4762_v47  ;;  %v10163_v53 = vadd.f32 %v5804_v46, %v5213_v42  ;;  %v8456_v13 = vpop.f32.mrf.mxu1  ;;  %v6061_v50 = vld [vmem:[#allocation3 + $0x10] sm:$0xff] }
 0x2f7   :  { %v5129_v59 = vpop.f32.mrf.mxu0 }
 0x2f8   :  { %v5214_v28 = vadd.f32 %v5129_v59, %v4760_v11  ;;  %v10165_v25 = vadd.f32 %v8456_v13, %v5216_v51  ;;  %v5807_v16 = vpop.f32.mrf.mxu1 }
 0x2f9   :  { %v8393_v7 = vpop.f32.mrf.mxu0 }
 0x2fa   :  { %v5219_v20 = vadd.f32 %v8393_v7, %v4765_v49  ;;  %v10167_v6 = vadd.f32 %v5807_v16, %v5214_v28  ;;  %v8459_v15 = vpop.f32.mrf.mxu1  ;;  %v6059_v28 = vld [vmem:[#allocation3] sm:$0xff] }
 0x2fb   :  { %v5142_v18 = vpop.f32.mrf.mxu0 }
 0x2fc   :  { %v5217_v19 = vadd.f32 %v5142_v18, %v4763_v17  ;;  %v10169_v21 = vadd.f32 %v8459_v15, %v5219_v20  ;;  %v5820_v4 = vpop.f32.mrf.mxu1  ;;  %v6062_v15 = vld [vmem:[#allocation3 + $0x18] sm:$0xff] }
 0x2fd   :  { %v8394_v26 = vpop.f32.mrf.mxu0 }
 0x2fe   :  { %v5220_v27 = vadd.f32 %v8394_v26, %v4766_v24  ;;  %v10171_v31 = vadd.f32 %v5820_v4, %v5217_v19  ;;  %v8460_v36 = vpop.f32.mrf.mxu1  ;;  %v6060_v24 = vld [vmem:[#allocation3 + $0x8] sm:$0xff] }
 0x2ff   :  { %v5145_v9 = vpop.f32.mrf.mxu0 }
 0x300   :  { %v5218_v42 = vadd.f32 %v5145_v9, %v4764_v52  ;;  %v10173_v46 = vadd.f32 %v8460_v36, %v5220_v27  ;;  %v5823_v47 = vpop.f32.mrf.mxu1  ;;  %v6065_v9 = vld [vmem:[#allocation3 + $0x30] sm:$0xff] }
 0x301   :  { %v8465_v51 = vpop.f32.mrf.mxu0 }
 0x302   :  { %v6515_v13 = vadd.f32 %v8465_v51, %v6061_v50  ;;  %v10175_v11 = vadd.f32 %v5823_v47, %v5218_v42  ;;  %v8531_v59 = vpop.f32.mrf.mxu1 }
 0x303   :  { %v6258_v16 = vpop.f32.mrf.mxu0 }
 0x304   :  { %v6513_v49 = vadd.f32 %v6258_v16, %v6059_v28  ;;  %v7129_v7 = vadd.f32 %v8531_v59, %v6515_v13  ;;  %v6872_v20 = vpop.f32.mrf.mxu1  ;;  %v6063_v13 = vld [vmem:[#allocation3 + $0x20] sm:$0xff] }
 0x305   :  { %v8466_v17 = vpop.f32.mrf.mxu0 }
 0x306   :  { %v6516_v18 = vadd.f32 %v8466_v17, %v6062_v15  ;;  %7193 = vst [vmem:[#allocation3 + $0x10] sm:$0xff] %v7129_v7  ;;  %v7127_v19 = vadd.f32 %v6872_v20, %v6513_v49  ;;  %v8532_v4 = vpop.f32.mrf.mxu1  ;;  %v6066_v49 = vld [vmem:[#allocation3 + $0x38] sm:$0xff] }
 0x307   :  { %v6261_v26 = vpop.f32.mrf.mxu0 }
 0x308   :  { %v6514_v27 = vadd.f32 %v6261_v26, %v6060_v24  ;;  %7191 = vst [vmem:[#allocation3] sm:$0xff] %v7127_v19  ;;  %v7130_v36 = vadd.f32 %v8532_v4, %v6516_v18  ;;  %v6875_v52 = vpop.f32.mrf.mxu1  ;;  %v6064_v18 = vld [vmem:[#allocation3 + $0x28] sm:$0xff] }
 0x309   :  { %v8469_v42 = vpop.f32.mrf.mxu0 }
 0x30a   :  { %v6519_v47 = vadd.f32 %v8469_v42, %v6065_v9  ;;  %7194 = vst [vmem:[#allocation3 + $0x18] sm:$0xff] %v7130_v36  ;;  %v7128_v50 = vadd.f32 %v6875_v52, %v6514_v27  ;;  %v8535_v51 = vpop.f32.mrf.mxu1  ;;  %v6069_v27 = vld [vmem:[#allocation3 + $0x50] sm:$0xff] }
 0x30b   :  { %v6274_v59 = vpop.f32.mrf.mxu0 }
 0x30c   :  { %v6517_v28 = vadd.f32 %v6274_v59, %v6063_v13  ;;  %7192 = vst [vmem:[#allocation3 + $0x8] sm:$0xff] %v7128_v50  ;;  %v7133_v16 = vadd.f32 %v8535_v51, %v6519_v47  ;;  %v6888_v7 = vpop.f32.mrf.mxu1  ;;  %v6067_v47 = vld [vmem:[#allocation3 + $0x40] sm:$0xff] }
 0x30d   :  { %v8470_v20 = vpop.f32.mrf.mxu0 }
 0x30e   :  { %v6520_v15 = vadd.f32 %v8470_v20, %v6066_v49  ;;  %7197 = vst [vmem:[#allocation3 + $0x30] sm:$0xff] %v7133_v16  ;;  %v7131_v17 = vadd.f32 %v6888_v7, %v6517_v28  ;;  %v8536_v19 = vpop.f32.mrf.mxu1  ;;  %v6070_v28 = vld [vmem:[#allocation3 + $0x58] sm:$0xff] }
 0x30f   :  { %v6277_v4 = vpop.f32.mrf.mxu0 }
 0x310   :  { %v6518_v24 = vadd.f32 %v6277_v4, %v6064_v18  ;;  %7195 = vst [vmem:[#allocation3 + $0x20] sm:$0xff] %v7131_v17  ;;  %v7134_v26 = vadd.f32 %v8536_v19, %v6520_v15  ;;  %v6891_v36 = vpop.f32.mrf.mxu1  ;;  %v6068_v15 = vld [vmem:[#allocation3 + $0x48] sm:$0xff] }
 0x311   :  { %v8473_v52 = vpop.f32.mrf.mxu0 }
 0x312   :  { %v6523_v9 = vadd.f32 %v8473_v52, %v6069_v27  ;;  %7198 = vst [vmem:[#allocation3 + $0x38] sm:$0xff] %v7134_v26  ;;  %v7132_v42 = vadd.f32 %v6891_v36, %v6518_v24  ;;  %v8539_v50 = vpop.f32.mrf.mxu1  ;;  %v6073_v24 = vld [vmem:[#allocation3 + $0x70] sm:$0xff] }
 0x313   :  { %v6290_v51 = vpop.f32.mrf.mxu0 }
 0x314   :  { %v6521_v13 = vadd.f32 %v6290_v51, %v6067_v47  ;;  %7196 = vst [vmem:[#allocation3 + $0x28] sm:$0xff] %v7132_v42  ;;  %v7137_v59 = vadd.f32 %v8539_v50, %v6523_v9  ;;  %v6904_v16 = vpop.f32.mrf.mxu1  ;;  %v6071_v9 = vld [vmem:[#allocation3 + $0x60] sm:$0xff] }
 0x315   :  { %v8474_v7 = vpop.f32.mrf.mxu0 }
 0x316   :  { %v6524_v49 = vadd.f32 %v8474_v7, %v6070_v28  ;;  %7201 = vst [vmem:[#allocation3 + $0x50] sm:$0xff] %v7137_v59  ;;  %v7135_v20 = vadd.f32 %v6904_v16, %v6521_v13  ;;  %v8540_v17 = vpop.f32.mrf.mxu1  ;;  %v6074_v13 = vld [vmem:[#allocation3 + $0x78] sm:$0xff] }
 0x317   :  { %v6293_v19 = vpop.f32.mrf.mxu0 }
 0x318   :  { %v6522_v18 = vadd.f32 %v6293_v19, %v6068_v15  ;;  %7199 = vst [vmem:[#allocation3 + $0x40] sm:$0xff] %v7135_v20  ;;  %v7138_v4 = vadd.f32 %v8540_v17, %v6524_v49  ;;  %v6907_v26 = vpop.f32.mrf.mxu1  ;;  %v6072_v49 = vld [vmem:[#allocation3 + $0x68] sm:$0xff] }
 0x319   :  { %v8477_v36 = vpop.f32.mrf.mxu0 }
 0x31a   :  { %v6527_v27 = vadd.f32 %v8477_v36, %v6073_v24  ;;  %7202 = vst [vmem:[#allocation3 + $0x58] sm:$0xff] %v7138_v4  ;;  %v7136_v52 = vadd.f32 %v6907_v26, %v6522_v18  ;;  %v8543_v42 = vpop.f32.mrf.mxu1  ;;  %v6077_v18 = vld [vmem:[#allocation3 + $0x90] sm:$0xff] }
 0x31b   :  { %v6306_v50 = vpop.f32.mrf.mxu0 }
 0x31c   :  { %v6525_v47 = vadd.f32 %v6306_v50, %v6071_v9  ;;  %7200 = vst [vmem:[#allocation3 + $0x48] sm:$0xff] %v7136_v52  ;;  %v7141_v51 = vadd.f32 %v8543_v42, %v6527_v27  ;;  %v6920_v59 = vpop.f32.mrf.mxu1  ;;  %v6075_v27 = vld [vmem:[#allocation3 + $0x80] sm:$0xff] }
 0x31d   :  { %v8478_v16 = vpop.f32.mrf.mxu0 }
 0x31e   :  { %v6528_v28 = vadd.f32 %v8478_v16, %v6074_v13  ;;  %7205 = vst [vmem:[#allocation3 + $0x70] sm:$0xff] %v7141_v51  ;;  %v7139_v7 = vadd.f32 %v6920_v59, %v6525_v47  ;;  %v8544_v20 = vpop.f32.mrf.mxu1  ;;  %v6078_v47 = vld [vmem:[#allocation3 + $0x98] sm:$0xff] }
 0x31f   :  { %v6309_v17 = vpop.f32.mrf.mxu0 }
 0x320   :  { %v6526_v15 = vadd.f32 %v6309_v17, %v6072_v49  ;;  %7203 = vst [vmem:[#allocation3 + $0x60] sm:$0xff] %v7139_v7  ;;  %v7142_v19 = vadd.f32 %v8544_v20, %v6528_v28  ;;  %v6923_v4 = vpop.f32.mrf.mxu1  ;;  %v6076_v28 = vld [vmem:[#allocation3 + $0x88] sm:$0xff] }
 0x321   :  { %v8481_v26 = vpop.f32.mrf.mxu0 }
 0x322   :  { %v6531_v24 = vadd.f32 %v8481_v26, %v6077_v18  ;;  %7206 = vst [vmem:[#allocation3 + $0x78] sm:$0xff] %v7142_v19  ;;  %v7140_v36 = vadd.f32 %v6923_v4, %v6526_v15  ;;  %v8547_v52 = vpop.f32.mrf.mxu1  ;;  %v6081_v15 = vld [vmem:[#allocation3 + $0xb0] sm:$0xff] }
 0x323   :  { %v6322_v42 = vpop.f32.mrf.mxu0 }
 0x324   :  { %v6529_v9 = vadd.f32 %v6322_v42, %v6075_v27  ;;  %7204 = vst [vmem:[#allocation3 + $0x68] sm:$0xff] %v7140_v36  ;;  %v7145_v50 = vadd.f32 %v8547_v52, %v6531_v24  ;;  %v6936_v51 = vpop.f32.mrf.mxu1  ;;  %v6079_v24 = vld [vmem:[#allocation3 + $0xa0] sm:$0xff] }
 0x325   :  { %v8482_v59 = vpop.f32.mrf.mxu0 }
 0x326   :  { %v6532_v13 = vadd.f32 %v8482_v59, %v6078_v47  ;;  %7209 = vst [vmem:[#allocation3 + $0x90] sm:$0xff] %v7145_v50  ;;  %v7143_v16 = vadd.f32 %v6936_v51, %v6529_v9  ;;  %v8548_v7 = vpop.f32.mrf.mxu1 }
 0x327   :  { %v6325_v20 = vpop.f32.mrf.mxu0 }
 0x328   :  { %v6530_v49 = vadd.f32 %v6325_v20, %v6076_v28  ;;  %7207 = vst [vmem:[#allocation3 + $0x80] sm:$0xff] %v7143_v16  ;;  %v7146_v17 = vadd.f32 %v8548_v7, %v6532_v13  ;;  %v6939_v19 = vpop.f32.mrf.mxu1 }
 0x329   :  { %v8485_v4 = vpop.f32.mrf.mxu0 }
 0x32a   :  { %v6535_v18 = vadd.f32 %v8485_v4, %v6081_v15  ;;  %7210 = vst [vmem:[#allocation3 + $0x98] sm:$0xff] %v7146_v17  ;;  %v7144_v26 = vadd.f32 %v6939_v19, %v6530_v49  ;;  %v8551_v36 = vpop.f32.mrf.mxu1 }
 0x32b   :  { %v6338_v52 = vpop.f32.mrf.mxu0 }
 0x32c   :  { %v6533_v27 = vadd.f32 %v6338_v52, %v6079_v24  ;;  %7208 = vst [vmem:[#allocation3 + $0x88] sm:$0xff] %v7144_v26  ;;  %v7149_v42 = vadd.f32 %v8551_v36, %v6535_v18  ;;  %v6952_v50 = vpop.f32.mrf.mxu1 }
 0x32d   :  { %v8486_v9 = vpop.f32.mrf.mxu0 }
 0x32e   :  { %v6536_v51 = vadd.f32 %v8486_v9, %v10081_v12  ;;  %7213 = vst [vmem:[#allocation3 + $0xb0] sm:$0xff] %v7149_v42  ;;  %v7147_v47 = vadd.f32 %v6952_v50, %v6533_v27  ;;  %v8552_v59 = vpop.f32.mrf.mxu1 }
 0x32f   :  { %v6341_v13 = vpop.f32.mrf.mxu0 }
 0x330   :  { %v6534_v16 = vadd.f32 %v6341_v13, %v10084_v61  ;;  %7211 = vst [vmem:[#allocation3 + $0xa0] sm:$0xff] %v7147_v47  ;;  %v7150_v7 = vadd.f32 %v8552_v59, %v6536_v51  ;;  %v6955_v28 = vpop.f32.mrf.mxu1 }
 0x331   :  { %v8489_v20 = vpop.f32.mrf.mxu0 }
 0x332   :  { %v6539_v49 = vadd.f32 %v8489_v20, %v10089_v55  ;;  %7214 = vst [vmem:[#allocation3 + $0xb8] sm:$0xff] %v7150_v7  ;;  %v7148_v17 = vadd.f32 %v6955_v28, %v6534_v16  ;;  %v8555_v19 = vpop.f32.mrf.mxu1 }
 0x333   :  { %v6354_v15 = vpop.f32.mrf.mxu0 }
 0x334   :  { %v6537_v4 = vadd.f32 %v6354_v15, %v10091_v23  ;;  %7212 = vst [vmem:[#allocation3 + $0xa8] sm:$0xff] %v7148_v17  ;;  %v7153_v12 = vadd.f32 %v8555_v19, %v6539_v49  ;;  %v6968_v18 = vpop.f32.mrf.mxu1 }
 0x335   :  { %v8490_v26 = vpop.f32.mrf.mxu0 }
 0x336   :  { %v6540_v36 = vadd.f32 %v8490_v26, %v10099_v33  ;;  %7217 = vst [vmem:[#allocation3 + $0xd0] sm:$0xff] %v7153_v12  ;;  %v7151_v61 = vadd.f32 %v6968_v18, %v6537_v4  ;;  %v8556_v24 = vpop.f32.mrf.mxu1 }
 0x337   :  { %v6357_v52 = vpop.f32.mrf.mxu0 }
 0x338   :  { %v6538_v27 = vadd.f32 %v6357_v52, %v10102_v40  ;;  %7215 = vst [vmem:[#allocation3 + $0xc0] sm:$0xff] %v7151_v61  ;;  %v7154_v55 = vadd.f32 %v8556_v24, %v6540_v36  ;;  %v6971_v42 = vpop.f32.mrf.mxu1 }
 0x339   :  { %v8493_v50 = vpop.f32.mrf.mxu0 }
 0x33a   :  { %v6543_v9 = vadd.f32 %v8493_v50, %v10105_v43  ;;  %7218 = vst [vmem:[#allocation3 + $0xd8] sm:$0xff] %v7154_v55  ;;  %v7152_v23 = vadd.f32 %v6971_v42, %v6538_v27  ;;  %v8559_v51 = vpop.f32.mrf.mxu1 }
 0x33b   :  { %v6370_v47 = vpop.f32.mrf.mxu0 }
 0x33c   :  { %v6541_v59 = vadd.f32 %v6370_v47, %v10107_v48  ;;  %7216 = vst [vmem:[#allocation3 + $0xc8] sm:$0xff] %v7152_v23  ;;  %v7157_v33 = vadd.f32 %v8559_v51, %v6543_v9  ;;  %v6984_v13 = vpop.f32.mrf.mxu1 }
 0x33d   :  { %v8494_v16 = vpop.f32.mrf.mxu0 }
 0x33e   :  { %v6544_v7 = vadd.f32 %v8494_v16, %v10109_v56  ;;  %7221 = vst [vmem:[#allocation3 + $0xf0] sm:$0xff] %v7157_v33  ;;  %v7155_v40 = vadd.f32 %v6984_v13, %v6541_v59  ;;  %v8560_v28 = vpop.f32.mrf.mxu1 }
 0x33f   :  { %v6373_v20 = vpop.f32.mrf.mxu0 }
 0x340   :  { %v6542_v49 = vadd.f32 %v6373_v20, %v10111_v60  ;;  %7219 = vst [vmem:[#allocation3 + $0xe0] sm:$0xff] %v7155_v40  ;;  %v7158_v43 = vadd.f32 %v8560_v28, %v6544_v7  ;;  %v6987_v17 = vpop.f32.mrf.mxu1 }
 0x341   :  { %v8497_v19 = vpop.f32.mrf.mxu0 }
 0x342   :  { %v6547_v15 = vadd.f32 %v8497_v19, %v10113_v2  ;;  %7222 = vst [vmem:[#allocation3 + $0xf8] sm:$0xff] %v7158_v43  ;;  %v7156_v48 = vadd.f32 %v6987_v17, %v6542_v49  ;;  %v8563_v4 = vpop.f32.mrf.mxu1 }
 0x343   :  { %v6386_v12 = vpop.f32.mrf.mxu0 }
 0x344   :  { %v6545_v18 = vadd.f32 %v6386_v12, %v10115_v8  ;;  %7220 = vst [vmem:[#allocation3 + $0xe8] sm:$0xff] %v7156_v48  ;;  %v7161_v56 = vadd.f32 %v8563_v4, %v6547_v15  ;;  %v7000_v26 = vpop.f32.mrf.mxu1 }
 0x345   :  { %v8498_v36 = vpop.f32.mrf.mxu0 }
 0x346   :  { %v6548_v61 = vadd.f32 %v8498_v36, %v10117_v14  ;;  %7225 = vst [vmem:[#allocation3 + $0x110] sm:$0xff] %v7161_v56  ;;  %v7159_v60 = vadd.f32 %v7000_v26, %v6545_v18  ;;  %v8564_v24 = vpop.f32.mrf.mxu1 }
 0x347   :  { %v6389_v52 = vpop.f32.mrf.mxu0 }
 0x348   :  { %v6546_v27 = vadd.f32 %v6389_v52, %v10119_v30  ;;  %7223 = vst [vmem:[#allocation3 + $0x100] sm:$0xff] %v7159_v60  ;;  %v7162_v2 = vadd.f32 %v8564_v24, %v6548_v61  ;;  %v7003_v55 = vpop.f32.mrf.mxu1 }
 0x349   :  { %v8501_v42 = vpop.f32.mrf.mxu0 }
 0x34a   :  { %v6551_v50 = vadd.f32 %v8501_v42, %v10121_v58  ;;  %7226 = vst [vmem:[#allocation3 + $0x118] sm:$0xff] %v7162_v2  ;;  %v7160_v8 = vadd.f32 %v7003_v55, %v6546_v27  ;;  %v8567_v9 = vpop.f32.mrf.mxu1 }
 0x34b   :  { %v6402_v23 = vpop.f32.mrf.mxu0 }
 0x34c   :  { %v6549_v51 = vadd.f32 %v6402_v23, %v10123_v35  ;;  %7224 = vst [vmem:[#allocation3 + $0x108] sm:$0xff] %v7160_v8  ;;  %v7165_v14 = vadd.f32 %v8567_v9, %v6551_v50  ;;  %v7016_v47 = vpop.f32.mrf.mxu1 }
 0x34d   :  { %v8502_v59 = vpop.f32.mrf.mxu0 }
 0x34e   :  { %v6552_v33 = vadd.f32 %v8502_v59, %v10125_v34  ;;  %7229 = vst [vmem:[#allocation3 + $0x130] sm:$0xff] %v7165_v14  ;;  %v7163_v30 = vadd.f32 %v7016_v47, %v6549_v51  ;;  %v8568_v13 = vpop.f32.mrf.mxu1 }
 0x34f   :  { %v6405_v16 = vpop.f32.mrf.mxu0 }
 0x350   :  { %v6550_v7 = vadd.f32 %v6405_v16, %v10127_v44  ;;  %7227 = vst [vmem:[#allocation3 + $0x120] sm:$0xff] %v7163_v30  ;;  %v7166_v58 = vadd.f32 %v8568_v13, %v6552_v33  ;;  %v7019_v40 = vpop.f32.mrf.mxu1 }
 0x351   :  { %v8505_v28 = vpop.f32.mrf.mxu0 }
 0x352   :  { %v6555_v20 = vadd.f32 %v8505_v28, %v10129_v45  ;;  %7230 = vst [vmem:[#allocation3 + $0x138] sm:$0xff] %v7166_v58  ;;  %v7164_v35 = vadd.f32 %v7019_v40, %v6550_v7  ;;  %v8571_v49 = vpop.f32.mrf.mxu1 }
 0x353   :  { %v6418_v43 = vpop.f32.mrf.mxu0 }
 0x354   :  { %v6553_v17 = vadd.f32 %v6418_v43, %v10131_v54  ;;  %7228 = vst [vmem:[#allocation3 + $0x128] sm:$0xff] %v7164_v35  ;;  %v7169_v34 = vadd.f32 %v8571_v49, %v6555_v20  ;;  %v7032_v19 = vpop.f32.mrf.mxu1 }
 0x355   :  { %v8506_v15 = vpop.f32.mrf.mxu0 }
 0x356   :  { %v6556_v48 = vadd.f32 %v8506_v15, %v10133_v62  ;;  %7233 = vst [vmem:[#allocation3 + $0x150] sm:$0xff] %v7169_v34  ;;  %v7167_v44 = vadd.f32 %v7032_v19, %v6553_v17  ;;  %v8572_v4 = vpop.f32.mrf.mxu1 }
 0x357   :  { %v6421_v12 = vpop.f32.mrf.mxu0 }
 0x358   :  { %v6554_v18 = vadd.f32 %v6421_v12, %v10135_v5  ;;  %7231 = vst [vmem:[#allocation3 + $0x140] sm:$0xff] %v7167_v44  ;;  %v7170_v45 = vadd.f32 %v8572_v4, %v6556_v48  ;;  %v7035_v56 = vpop.f32.mrf.mxu1 }
 0x359   :  { %v8509_v26 = vpop.f32.mrf.mxu0 }
 0x35a   :  { %v6559_v36 = vadd.f32 %v8509_v26, %v10137_v32  ;;  %7234 = vst [vmem:[#allocation3 + $0x158] sm:$0xff] %v7170_v45  ;;  %v7168_v54 = vadd.f32 %v7035_v56, %v6554_v18  ;;  %v8575_v61 = vpop.f32.mrf.mxu1 }
 0x35b   :  { %v6434_v60 = vpop.f32.mrf.mxu0 }
 0x35c   :  { %v6557_v24 = vadd.f32 %v6434_v60, %v10139_v3  ;;  %7232 = vst [vmem:[#allocation3 + $0x148] sm:$0xff] %v7168_v54  ;;  %v7173_v62 = vadd.f32 %v8575_v61, %v6559_v36  ;;  %v7048_v52 = vpop.f32.mrf.mxu1 }
 0x35d   :  { %v8510_v27 = vpop.f32.mrf.mxu0 }
 0x35e   :  { %v6560_v2 = vadd.f32 %v8510_v27, %v10141_v22  ;;  %7237 = vst [vmem:[#allocation3 + $0x170] sm:$0xff] %v7173_v62  ;;  %v7171_v5 = vadd.f32 %v7048_v52, %v6557_v24  ;;  %v8576_v55 = vpop.f32.mrf.mxu1 }
 0x35f   :  { %v6437_v42 = vpop.f32.mrf.mxu0 }
 0x360   :  { %v6558_v50 = vadd.f32 %v6437_v42, %v10143_v29  ;;  %7235 = vst [vmem:[#allocation3 + $0x160] sm:$0xff] %v7171_v5  ;;  %v7174_v32 = vadd.f32 %v8576_v55, %v6560_v2  ;;  %v7051_v8 = vpop.f32.mrf.mxu1 }
 0x361   :  { %v8513_v9 = vpop.f32.mrf.mxu0 }
 0x362   :  { %v6563_v23 = vadd.f32 %v8513_v9, %v10145_v38  ;;  %7238 = vst [vmem:[#allocation3 + $0x178] sm:$0xff] %v7174_v32  ;;  %v7172_v3 = vadd.f32 %v7051_v8, %v6558_v50  ;;  %v8579_v51 = vpop.f32.mrf.mxu1 }
 0x363   :  { %v6450_v14 = vpop.f32.mrf.mxu0 }
 0x364   :  { %v6561_v47 = vadd.f32 %v6450_v14, %v10147_v1  ;;  %7236 = vst [vmem:[#allocation3 + $0x168] sm:$0xff] %v7172_v3  ;;  %v7177_v22 = vadd.f32 %v8579_v51, %v6563_v23  ;;  %v7064_v59 = vpop.f32.mrf.mxu1 }
 0x365   :  { %v8514_v33 = vpop.f32.mrf.mxu0 }
 0x366   :  { %v6564_v30 = vadd.f32 %v8514_v33, %v10149_v57  ;;  %7241 = vst [vmem:[#allocation3 + $0x190] sm:$0xff] %v7177_v22  ;;  %v7175_v29 = vadd.f32 %v7064_v59, %v6561_v47  ;;  %v8580_v13 = vpop.f32.mrf.mxu1 }
 0x367   :  { %v6453_v16 = vpop.f32.mrf.mxu0 }
 0x368   :  { %v6562_v7 = vadd.f32 %v6453_v16, %v10151_v63  ;;  %7239 = vst [vmem:[#allocation3 + $0x180] sm:$0xff] %v7175_v29  ;;  %v7178_v38 = vadd.f32 %v8580_v13, %v6564_v30  ;;  %v7067_v58 = vpop.f32.mrf.mxu1 }
 0x369   :  { %v8517_v40 = vpop.f32.mrf.mxu0 }
 0x36a   :  { %v6567_v28 = vadd.f32 %v8517_v40, %v10153_v10  ;;  %7242 = vst [vmem:[#allocation3 + $0x198] sm:$0xff] %v7178_v38  ;;  %v7176_v1 = vadd.f32 %v7067_v58, %v6562_v7  ;;  %v8583_v20 = vpop.f32.mrf.mxu1 }
 0x36b   :  { %v6466_v35 = vpop.f32.mrf.mxu0 }
 0x36c   :  { %v6565_v49 = vadd.f32 %v6466_v35, %v10155_v37  ;;  %7240 = vst [vmem:[#allocation3 + $0x188] sm:$0xff] %v7176_v1  ;;  %v7181_v57 = vadd.f32 %v8583_v20, %v6567_v28  ;;  %v7080_v43 = vpop.f32.mrf.mxu1 }
 0x36d   :  { %v8518_v17 = vpop.f32.mrf.mxu0 }
 0x36e   :  { %v6568_v34 = vadd.f32 %v8518_v17, %v10157_v0  ;;  %7245 = vst [vmem:[#allocation3 + $0x1b0] sm:$0xff] %v7181_v57  ;;  %v7179_v63 = vadd.f32 %v7080_v43, %v6565_v49  ;;  %v8584_v19 = vpop.f32.mrf.mxu1 }
 0x36f   :  { %v6469_v15 = vpop.f32.mrf.mxu0 }
 0x370   :  { %v6566_v48 = vadd.f32 %v6469_v15, %v10159_v39  ;;  %7243 = vst [vmem:[#allocation3 + $0x1a0] sm:$0xff] %v7179_v63  ;;  %v7182_v10 = vadd.f32 %v8584_v19, %v6568_v34  ;;  %v7083_v44 = vpop.f32.mrf.mxu1 }
 0x371   :  { %v8521_v4 = vpop.f32.mrf.mxu0 }
 0x372   :  { %v6571_v12 = vadd.f32 %v8521_v4, %v10161_v41  ;;  %7246 = vst [vmem:[#allocation3 + $0x1b8] sm:$0xff] %v7182_v10  ;;  %v7180_v37 = vadd.f32 %v7083_v44, %v6566_v48  ;;  %v8587_v18 = vpop.f32.mrf.mxu1 }
 0x373   :  { %v6482_v45 = vpop.f32.mrf.mxu0 }
 0x374   :  { %v6569_v56 = vadd.f32 %v6482_v45, %v10163_v53  ;;  %7244 = vst [vmem:[#allocation3 + $0x1a8] sm:$0xff] %v7180_v37  ;;  %v7185_v0 = vadd.f32 %v8587_v18, %v6571_v12  ;;  %v7096_v26 = vpop.f32.mrf.mxu1 }
 0x375   :  { %v8522_v36 = vpop.f32.mrf.mxu0 }
 0x376   :  { %v6572_v54 = vadd.f32 %v8522_v36, %v10165_v25  ;;  %7249 = vst [vmem:[#allocation3 + $0x1d0] sm:$0xff] %v7185_v0  ;;  %v7183_v39 = vadd.f32 %v7096_v26, %v6569_v56  ;;  %v8588_v61 = vpop.f32.mrf.mxu1 }
 0x377   :  { %v6485_v60 = vpop.f32.mrf.mxu0 }
 0x378   :  { %v6570_v24 = vadd.f32 %v6485_v60, %v10167_v6  ;;  %7247 = vst [vmem:[#allocation3 + $0x1c0] sm:$0xff] %v7183_v39  ;;  %v7186_v41 = vadd.f32 %v8588_v61, %v6572_v54  ;;  %v7099_v62 = vpop.f32.mrf.mxu1 }
 0x379   :  { %v8525_v52 = vpop.f32.mrf.mxu0 }
 0x37a   :  { %v6575_v27 = vadd.f32 %v8525_v52, %v10169_v21  ;;  %7250 = vst [vmem:[#allocation3 + $0x1d8] sm:$0xff] %v7186_v41  ;;  %v7184_v53 = vadd.f32 %v7099_v62, %v6570_v24  ;;  %v8591_v2 = vpop.f32.mrf.mxu1 }
 0x37b   :  { %v6498_v5 = vpop.f32.mrf.mxu0 }
 0x37c   :  { %v6573_v55 = vadd.f32 %v6498_v5, %v10171_v31  ;;  %7248 = vst [vmem:[#allocation3 + $0x1c8] sm:$0xff] %v7184_v53  ;;  %v7189_v25 = vadd.f32 %v8591_v2, %v6575_v27  ;;  %v7112_v42 = vpop.f32.mrf.mxu1 }
 0x37d   :  { %v8526_v50 = vpop.f32.mrf.mxu0 }
 0x37e   :  { %v6576_v32 = vadd.f32 %v8526_v50, %v10173_v46  ;;  %7253 = vst [vmem:[#allocation3 + $0x1f0] sm:$0xff] %v7189_v25  ;;  %v7187_v6 = vadd.f32 %v7112_v42, %v6573_v55  ;;  %v8592_v8 = vpop.f32.mrf.mxu1 }
 0x37f   :  { %v6501_v9 = vpop.f32.mrf.mxu0 }
 0x380   :  { %v6574_v21 = vadd.f32 %v6501_v9, %v10175_v11  ;;  %7251 = vst [vmem:[#allocation3 + $0x1e0] sm:$0xff] %v7187_v6  ;;  %v7190_v23 = vadd.f32 %v8592_v8, %v6576_v32  ;;  %v7115_v3 = vpop.f32.mrf.mxu1 }
 0x382   :  { %7254 = vst [vmem:[#allocation3 + $0x1f8] sm:$0xff] %v7190_v23  ;;  %v7188_v51 = vadd.f32 %v7115_v3, %v6574_v21 }
 0x384   :  { %7252 = vst [vmem:[#allocation3 + $0x1e8] sm:$0xff] %v7188_v51 }
 0x385   :  { %8687 = shalt.err (!%p8684_p4)
}
 0x386   :  { %s8700_s13 = smov 128   ;;  %s8701_s14 = smov 8  }
 0x387   :  { %7266 = dma.vmem_to_hbm [thread:$0]  %s7261_s11, 8192, %s10227_s5, [#allocation4], %s8700_s13, %s8700_s13, %s8701_s14  }
 0x388   :  { %8696 = dma.done.wait [#allocation4], 8192  }
 0x389   :  { %8697 = vsyncadd [#allocation4], 4294959104 }
 0x38a   :  { %7270 = vsyncpa [#allocation4], 1 }

</bundles_post_ra>
